<compile_context>
chip_gen: v6e
topology: v6e:2x2x1
jax: 0.10.0
libtpu: 0.0.40
codegen_flags: <defaults>
</compile_context>

<pallas_src>
import functools

import jax
import jax.numpy as jnp
import numpy as np
from jax import lax
from jax.experimental import pallas as pl
from jax.experimental.pallas import tpu as pltpu

LANE = 128                       # lanes per batch-tile row (fast axis)
GROUP = 8                        # sublane rows per in-kernel work group (1 vreg tall)
MAX_GROUPS_PER_TILE = 16         # at most 128 sublanes (16K sequences) per grid step
UNROLL_T_MAX = 32                # static unroll limit for the time loop
VMEM_BUDGET = 16 * 1024 * 1024   # conservative: fits v7x's 32 MiB default scoped VMEM


def _cdiv(a, b):
    return -(-a // b)


def _sel3(c0, c1, v0, v1, v2):
    """vals[idx] for idx in {0,1,2} as two lane-parallel selects (no XLU gather)."""
    return jnp.where(c0, v0, jnp.where(c1, v1, v2))


def _make_crf_kernel(T, L, sub, with_loss):
    assert L == 3
    n_groups = sub // GROUP
    unroll = T <= UNROLL_T_MAX

    def kernel(*refs):
        if with_loss:
            (logits_ref, labels_ref, len_ref, start_ref, trans_ref,
             etrans_ref, end_ref, llh_ref, tags_ref, bp_ref) = refs
        else:
            (logits_ref, len_ref, start_ref, trans_ref, end_ref,
             tags_ref, bp_ref) = refs
            labels_ref = etrans_ref = llh_ref = None

        # CRF parameters as SMEM scalar reads (ride the free scalar slot).
        start = [start_ref[0, j] for j in range(L)]
        end = [end_ref[0, j] for j in range(L)]
        trans = [[trans_ref[i, j] for j in range(L)] for i in range(L)]   # i -> j
        etr = ([[etrans_ref[i, j] for j in range(L)] for i in range(L)]
               if with_loss else None)

        def process_group(g, carry):
            r0 = pl.multiple_of(g * GROUP, GROUP)
            rows = pl.ds(r0, GROUP)
            len_g = len_ref[rows, :]                       # (GROUP, LANE) int32
            zero_i = jnp.zeros((GROUP, LANE), jnp.int32)   # hoisted broadcast

            h0 = [logits_ref[0, j, rows, :] for j in range(L)]
            delta = [start[j] + h0[j] for j in range(L)]   # viterbi scores
            if with_loss:
                alpha = [start[j] + h0[j] for j in range(L)]   # log-partition scores
                lab_prev = labels_ref[0, rows, :]
                p0, p1 = lab_prev == 0, lab_prev == 1
                num = (_sel3(p0, p1, start[0], start[1], start[2])
                       + _sel3(p0, p1, h0[0], h0[1], h0[2]))      # gold-path score

            def step(t, num, lab_prev, alpha, delta):
                h = [logits_ref[t, j, rows, :] for j in range(L)]
                valid = len_g > t                          # contiguous length mask

                if with_loss:
                    lab = labels_ref[t, rows, :]
                    e0, e1 = lab == 0, lab == 1            # hoisted compare masks
                    p0, p1 = lab_prev == 0, lab_prev == 1
                    emit = _sel3(e0, e1, h[0], h[1], h[2])
                    tr_rows = [_sel3(e0, e1, trans[i][0], trans[i][1], trans[i][2])
                               for i in range(L)]
                    tr_sc = _sel3(p0, p1, tr_rows[0], tr_rows[1], tr_rows[2])
                    num = jnp.where(valid, num + tr_sc + emit, num)
                    lab_prev = jnp.where(valid, lab, lab_prev)

                    # Forward (log-partition): single stabilization per step and
                    # exp(trans) precomputed -> 3 exp + 3 log per timestep.
                    mx = jnp.maximum(jnp.maximum(alpha[0], alpha[1]), alpha[2])
                    ea = [jnp.exp(alpha[i] - mx) for i in range(L)]
                    new_alpha = []
                    for j in range(L):
                        s = ea[0] * etr[0][j] + ea[1] * etr[1][j] + ea[2] * etr[2][j]
                        new_alpha.append(
                            jnp.where(valid, mx + jnp.log(s) + h[j], alpha[j]))
                    alpha = new_alpha

                # Viterbi max + backpointers packed into one int32 plane
                # (strict '>' keeps first-max ties, matching np.argmax).
                new_delta = []
                packed = None
                for j in range(L):
                    v0 = delta[0] + trans[0][j]
                    v1 = delta[1] + trans[1][j]
                    v2 = delta[2] + trans[2][j]
                    best = v0
                    bp = zero_i
                    bp = jnp.where(v1 > best, 1, bp)
                    best = jnp.maximum(best, v1)
                    bp = jnp.where(v2 > best, 2, bp)
                    best = jnp.maximum(best, v2)
                    bp = jnp.where(valid, bp, j)           # identity bp on padded steps
                    packed = bp if j == 0 else packed | (bp << (2 * j))
                    new_delta.append(jnp.where(valid, best + h[j], delta[j]))
                bp_ref[t] = packed                         # single vst per timestep
                return num, lab_prev, alpha, new_delta

            if with_loss:
                if unroll:
                    for t in range(1, T):
                        num, lab_prev, alpha, delta = step(t, num, lab_prev,
                                                           alpha, delta)
                else:
                    def t_body(t, c):
                        n, lp, a0, a1, a2, d0, d1, d2 = c
                        n, lp, a, d = step(t, n, lp, [a0, a1, a2], [d0, d1, d2])
                        return (n, lp, a[0], a[1], a[2], d[0], d[1], d[2])
                    c = lax.fori_loop(1, T, t_body,
                                      (num, lab_prev, alpha[0], alpha[1], alpha[2],
                                       delta[0], delta[1], delta[2]))
                    num, lab_prev = c[0], c[1]
                    alpha, delta = list(c[2:5]), list(c[5:8])

                # log-likelihood = gold-path score - log-partition
                p0, p1 = lab_prev == 0, lab_prev == 1
                num = num + _sel3(p0, p1, end[0], end[1], end[2])
                f = [alpha[j] + end[j] for j in range(L)]
                mx = jnp.maximum(jnp.maximum(f[0], f[1]), f[2])
                denom = mx + jnp.log(jnp.exp(f[0] - mx) + jnp.exp(f[1] - mx)
                                     + jnp.exp(f[2] - mx))
                llh_ref[rows, :] = num - denom
            else:
                if unroll:
                    for t in range(1, T):
                        _, _, _, delta = step(t, None, None, None, delta)
                else:
                    def t_body(t, c):
                        _, _, _, d = step(t, None, None, None, list(c))
                        return (d[0], d[1], d[2])
                    delta = list(lax.fori_loop(
                        1, T, t_body, (delta[0], delta[1], delta[2])))

            # Viterbi termination + backtrace.
            g0 = delta[0] + end[0]
            g1 = delta[1] + end[1]
            g2 = delta[2] + end[2]
            best = g0
            cur = zero_i
            cur = jnp.where(g1 > best, 1, cur)
            best = jnp.maximum(best, g1)
            cur = jnp.where(g2 > best, 2, cur)
            tags_ref[T - 1, rows, :] = cur

            def backstep(t, cur):
                packed = bp_ref[t]
                cur = _sel3(cur == 0, cur == 1,
                            packed & 3, (packed >> 2) & 3, (packed >> 4) & 3)
                tags_ref[t - 1, rows, :] = cur
                return cur

            if unroll:
                for t in range(T - 1, 0, -1):
                    cur = backstep(t, cur)
            else:
                lax.fori_loop(0, T - 1, lambda i, c: backstep((T - 1) - i, c), cur)

            return carry

        lax.fori_loop(0, n_groups, process_group, 0)

    return kernel


def _batch_tiling(B, T, with_loss):
    """Pick (sublanes per grid step, number of grid steps) for the padded batch."""
    groups_needed = max(1, _cdiv(_cdiv(B, LANE), GROUP))
    # Per-group VMEM footprint with double-buffered pipelined blocks.
    bpg = T * 3 * GROUP * LANE * 4 * 2            # logits in
    bpg += T * GROUP * LANE * 4 * 2               # tags out
    bpg += GROUP * LANE * 4 * 2                   # lengths in
    if with_loss:
        bpg += T * GROUP * LANE * 4 * 2           # labels in
        bpg += GROUP * LANE * 4 * 2               # llh out
    fixed = T * GROUP * LANE * 4                  # packed backpointer scratch (1 group)
    max_groups = max(1, min(MAX_GROUPS_PER_TILE, (VMEM_BUDGET - fixed) // bpg))
    # Keep at least two grid steps when there are >= 2 groups of work so both
    # v7x TensorCores get a share of the batch.
    target_tiles = 2 if groups_needed >= 2 else 1
    groups_per_tile = max(1, min(max_groups, _cdiv(groups_needed, target_tiles)))
    nb = _cdiv(groups_needed, groups_per_tile)
    return groups_per_tile * GROUP, nb


@functools.partial(jax.jit, static_argnames=("compute_llh",))
def crf_pallas(logits, labels, mask, start, trans, end, *, compute_llh=True):
    """logits (B,T,3); labels (B,T) int or None; mask (B,T) contiguous length mask.
    Returns (llh (B,) or None, tags (B,T))."""
    B, T, L = logits.shape
    assert L == 3, "kernel is unrolled for num_labels == 3"
    sub, nb = _batch_tiling(B, T, compute_llh)
    rows = sub * nb
    Bp = rows * LANE
    pad = Bp - B

    # Single layout pass: cast + transpose to (T, L, B), pad the batch and fold
    # it onto (sublane, lane). XLA fuses this into one copy of the inputs.
    # TODO(synk): produce logits T-major upstream to avoid even this copy (v5e).
    lg = jnp.transpose(logits.astype(jnp.float32), (1, 2, 0))
    lg = jnp.pad(lg, ((0, 0), (0, 0), (0, pad))).reshape(T, L, rows, LANE)
    # Dense mask -> per-sequence length (assumed contiguous, mask[:, 0] == 1).
    lengths = jnp.sum(mask.astype(jnp.float32) > 0.5, axis=1).astype(jnp.int32)
    ln = jnp.pad(lengths, (0, pad)).reshape(rows, LANE)

    smem = pl.BlockSpec(memory_space=pltpu.MemorySpace.SMEM)
    cparams = pltpu.CompilerParams(dimension_semantics=("parallel",))
    scratch = [pltpu.VMEM((T, GROUP, LANE), jnp.int32)]   # packed backpointers
    kernel = _make_crf_kernel(T, L, sub, compute_llh)

    start32 = start.astype(jnp.float32)
    trans32 = trans.astype(jnp.float32)
    end32 = end.astype(jnp.float32)

    if compute_llh:
        lb = jnp.transpose(labels.astype(jnp.int32), (1, 0))
        lb = jnp.pad(lb, ((0, 0), (0, pad))).reshape(T, rows, LANE)
        llh, tags = pl.pallas_call(
            kernel,
            out_shape=(jax.ShapeDtypeStruct((rows, LANE), jnp.float32),
                       jax.ShapeDtypeStruct((T, rows, LANE), jnp.int32)),
            grid=(nb,),
            in_specs=[
                pl.BlockSpec((T, L, sub, LANE), lambda i: (0, 0, i, 0)),
                pl.BlockSpec((T, sub, LANE), lambda i: (0, i, 0)),
                pl.BlockSpec((sub, LANE), lambda i: (i, 0)),
                smem, smem, smem, smem,          # start (1,3) / trans / exp(trans) / end
            ],
            out_specs=(pl.BlockSpec((sub, LANE), lambda i: (i, 0)),
                       pl.BlockSpec((T, sub, LANE), lambda i: (0, i, 0))),
            scratch_shapes=scratch,
            compiler_params=cparams,
        )(lg, lb, ln, start32, trans32, jnp.exp(trans32), end32)
        llh = llh.reshape(Bp)[:B]
    else:
        # Decode-only kernel: no labels DMA, no numerator, no log-partition.
        tags = pl.pallas_call(
            kernel,
            out_shape=jax.ShapeDtypeStruct((T, rows, LANE), jnp.int32),
            grid=(nb,),
            in_specs=[
                pl.BlockSpec((T, L, sub, LANE), lambda i: (0, 0, i, 0)),
                pl.BlockSpec((sub, LANE), lambda i: (i, 0)),
                smem, smem, smem,
            ],
            out_specs=pl.BlockSpec((T, sub, LANE), lambda i: (0, i, 0)),
            scratch_shapes=scratch,
            compiler_params=cparams,
        )(lg, ln, start32, trans32, end32)
        llh = None

    tags = jnp.transpose(tags.reshape(T, Bp)[:, :B], (1, 0))
    return llh, tags


def init_crf_params(key, num_labels=3):
    # TorchCRF initializes start/trans/end with uniform(-0.1, 0.1)
    k1, k2, k3 = jax.random.split(key, 3)
    start = jax.random.uniform(k1, (1, num_labels), jnp.float32, -0.1, 0.1)
    trans = jax.random.uniform(k2, (num_labels, num_labels), jnp.float32, -0.1, 0.1)
    end = jax.random.uniform(k3, (1, num_labels), jnp.float32, -0.1, 0.1)
    return start, trans, end


def reclassifier_forward(params, logits, labels=None, mask=None):
    """Mirrors Reclassifier.forward: returns (loss, tags)."""
    start, trans, end = params
    B, T, _ = logits.shape
    if mask is None:
        mask = jnp.ones((B, T), jnp.float32)
    if labels is None:
        # Decode-only path: Viterbi only; dense (B, T) tags (pads carry last tag).
        _, tags = crf_pallas(logits, None, mask, start, trans, end,
                             compute_llh=False)
        return None, tags
    llh, tags = crf_pallas(logits, labels, mask, start, trans, end)
    loss = -jnp.mean(llh)
    return loss, tags


# ---------------------- pure-numpy reference (for checking) ------------------
def ref_crf(logits, labels, mask, start, trans, end):
    # float32 reference so the Viterbi path is bit-comparable with the kernel.
    logits = np.asarray(logits, np.float32)
    labels = np.asarray(labels)
    mask = np.asarray(mask, np.float32)
    start = np.asarray(start, np.float32)[0]
    trans = np.asarray(trans, np.float32)
    end = np.asarray(end, np.float32)[0]
    B, T, L = logits.shape
    llh = np.zeros(B, np.float32)
    tags = np.zeros((B, T), np.int32)
    for b in range(B):
        num = start[labels[b, 0]] + logits[b, 0, labels[b, 0]]
        prev = labels[b, 0]
        for t in range(1, T):
            if mask[b, t] > 0.5:
                num += trans[prev, labels[b, t]] + logits[b, t, labels[b, t]]
                prev = labels[b, t]
        num += end[prev]
        alpha = start + logits[b, 0]
        for t in range(1, T):
            if mask[b, t] > 0.5:
                sc = alpha[:, None] + trans
                m = sc.max(axis=0)
                alpha = m + np.log(np.exp(sc - m).sum(axis=0)) + logits[b, t]
        fin = alpha + end
        m = fin.max()
        llh[b] = num - (m + np.log(np.exp(fin - m).sum()))
        delta = start + logits[b, 0]
        bps = []
        for t in range(1, T):
            if mask[b, t] > 0.5:
                sc = delta[:, None] + trans
                bps.append(sc.argmax(axis=0))
                delta = sc.max(axis=0) + logits[b, t]
            else:
                bps.append(np.arange(L))
        cur = int((delta + end).argmax())
        tags[b, T - 1] = cur
        for t in range(T - 1, 0, -1):
            cur = int(bps[t - 1][cur])
            tags[b, t - 1] = cur
    return llh, tags


if __name__ == "__main__":
    key = jax.random.PRNGKey(0)
    k_logits, k_labels, k_params, k2 = jax.random.split(key, 4)

    # ---- Test 1: small shapes (static-unrolled T path) ----
    B, T, L = 2, 8, 3
    logits = jax.random.normal(k_logits, (B, T, L), jnp.float32)
    labels = jax.random.randint(k_labels, (B, T), 0, L, jnp.int32)
    lengths = jnp.array([T, 5], jnp.int32)
    mask = (jnp.arange(T)[None, :] < lengths[:, None]).astype(jnp.float32)
    params = init_crf_params(k_params, num_labels=L)

    loss, tags = reclassifier_forward(params, logits, labels, mask)
    loss = jax.block_until_ready(loss)
    tags = jax.block_until_ready(tags)

    llh_k, tags_k = crf_pallas(logits, labels, mask, *params)
    llh_k = jax.block_until_ready(llh_k)
    llh_r, tags_r = ref_crf(logits, labels, mask, *params)
    np.testing.assert_allclose(np.asarray(llh_k), llh_r, rtol=1e-4, atol=1e-3)
    np.testing.assert_allclose(float(loss), float(-llh_r.mean()), rtol=1e-4, atol=1e-3)
    assert np.array_equal(np.asarray(tags_k), tags_r)

    # decode-only path (labels=None) exercises the decode kernel
    _, tags_d = reclassifier_forward(params, logits, None, None)
    tags_d = jax.block_until_ready(tags_d)
    _, tags_dr = ref_crf(logits, labels, np.ones((B, T), np.float32), *params)
    assert np.array_equal(np.asarray(tags_d), tags_dr)

    # ---- Test 2: bigger batch + T > UNROLL_T_MAX (fori_loop time path) ----
    B2, T2 = 300, 40
    ka, kb, kc = jax.random.split(k2, 3)
    logits2 = jax.random.normal(ka, (B2, T2, L), jnp.float32)
    labels2 = jax.random.randint(kb, (B2, T2), 0, L, jnp.int32)
    lens2 = jax.random.randint(kc, (B2,), 1, T2 + 1, jnp.int32)
    mask2 = (jnp.arange(T2)[None, :] < lens2[:, None]).astype(jnp.float32)
    llh2, tags2 = crf_pallas(logits2, labels2, mask2, *params)
    llh2 = jax.block_until_ready(llh2)
    tags2 = jax.block_until_ready(tags2)
    llh2_r, tags2_r = ref_crf(logits2, labels2, mask2, *params)
    np.testing.assert_allclose(np.asarray(llh2), llh2_r, rtol=5e-4, atol=5e-3)
    assert np.array_equal(np.asarray(tags2), tags2_r)

    print("KERNEL_OK")
</pallas_src>

<mosaic_0001>
module attributes {stable_mosaic.version = 11 : i64} {
  func.func @kernel(%arg0: i32, %arg1: memref<8x3x8x128xf32, #tpu.memory_space<vmem>>, %arg2: memref<8x8x128xi32, #tpu.memory_space<vmem>>, %arg3: memref<8x128xi32, #tpu.memory_space<vmem>>, %arg4: memref<1x3xf32, #tpu.memory_space<smem>>, %arg5: memref<3x3xf32, #tpu.memory_space<smem>>, %arg6: memref<3x3xf32, #tpu.memory_space<smem>>, %arg7: memref<1x3xf32, #tpu.memory_space<smem>>, %arg8: memref<8x128xf32, #tpu.memory_space<vmem>>, %arg9: memref<8x8x128xi32, #tpu.memory_space<vmem>>, %arg10: memref<8x8x128xi32, #tpu.memory_space<vmem>>) attributes {dimension_semantics = [#tpu.dimension_semantics<parallel>], iteration_bounds = array<i64: 1>, scalar_prefetch = 0 : i64, scratch_operands = 1 : i64, tpu.core_type = #tpu.core_type<tc>, window_params = [{transform_indices = @transform_0, window_bounds = array<i64: 8, 3, 8, 128>}, {transform_indices = @transform_1, window_bounds = array<i64: 8, 8, 128>}, {transform_indices = @transform_2, window_bounds = array<i64: 8, 128>}, {transform_indices = @transform_3, window_bounds = array<i64: 1, 3>}, {transform_indices = @transform_4, window_bounds = array<i64: 3, 3>}, {transform_indices = @transform_5, window_bounds = array<i64: 3, 3>}, {transform_indices = @transform_6, window_bounds = array<i64: 1, 3>}, {transform_indices = @transform_7, window_bounds = array<i64: 8, 128>}, {transform_indices = @transform_8, window_bounds = array<i64: 8, 8, 128>}]} {
    %c0 = arith.constant 0 : index
    %c0_0 = arith.constant 0 : index
    %0 = memref.load %arg4[%c0, %c0_0] : memref<1x3xf32, #tpu.memory_space<smem>>
    %c0_1 = arith.constant 0 : index
    %c1 = arith.constant 1 : index
    %1 = memref.load %arg4[%c0_1, %c1] : memref<1x3xf32, #tpu.memory_space<smem>>
    %c0_2 = arith.constant 0 : index
    %c2 = arith.constant 2 : index
    %2 = memref.load %arg4[%c0_2, %c2] : memref<1x3xf32, #tpu.memory_space<smem>>
    %c0_3 = arith.constant 0 : index
    %c0_4 = arith.constant 0 : index
    %3 = memref.load %arg7[%c0_3, %c0_4] : memref<1x3xf32, #tpu.memory_space<smem>>
    %c0_5 = arith.constant 0 : index
    %c1_6 = arith.constant 1 : index
    %4 = memref.load %arg7[%c0_5, %c1_6] : memref<1x3xf32, #tpu.memory_space<smem>>
    %c0_7 = arith.constant 0 : index
    %c2_8 = arith.constant 2 : index
    %5 = memref.load %arg7[%c0_7, %c2_8] : memref<1x3xf32, #tpu.memory_space<smem>>
    %c0_9 = arith.constant 0 : index
    %c0_10 = arith.constant 0 : index
    %6 = memref.load %arg5[%c0_9, %c0_10] : memref<3x3xf32, #tpu.memory_space<smem>>
    %c0_11 = arith.constant 0 : index
    %c1_12 = arith.constant 1 : index
    %7 = memref.load %arg5[%c0_11, %c1_12] : memref<3x3xf32, #tpu.memory_space<smem>>
    %c0_13 = arith.constant 0 : index
    %c2_14 = arith.constant 2 : index
    %8 = memref.load %arg5[%c0_13, %c2_14] : memref<3x3xf32, #tpu.memory_space<smem>>
    %c1_15 = arith.constant 1 : index
    %c0_16 = arith.constant 0 : index
    %9 = memref.load %arg5[%c1_15, %c0_16] : memref<3x3xf32, #tpu.memory_space<smem>>
    %c1_17 = arith.constant 1 : index
    %c1_18 = arith.constant 1 : index
    %10 = memref.load %arg5[%c1_17, %c1_18] : memref<3x3xf32, #tpu.memory_space<smem>>
    %c1_19 = arith.constant 1 : index
    %c2_20 = arith.constant 2 : index
    %11 = memref.load %arg5[%c1_19, %c2_20] : memref<3x3xf32, #tpu.memory_space<smem>>
    %c2_21 = arith.constant 2 : index
    %c0_22 = arith.constant 0 : index
    %12 = memref.load %arg5[%c2_21, %c0_22] : memref<3x3xf32, #tpu.memory_space<smem>>
    %c2_23 = arith.constant 2 : index
    %c1_24 = arith.constant 1 : index
    %13 = memref.load %arg5[%c2_23, %c1_24] : memref<3x3xf32, #tpu.memory_space<smem>>
    %c2_25 = arith.constant 2 : index
    %c2_26 = arith.constant 2 : index
    %14 = memref.load %arg5[%c2_25, %c2_26] : memref<3x3xf32, #tpu.memory_space<smem>>
    %c0_27 = arith.constant 0 : index
    %c0_28 = arith.constant 0 : index
    %15 = memref.load %arg6[%c0_27, %c0_28] : memref<3x3xf32, #tpu.memory_space<smem>>
    %c0_29 = arith.constant 0 : index
    %c1_30 = arith.constant 1 : index
    %16 = memref.load %arg6[%c0_29, %c1_30] : memref<3x3xf32, #tpu.memory_space<smem>>
    %c0_31 = arith.constant 0 : index
    %c2_32 = arith.constant 2 : index
    %17 = memref.load %arg6[%c0_31, %c2_32] : memref<3x3xf32, #tpu.memory_space<smem>>
    %c1_33 = arith.constant 1 : index
    %c0_34 = arith.constant 0 : index
    %18 = memref.load %arg6[%c1_33, %c0_34] : memref<3x3xf32, #tpu.memory_space<smem>>
    %c1_35 = arith.constant 1 : index
    %c1_36 = arith.constant 1 : index
    %19 = memref.load %arg6[%c1_35, %c1_36] : memref<3x3xf32, #tpu.memory_space<smem>>
    %c1_37 = arith.constant 1 : index
    %c2_38 = arith.constant 2 : index
    %20 = memref.load %arg6[%c1_37, %c2_38] : memref<3x3xf32, #tpu.memory_space<smem>>
    %c2_39 = arith.constant 2 : index
    %c0_40 = arith.constant 0 : index
    %21 = memref.load %arg6[%c2_39, %c0_40] : memref<3x3xf32, #tpu.memory_space<smem>>
    %c2_41 = arith.constant 2 : index
    %c1_42 = arith.constant 1 : index
    %22 = memref.load %arg6[%c2_41, %c1_42] : memref<3x3xf32, #tpu.memory_space<smem>>
    %c2_43 = arith.constant 2 : index
    %c2_44 = arith.constant 2 : index
    %23 = memref.load %arg6[%c2_43, %c2_44] : memref<3x3xf32, #tpu.memory_space<smem>>
    %c0_i32 = arith.constant 0 : i32
    %c8_i32 = arith.constant 8 : i32
    %24 = arith.muli %c0_i32, %c8_i32 : i32
    %25 = tpu.assume_multiple %24, 8 : i32
    %26 = arith.index_cast %25 : i32 to index
    %c0_45 = arith.constant 0 : index
    %27 = vector.load %arg3[%26, %c0_45] : memref<8x128xi32, #tpu.memory_space<vmem>>, vector<8x128xi32>
    %c0_i32_46 = arith.constant 0 : i32
    %28 = vector.broadcast %c0_i32_46 : i32 to vector<8x128xi32>
    %c0_47 = arith.constant 0 : index
    %c0_48 = arith.constant 0 : index
    %29 = arith.index_cast %25 : i32 to index
    %c0_49 = arith.constant 0 : index
    %30 = vector.load %arg1[%c0_47, %c0_48, %29, %c0_49] : memref<8x3x8x128xf32, #tpu.memory_space<vmem>>, vector<1x1x8x128xf32>
    %31 = vector.shape_cast %30 : vector<1x1x8x128xf32> to vector<8x128xf32>
    %c0_50 = arith.constant 0 : index
    %c1_51 = arith.constant 1 : index
    %32 = arith.index_cast %25 : i32 to index
    %c0_52 = arith.constant 0 : index
    %33 = vector.load %arg1[%c0_50, %c1_51, %32, %c0_52] : memref<8x3x8x128xf32, #tpu.memory_space<vmem>>, vector<1x1x8x128xf32>
    %34 = vector.shape_cast %33 : vector<1x1x8x128xf32> to vector<8x128xf32>
    %c0_53 = arith.constant 0 : index
    %c2_54 = arith.constant 2 : index
    %35 = arith.index_cast %25 : i32 to index
    %c0_55 = arith.constant 0 : index
    %36 = vector.load %arg1[%c0_53, %c2_54, %35, %c0_55] : memref<8x3x8x128xf32, #tpu.memory_space<vmem>>, vector<1x1x8x128xf32>
    %37 = vector.shape_cast %36 : vector<1x1x8x128xf32> to vector<8x128xf32>
    %38 = vector.broadcast %0 : f32 to vector<8x128xf32>
    %39 = arith.addf %38, %31 : vector<8x128xf32>
    %40 = vector.broadcast %1 : f32 to vector<8x128xf32>
    %41 = arith.addf %40, %34 : vector<8x128xf32>
    %42 = vector.broadcast %2 : f32 to vector<8x128xf32>
    %43 = arith.addf %42, %37 : vector<8x128xf32>
    %44 = vector.broadcast %0 : f32 to vector<8x128xf32>
    %45 = arith.addf %44, %31 : vector<8x128xf32>
    %46 = vector.broadcast %1 : f32 to vector<8x128xf32>
    %47 = arith.addf %46, %34 : vector<8x128xf32>
    %48 = vector.broadcast %2 : f32 to vector<8x128xf32>
    %49 = arith.addf %48, %37 : vector<8x128xf32>
    %c0_56 = arith.constant 0 : index
    %50 = arith.index_cast %25 : i32 to index
    %c0_57 = arith.constant 0 : index
    %51 = vector.load %arg2[%c0_56, %50, %c0_57] : memref<8x8x128xi32, #tpu.memory_space<vmem>>, vector<1x8x128xi32>
    %52 = vector.shape_cast %51 : vector<1x8x128xi32> to vector<8x128xi32>
    %c0_i32_58 = arith.constant 0 : i32
    %53 = vector.broadcast %c0_i32_58 : i32 to vector<8x128xi32>
    %54 = arith.cmpi eq, %52, %53 : vector<8x128xi32>
    %c1_i32 = arith.constant 1 : i32
    %55 = vector.broadcast %c1_i32 : i32 to vector<8x128xi32>
    %56 = arith.cmpi eq, %52, %55 : vector<8x128xi32>
    %57 = vector.broadcast %1 : f32 to vector<8x128xf32>
    %58 = vector.broadcast %2 : f32 to vector<8x128xf32>
    %59 = arith.select %56, %57, %58 : vector<8x128xi1>, vector<8x128xf32>
    %60 = vector.broadcast %0 : f32 to vector<8x128xf32>
    %61 = arith.select %54, %60, %59 : vector<8x128xi1>, vector<8x128xf32>
    %62 = arith.select %56, %34, %37 : vector<8x128xi1>, vector<8x128xf32>
    %63 = arith.select %54, %31, %62 : vector<8x128xi1>, vector<8x128xf32>
    %64 = arith.addf %61, %63 : vector<8x128xf32>
    %c1_59 = arith.constant 1 : index
    %c0_60 = arith.constant 0 : index
    %65 = arith.index_cast %25 : i32 to index
    %c0_61 = arith.constant 0 : index
    %66 = vector.load %arg1[%c1_59, %c0_60, %65, %c0_61] : memref<8x3x8x128xf32, #tpu.memory_space<vmem>>, vector<1x1x8x128xf32>
    %67 = vector.shape_cast %66 : vector<1x1x8x128xf32> to vector<8x128xf32>
    %c1_62 = arith.constant 1 : index
    %c1_63 = arith.constant 1 : index
    %68 = arith.index_cast %25 : i32 to index
    %c0_64 = arith.constant 0 : index
    %69 = vector.load %arg1[%c1_62, %c1_63, %68, %c0_64] : memref<8x3x8x128xf32, #tpu.memory_space<vmem>>, vector<1x1x8x128xf32>
    %70 = vector.shape_cast %69 : vector<1x1x8x128xf32> to vector<8x128xf32>
    %c1_65 = arith.constant 1 : index
    %c2_66 = arith.constant 2 : index
    %71 = arith.index_cast %25 : i32 to index
    %c0_67 = arith.constant 0 : index
    %72 = vector.load %arg1[%c1_65, %c2_66, %71, %c0_67] : memref<8x3x8x128xf32, #tpu.memory_space<vmem>>, vector<1x1x8x128xf32>
    %73 = vector.shape_cast %72 : vector<1x1x8x128xf32> to vector<8x128xf32>
    %c1_i32_68 = arith.constant 1 : i32
    %74 = vector.broadcast %c1_i32_68 : i32 to vector<8x128xi32>
    %75 = arith.cmpi sgt, %27, %74 : vector<8x128xi32>
    %c1_69 = arith.constant 1 : index
    %76 = arith.index_cast %25 : i32 to index
    %c0_70 = arith.constant 0 : index
    %77 = vector.load %arg2[%c1_69, %76, %c0_70] : memref<8x8x128xi32, #tpu.memory_space<vmem>>, vector<1x8x128xi32>
    %78 = vector.shape_cast %77 : vector<1x8x128xi32> to vector<8x128xi32>
    %c0_i32_71 = arith.constant 0 : i32
    %79 = vector.broadcast %c0_i32_71 : i32 to vector<8x128xi32>
    %80 = arith.cmpi eq, %78, %79 : vector<8x128xi32>
    %c1_i32_72 = arith.constant 1 : i32
    %81 = vector.broadcast %c1_i32_72 : i32 to vector<8x128xi32>
    %82 = arith.cmpi eq, %78, %81 : vector<8x128xi32>
    %c0_i32_73 = arith.constant 0 : i32
    %83 = vector.broadcast %c0_i32_73 : i32 to vector<8x128xi32>
    %84 = arith.cmpi eq, %52, %83 : vector<8x128xi32>
    %c1_i32_74 = arith.constant 1 : i32
    %85 = vector.broadcast %c1_i32_74 : i32 to vector<8x128xi32>
    %86 = arith.cmpi eq, %52, %85 : vector<8x128xi32>
    %87 = arith.select %82, %70, %73 : vector<8x128xi1>, vector<8x128xf32>
    %88 = arith.select %80, %67, %87 : vector<8x128xi1>, vector<8x128xf32>
    %89 = vector.broadcast %7 : f32 to vector<8x128xf32>
    %90 = vector.broadcast %8 : f32 to vector<8x128xf32>
    %91 = arith.select %82, %89, %90 : vector<8x128xi1>, vector<8x128xf32>
    %92 = vector.broadcast %6 : f32 to vector<8x128xf32>
    %93 = arith.select %80, %92, %91 : vector<8x128xi1>, vector<8x128xf32>
    %94 = vector.broadcast %10 : f32 to vector<8x128xf32>
    %95 = vector.broadcast %11 : f32 to vector<8x128xf32>
    %96 = arith.select %82, %94, %95 : vector<8x128xi1>, vector<8x128xf32>
    %97 = vector.broadcast %9 : f32 to vector<8x128xf32>
    %98 = arith.select %80, %97, %96 : vector<8x128xi1>, vector<8x128xf32>
    %99 = vector.broadcast %13 : f32 to vector<8x128xf32>
    %100 = vector.broadcast %14 : f32 to vector<8x128xf32>
    %101 = arith.select %82, %99, %100 : vector<8x128xi1>, vector<8x128xf32>
    %102 = vector.broadcast %12 : f32 to vector<8x128xf32>
    %103 = arith.select %80, %102, %101 : vector<8x128xi1>, vector<8x128xf32>
    %104 = arith.select %86, %98, %103 : vector<8x128xi1>, vector<8x128xf32>
    %105 = arith.select %84, %93, %104 : vector<8x128xi1>, vector<8x128xf32>
    %106 = arith.addf %64, %105 : vector<8x128xf32>
    %107 = arith.addf %106, %88 : vector<8x128xf32>
    %108 = arith.select %75, %107, %64 : vector<8x128xi1>, vector<8x128xf32>
    %109 = arith.select %75, %78, %52 : vector<8x128xi1>, vector<8x128xi32>
    %110 = arith.maximumf %45, %47 : vector<8x128xf32>
    %111 = arith.maximumf %110, %49 : vector<8x128xf32>
    %112 = arith.subf %45, %111 : vector<8x128xf32>
    %113 = math.exp %112 : vector<8x128xf32>
    %114 = arith.subf %47, %111 : vector<8x128xf32>
    %115 = math.exp %114 : vector<8x128xf32>
    %116 = arith.subf %49, %111 : vector<8x128xf32>
    %117 = math.exp %116 : vector<8x128xf32>
    %118 = vector.broadcast %15 : f32 to vector<8x128xf32>
    %119 = arith.mulf %113, %118 : vector<8x128xf32>
    %120 = vector.broadcast %18 : f32 to vector<8x128xf32>
    %121 = arith.mulf %115, %120 : vector<8x128xf32>
    %122 = arith.addf %119, %121 : vector<8x128xf32>
    %123 = vector.broadcast %21 : f32 to vector<8x128xf32>
    %124 = arith.mulf %117, %123 : vector<8x128xf32>
    %125 = arith.addf %122, %124 : vector<8x128xf32>
    %126 = math.log %125 : vector<8x128xf32>
    %127 = arith.addf %111, %126 : vector<8x128xf32>
    %128 = arith.addf %127, %67 : vector<8x128xf32>
    %129 = arith.select %75, %128, %45 : vector<8x128xi1>, vector<8x128xf32>
    %130 = vector.broadcast %16 : f32 to vector<8x128xf32>
    %131 = arith.mulf %113, %130 : vector<8x128xf32>
    %132 = vector.broadcast %19 : f32 to vector<8x128xf32>
    %133 = arith.mulf %115, %132 : vector<8x128xf32>
    %134 = arith.addf %131, %133 : vector<8x128xf32>
    %135 = vector.broadcast %22 : f32 to vector<8x128xf32>
    %136 = arith.mulf %117, %135 : vector<8x128xf32>
    %137 = arith.addf %134, %136 : vector<8x128xf32>
    %138 = math.log %137 : vector<8x128xf32>
    %139 = arith.addf %111, %138 : vector<8x128xf32>
    %140 = arith.addf %139, %70 : vector<8x128xf32>
    %141 = arith.select %75, %140, %47 : vector<8x128xi1>, vector<8x128xf32>
    %142 = vector.broadcast %17 : f32 to vector<8x128xf32>
    %143 = arith.mulf %113, %142 : vector<8x128xf32>
    %144 = vector.broadcast %20 : f32 to vector<8x128xf32>
    %145 = arith.mulf %115, %144 : vector<8x128xf32>
    %146 = arith.addf %143, %145 : vector<8x128xf32>
    %147 = vector.broadcast %23 : f32 to vector<8x128xf32>
    %148 = arith.mulf %117, %147 : vector<8x128xf32>
    %149 = arith.addf %146, %148 : vector<8x128xf32>
    %150 = math.log %149 : vector<8x128xf32>
    %151 = arith.addf %111, %150 : vector<8x128xf32>
    %152 = arith.addf %151, %73 : vector<8x128xf32>
    %153 = arith.select %75, %152, %49 : vector<8x128xi1>, vector<8x128xf32>
    %154 = vector.broadcast %6 : f32 to vector<8x128xf32>
    %155 = arith.addf %39, %154 : vector<8x128xf32>
    %156 = vector.broadcast %9 : f32 to vector<8x128xf32>
    %157 = arith.addf %41, %156 : vector<8x128xf32>
    %158 = vector.broadcast %12 : f32 to vector<8x128xf32>
    %159 = arith.addf %43, %158 : vector<8x128xf32>
    %160 = arith.cmpf ogt, %157, %155 : vector<8x128xf32>
    %c1_i32_75 = arith.constant 1 : i32
    %161 = vector.broadcast %c1_i32_75 : i32 to vector<8x128xi32>
    %162 = arith.select %160, %161, %28 : vector<8x128xi1>, vector<8x128xi32>
    %163 = arith.maximumf %155, %157 : vector<8x128xf32>
    %164 = arith.cmpf ogt, %159, %163 : vector<8x128xf32>
    %c2_i32 = arith.constant 2 : i32
    %165 = vector.broadcast %c2_i32 : i32 to vector<8x128xi32>
    %166 = arith.select %164, %165, %162 : vector<8x128xi1>, vector<8x128xi32>
    %167 = arith.maximumf %163, %159 : vector<8x128xf32>
    %c0_i32_76 = arith.constant 0 : i32
    %168 = vector.broadcast %c0_i32_76 : i32 to vector<8x128xi32>
    %169 = arith.select %75, %166, %168 : vector<8x128xi1>, vector<8x128xi32>
    %170 = arith.addf %167, %67 : vector<8x128xf32>
    %171 = arith.select %75, %170, %39 : vector<8x128xi1>, vector<8x128xf32>
    %172 = vector.broadcast %7 : f32 to vector<8x128xf32>
    %173 = arith.addf %39, %172 : vector<8x128xf32>
    %174 = vector.broadcast %10 : f32 to vector<8x128xf32>
    %175 = arith.addf %41, %174 : vector<8x128xf32>
    %176 = vector.broadcast %13 : f32 to vector<8x128xf32>
    %177 = arith.addf %43, %176 : vector<8x128xf32>
    %178 = arith.cmpf ogt, %175, %173 : vector<8x128xf32>
    %c1_i32_77 = arith.constant 1 : i32
    %179 = vector.broadcast %c1_i32_77 : i32 to vector<8x128xi32>
    %180 = arith.select %178, %179, %28 : vector<8x128xi1>, vector<8x128xi32>
    %181 = arith.maximumf %173, %175 : vector<8x128xf32>
    %182 = arith.cmpf ogt, %177, %181 : vector<8x128xf32>
    %c2_i32_78 = arith.constant 2 : i32
    %183 = vector.broadcast %c2_i32_78 : i32 to vector<8x128xi32>
    %184 = arith.select %182, %183, %180 : vector<8x128xi1>, vector<8x128xi32>
    %185 = arith.maximumf %181, %177 : vector<8x128xf32>
    %c1_i32_79 = arith.constant 1 : i32
    %186 = vector.broadcast %c1_i32_79 : i32 to vector<8x128xi32>
    %187 = arith.select %75, %184, %186 : vector<8x128xi1>, vector<8x128xi32>
    %c2_i32_80 = arith.constant 2 : i32
    %188 = vector.broadcast %c2_i32_80 : i32 to vector<8x128xi32>
    %189 = arith.shli %187, %188 : vector<8x128xi32>
    %190 = arith.ori %169, %189 : vector<8x128xi32>
    %191 = arith.addf %185, %70 : vector<8x128xf32>
    %192 = arith.select %75, %191, %41 : vector<8x128xi1>, vector<8x128xf32>
    %193 = vector.broadcast %8 : f32 to vector<8x128xf32>
    %194 = arith.addf %39, %193 : vector<8x128xf32>
    %195 = vector.broadcast %11 : f32 to vector<8x128xf32>
    %196 = arith.addf %41, %195 : vector<8x128xf32>
    %197 = vector.broadcast %14 : f32 to vector<8x128xf32>
    %198 = arith.addf %43, %197 : vector<8x128xf32>
    %199 = arith.cmpf ogt, %196, %194 : vector<8x128xf32>
    %c1_i32_81 = arith.constant 1 : i32
    %200 = vector.broadcast %c1_i32_81 : i32 to vector<8x128xi32>
    %201 = arith.select %199, %200, %28 : vector<8x128xi1>, vector<8x128xi32>
    %202 = arith.maximumf %194, %196 : vector<8x128xf32>
    %203 = arith.cmpf ogt, %198, %202 : vector<8x128xf32>
    %c2_i32_82 = arith.constant 2 : i32
    %204 = vector.broadcast %c2_i32_82 : i32 to vector<8x128xi32>
    %205 = arith.select %203, %204, %201 : vector<8x128xi1>, vector<8x128xi32>
    %206 = arith.maximumf %202, %198 : vector<8x128xf32>
    %c2_i32_83 = arith.constant 2 : i32
    %207 = vector.broadcast %c2_i32_83 : i32 to vector<8x128xi32>
    %208 = arith.select %75, %205, %207 : vector<8x128xi1>, vector<8x128xi32>
    %c4_i32 = arith.constant 4 : i32
    %209 = vector.broadcast %c4_i32 : i32 to vector<8x128xi32>
    %210 = arith.shli %208, %209 : vector<8x128xi32>
    %211 = arith.ori %190, %210 : vector<8x128xi32>
    %212 = arith.addf %206, %73 : vector<8x128xf32>
    %213 = arith.select %75, %212, %43 : vector<8x128xi1>, vector<8x128xf32>
    %c1_84 = arith.constant 1 : index
    %c0_85 = arith.constant 0 : index
    %c0_86 = arith.constant 0 : index
    %214 = vector.load %arg10[%c1_84, %c0_85, %c0_86] : memref<8x8x128xi32, #tpu.memory_space<vmem>>, vector<1x8x128xi32>
    %215 = vector.shape_cast %214 : vector<1x8x128xi32> to vector<8x128xi32>
    %216 = vector.shape_cast %211 : vector<8x128xi32> to vector<1x8x128xi32>
    tpu.vector_store %arg10[%c1_84, %c0_85, %c0_86], %216 {strides = array<i32>} : memref<8x8x128xi32, #tpu.memory_space<vmem>>, vector<1x8x128xi32>,
    %c2_87 = arith.constant 2 : index
    %c0_88 = arith.constant 0 : index
    %217 = arith.index_cast %25 : i32 to index
    %c0_89 = arith.constant 0 : index
    %218 = vector.load %arg1[%c2_87, %c0_88, %217, %c0_89] : memref<8x3x8x128xf32, #tpu.memory_space<vmem>>, vector<1x1x8x128xf32>
    %219 = vector.shape_cast %218 : vector<1x1x8x128xf32> to vector<8x128xf32>
    %c2_90 = arith.constant 2 : index
    %c1_91 = arith.constant 1 : index
    %220 = arith.index_cast %25 : i32 to index
    %c0_92 = arith.constant 0 : index
    %221 = vector.load %arg1[%c2_90, %c1_91, %220, %c0_92] : memref<8x3x8x128xf32, #tpu.memory_space<vmem>>, vector<1x1x8x128xf32>
    %222 = vector.shape_cast %221 : vector<1x1x8x128xf32> to vector<8x128xf32>
    %c2_93 = arith.constant 2 : index
    %c2_94 = arith.constant 2 : index
    %223 = arith.index_cast %25 : i32 to index
    %c0_95 = arith.constant 0 : index
    %224 = vector.load %arg1[%c2_93, %c2_94, %223, %c0_95] : memref<8x3x8x128xf32, #tpu.memory_space<vmem>>, vector<1x1x8x128xf32>
    %225 = vector.shape_cast %224 : vector<1x1x8x128xf32> to vector<8x128xf32>
    %c2_i32_96 = arith.constant 2 : i32
    %226 = vector.broadcast %c2_i32_96 : i32 to vector<8x128xi32>
    %227 = arith.cmpi sgt, %27, %226 : vector<8x128xi32>
    %c2_97 = arith.constant 2 : index
    %228 = arith.index_cast %25 : i32 to index
    %c0_98 = arith.constant 0 : index
    %229 = vector.load %arg2[%c2_97, %228, %c0_98] : memref<8x8x128xi32, #tpu.memory_space<vmem>>, vector<1x8x128xi32>
    %230 = vector.shape_cast %229 : vector<1x8x128xi32> to vector<8x128xi32>
    %c0_i32_99 = arith.constant 0 : i32
    %231 = vector.broadcast %c0_i32_99 : i32 to vector<8x128xi32>
    %232 = arith.cmpi eq, %230, %231 : vector<8x128xi32>
    %c1_i32_100 = arith.constant 1 : i32
    %233 = vector.broadcast %c1_i32_100 : i32 to vector<8x128xi32>
    %234 = arith.cmpi eq, %230, %233 : vector<8x128xi32>
    %c0_i32_101 = arith.constant 0 : i32
    %235 = vector.broadcast %c0_i32_101 : i32 to vector<8x128xi32>
    %236 = arith.cmpi eq, %109, %235 : vector<8x128xi32>
    %c1_i32_102 = arith.constant 1 : i32
    %237 = vector.broadcast %c1_i32_102 : i32 to vector<8x128xi32>
    %238 = arith.cmpi eq, %109, %237 : vector<8x128xi32>
    %239 = arith.select %234, %222, %225 : vector<8x128xi1>, vector<8x128xf32>
    %240 = arith.select %232, %219, %239 : vector<8x128xi1>, vector<8x128xf32>
    %241 = vector.broadcast %7 : f32 to vector<8x128xf32>
    %242 = vector.broadcast %8 : f32 to vector<8x128xf32>
    %243 = arith.select %234, %241, %242 : vector<8x128xi1>, vector<8x128xf32>
    %244 = vector.broadcast %6 : f32 to vector<8x128xf32>
    %245 = arith.select %232, %244, %243 : vector<8x128xi1>, vector<8x128xf32>
    %246 = vector.broadcast %10 : f32 to vector<8x128xf32>
    %247 = vector.broadcast %11 : f32 to vector<8x128xf32>
    %248 = arith.select %234, %246, %247 : vector<8x128xi1>, vector<8x128xf32>
    %249 = vector.broadcast %9 : f32 to vector<8x128xf32>
    %250 = arith.select %232, %249, %248 : vector<8x128xi1>, vector<8x128xf32>
    %251 = vector.broadcast %13 : f32 to vector<8x128xf32>
    %252 = vector.broadcast %14 : f32 to vector<8x128xf32>
    %253 = arith.select %234, %251, %252 : vector<8x128xi1>, vector<8x128xf32>
    %254 = vector.broadcast %12 : f32 to vector<8x128xf32>
    %255 = arith.select %232, %254, %253 : vector<8x128xi1>, vector<8x128xf32>
    %256 = arith.select %238, %250, %255 : vector<8x128xi1>, vector<8x128xf32>
    %257 = arith.select %236, %245, %256 : vector<8x128xi1>, vector<8x128xf32>
    %258 = arith.addf %108, %257 : vector<8x128xf32>
    %259 = arith.addf %258, %240 : vector<8x128xf32>
    %260 = arith.select %227, %259, %108 : vector<8x128xi1>, vector<8x128xf32>
    %261 = arith.select %227, %230, %109 : vector<8x128xi1>, vector<8x128xi32>
    %262 = arith.maximumf %129, %141 : vector<8x128xf32>
    %263 = arith.maximumf %262, %153 : vector<8x128xf32>
    %264 = arith.subf %129, %263 : vector<8x128xf32>
    %265 = math.exp %264 : vector<8x128xf32>
    %266 = arith.subf %141, %263 : vector<8x128xf32>
    %267 = math.exp %266 : vector<8x128xf32>
    %268 = arith.subf %153, %263 : vector<8x128xf32>
    %269 = math.exp %268 : vector<8x128xf32>
    %270 = vector.broadcast %15 : f32 to vector<8x128xf32>
    %271 = arith.mulf %265, %270 : vector<8x128xf32>
    %272 = vector.broadcast %18 : f32 to vector<8x128xf32>
    %273 = arith.mulf %267, %272 : vector<8x128xf32>
    %274 = arith.addf %271, %273 : vector<8x128xf32>
    %275 = vector.broadcast %21 : f32 to vector<8x128xf32>
    %276 = arith.mulf %269, %275 : vector<8x128xf32>
    %277 = arith.addf %274, %276 : vector<8x128xf32>
    %278 = math.log %277 : vector<8x128xf32>
    %279 = arith.addf %263, %278 : vector<8x128xf32>
    %280 = arith.addf %279, %219 : vector<8x128xf32>
    %281 = arith.select %227, %280, %129 : vector<8x128xi1>, vector<8x128xf32>
    %282 = vector.broadcast %16 : f32 to vector<8x128xf32>
    %283 = arith.mulf %265, %282 : vector<8x128xf32>
    %284 = vector.broadcast %19 : f32 to vector<8x128xf32>
    %285 = arith.mulf %267, %284 : vector<8x128xf32>
    %286 = arith.addf %283, %285 : vector<8x128xf32>
    %287 = vector.broadcast %22 : f32 to vector<8x128xf32>
    %288 = arith.mulf %269, %287 : vector<8x128xf32>
    %289 = arith.addf %286, %288 : vector<8x128xf32>
    %290 = math.log %289 : vector<8x128xf32>
    %291 = arith.addf %263, %290 : vector<8x128xf32>
    %292 = arith.addf %291, %222 : vector<8x128xf32>
    %293 = arith.select %227, %292, %141 : vector<8x128xi1>, vector<8x128xf32>
    %294 = vector.broadcast %17 : f32 to vector<8x128xf32>
    %295 = arith.mulf %265, %294 : vector<8x128xf32>
    %296 = vector.broadcast %20 : f32 to vector<8x128xf32>
    %297 = arith.mulf %267, %296 : vector<8x128xf32>
    %298 = arith.addf %295, %297 : vector<8x128xf32>
    %299 = vector.broadcast %23 : f32 to vector<8x128xf32>
    %300 = arith.mulf %269, %299 : vector<8x128xf32>
    %301 = arith.addf %298, %300 : vector<8x128xf32>
    %302 = math.log %301 : vector<8x128xf32>
    %303 = arith.addf %263, %302 : vector<8x128xf32>
    %304 = arith.addf %303, %225 : vector<8x128xf32>
    %305 = arith.select %227, %304, %153 : vector<8x128xi1>, vector<8x128xf32>
    %306 = vector.broadcast %6 : f32 to vector<8x128xf32>
    %307 = arith.addf %171, %306 : vector<8x128xf32>
    %308 = vector.broadcast %9 : f32 to vector<8x128xf32>
    %309 = arith.addf %192, %308 : vector<8x128xf32>
    %310 = vector.broadcast %12 : f32 to vector<8x128xf32>
    %311 = arith.addf %213, %310 : vector<8x128xf32>
    %312 = arith.cmpf ogt, %309, %307 : vector<8x128xf32>
    %c1_i32_103 = arith.constant 1 : i32
    %313 = vector.broadcast %c1_i32_103 : i32 to vector<8x128xi32>
    %314 = arith.select %312, %313, %28 : vector<8x128xi1>, vector<8x128xi32>
    %315 = arith.maximumf %307, %309 : vector<8x128xf32>
    %316 = arith.cmpf ogt, %311, %315 : vector<8x128xf32>
    %c2_i32_104 = arith.constant 2 : i32
    %317 = vector.broadcast %c2_i32_104 : i32 to vector<8x128xi32>
    %318 = arith.select %316, %317, %314 : vector<8x128xi1>, vector<8x128xi32>
    %319 = arith.maximumf %315, %311 : vector<8x128xf32>
    %c0_i32_105 = arith.constant 0 : i32
    %320 = vector.broadcast %c0_i32_105 : i32 to vector<8x128xi32>
    %321 = arith.select %227, %318, %320 : vector<8x128xi1>, vector<8x128xi32>
    %322 = arith.addf %319, %219 : vector<8x128xf32>
    %323 = arith.select %227, %322, %171 : vector<8x128xi1>, vector<8x128xf32>
    %324 = vector.broadcast %7 : f32 to vector<8x128xf32>
    %325 = arith.addf %171, %324 : vector<8x128xf32>
    %326 = vector.broadcast %10 : f32 to vector<8x128xf32>
    %327 = arith.addf %192, %326 : vector<8x128xf32>
    %328 = vector.broadcast %13 : f32 to vector<8x128xf32>
    %329 = arith.addf %213, %328 : vector<8x128xf32>
    %330 = arith.cmpf ogt, %327, %325 : vector<8x128xf32>
    %c1_i32_106 = arith.constant 1 : i32
    %331 = vector.broadcast %c1_i32_106 : i32 to vector<8x128xi32>
    %332 = arith.select %330, %331, %28 : vector<8x128xi1>, vector<8x128xi32>
    %333 = arith.maximumf %325, %327 : vector<8x128xf32>
    %334 = arith.cmpf ogt, %329, %333 : vector<8x128xf32>
    %c2_i32_107 = arith.constant 2 : i32
    %335 = vector.broadcast %c2_i32_107 : i32 to vector<8x128xi32>
    %336 = arith.select %334, %335, %332 : vector<8x128xi1>, vector<8x128xi32>
    %337 = arith.maximumf %333, %329 : vector<8x128xf32>
    %c1_i32_108 = arith.constant 1 : i32
    %338 = vector.broadcast %c1_i32_108 : i32 to vector<8x128xi32>
    %339 = arith.select %227, %336, %338 : vector<8x128xi1>, vector<8x128xi32>
    %c2_i32_109 = arith.constant 2 : i32
    %340 = vector.broadcast %c2_i32_109 : i32 to vector<8x128xi32>
    %341 = arith.shli %339, %340 : vector<8x128xi32>
    %342 = arith.ori %321, %341 : vector<8x128xi32>
    %343 = arith.addf %337, %222 : vector<8x128xf32>
    %344 = arith.select %227, %343, %192 : vector<8x128xi1>, vector<8x128xf32>
    %345 = vector.broadcast %8 : f32 to vector<8x128xf32>
    %346 = arith.addf %171, %345 : vector<8x128xf32>
    %347 = vector.broadcast %11 : f32 to vector<8x128xf32>
    %348 = arith.addf %192, %347 : vector<8x128xf32>
    %349 = vector.broadcast %14 : f32 to vector<8x128xf32>
    %350 = arith.addf %213, %349 : vector<8x128xf32>
    %351 = arith.cmpf ogt, %348, %346 : vector<8x128xf32>
    %c1_i32_110 = arith.constant 1 : i32
    %352 = vector.broadcast %c1_i32_110 : i32 to vector<8x128xi32>
    %353 = arith.select %351, %352, %28 : vector<8x128xi1>, vector<8x128xi32>
    %354 = arith.maximumf %346, %348 : vector<8x128xf32>
    %355 = arith.cmpf ogt, %350, %354 : vector<8x128xf32>
    %c2_i32_111 = arith.constant 2 : i32
    %356 = vector.broadcast %c2_i32_111 : i32 to vector<8x128xi32>
    %357 = arith.select %355, %356, %353 : vector<8x128xi1>, vector<8x128xi32>
    %358 = arith.maximumf %354, %350 : vector<8x128xf32>
    %c2_i32_112 = arith.constant 2 : i32
    %359 = vector.broadcast %c2_i32_112 : i32 to vector<8x128xi32>
    %360 = arith.select %227, %357, %359 : vector<8x128xi1>, vector<8x128xi32>
    %c4_i32_113 = arith.constant 4 : i32
    %361 = vector.broadcast %c4_i32_113 : i32 to vector<8x128xi32>
    %362 = arith.shli %360, %361 : vector<8x128xi32>
    %363 = arith.ori %342, %362 : vector<8x128xi32>
    %364 = arith.addf %358, %225 : vector<8x128xf32>
    %365 = arith.select %227, %364, %213 : vector<8x128xi1>, vector<8x128xf32>
    %c2_114 = arith.constant 2 : index
    %c0_115 = arith.constant 0 : index
    %c0_116 = arith.constant 0 : index
    %366 = vector.load %arg10[%c2_114, %c0_115, %c0_116] : memref<8x8x128xi32, #tpu.memory_space<vmem>>, vector<1x8x128xi32>
    %367 = vector.shape_cast %366 : vector<1x8x128xi32> to vector<8x128xi32>
    %368 = vector.shape_cast %363 : vector<8x128xi32> to vector<1x8x128xi32>
    tpu.vector_store %arg10[%c2_114, %c0_115, %c0_116], %368 {strides = array<i32>} : memref<8x8x128xi32, #tpu.memory_space<vmem>>, vector<1x8x128xi32>,
    %c3 = arith.constant 3 : index
    %c0_117 = arith.constant 0 : index
    %369 = arith.index_cast %25 : i32 to index
    %c0_118 = arith.constant 0 : index
    %370 = vector.load %arg1[%c3, %c0_117, %369, %c0_118] : memref<8x3x8x128xf32, #tpu.memory_space<vmem>>, vector<1x1x8x128xf32>
    %371 = vector.shape_cast %370 : vector<1x1x8x128xf32> to vector<8x128xf32>
    %c3_119 = arith.constant 3 : index
    %c1_120 = arith.constant 1 : index
    %372 = arith.index_cast %25 : i32 to index
    %c0_121 = arith.constant 0 : index
    %373 = vector.load %arg1[%c3_119, %c1_120, %372, %c0_121] : memref<8x3x8x128xf32, #tpu.memory_space<vmem>>, vector<1x1x8x128xf32>
    %374 = vector.shape_cast %373 : vector<1x1x8x128xf32> to vector<8x128xf32>
    %c3_122 = arith.constant 3 : index
    %c2_123 = arith.constant 2 : index
    %375 = arith.index_cast %25 : i32 to index
    %c0_124 = arith.constant 0 : index
    %376 = vector.load %arg1[%c3_122, %c2_123, %375, %c0_124] : memref<8x3x8x128xf32, #tpu.memory_space<vmem>>, vector<1x1x8x128xf32>
    %377 = vector.shape_cast %376 : vector<1x1x8x128xf32> to vector<8x128xf32>
    %c3_i32 = arith.constant 3 : i32
    %378 = vector.broadcast %c3_i32 : i32 to vector<8x128xi32>
    %379 = arith.cmpi sgt, %27, %378 : vector<8x128xi32>
    %c3_125 = arith.constant 3 : index
    %380 = arith.index_cast %25 : i32 to index
    %c0_126 = arith.constant 0 : index
    %381 = vector.load %arg2[%c3_125, %380, %c0_126] : memref<8x8x128xi32, #tpu.memory_space<vmem>>, vector<1x8x128xi32>
    %382 = vector.shape_cast %381 : vector<1x8x128xi32> to vector<8x128xi32>
    %c0_i32_127 = arith.constant 0 : i32
    %383 = vector.broadcast %c0_i32_127 : i32 to vector<8x128xi32>
    %384 = arith.cmpi eq, %382, %383 : vector<8x128xi32>
    %c1_i32_128 = arith.constant 1 : i32
    %385 = vector.broadcast %c1_i32_128 : i32 to vector<8x128xi32>
    %386 = arith.cmpi eq, %382, %385 : vector<8x128xi32>
    %c0_i32_129 = arith.constant 0 : i32
    %387 = vector.broadcast %c0_i32_129 : i32 to vector<8x128xi32>
    %388 = arith.cmpi eq, %261, %387 : vector<8x128xi32>
    %c1_i32_130 = arith.constant 1 : i32
    %389 = vector.broadcast %c1_i32_130 : i32 to vector<8x128xi32>
    %390 = arith.cmpi eq, %261, %389 : vector<8x128xi32>
    %391 = arith.select %386, %374, %377 : vector<8x128xi1>, vector<8x128xf32>
    %392 = arith.select %384, %371, %391 : vector<8x128xi1>, vector<8x128xf32>
    %393 = vector.broadcast %7 : f32 to vector<8x128xf32>
    %394 = vector.broadcast %8 : f32 to vector<8x128xf32>
    %395 = arith.select %386, %393, %394 : vector<8x128xi1>, vector<8x128xf32>
    %396 = vector.broadcast %6 : f32 to vector<8x128xf32>
    %397 = arith.select %384, %396, %395 : vector<8x128xi1>, vector<8x128xf32>
    %398 = vector.broadcast %10 : f32 to vector<8x128xf32>
    %399 = vector.broadcast %11 : f32 to vector<8x128xf32>
    %400 = arith.select %386, %398, %399 : vector<8x128xi1>, vector<8x128xf32>
    %401 = vector.broadcast %9 : f32 to vector<8x128xf32>
    %402 = arith.select %384, %401, %400 : vector<8x128xi1>, vector<8x128xf32>
    %403 = vector.broadcast %13 : f32 to vector<8x128xf32>
    %404 = vector.broadcast %14 : f32 to vector<8x128xf32>
    %405 = arith.select %386, %403, %404 : vector<8x128xi1>, vector<8x128xf32>
    %406 = vector.broadcast %12 : f32 to vector<8x128xf32>
    %407 = arith.select %384, %406, %405 : vector<8x128xi1>, vector<8x128xf32>
    %408 = arith.select %390, %402, %407 : vector<8x128xi1>, vector<8x128xf32>
    %409 = arith.select %388, %397, %408 : vector<8x128xi1>, vector<8x128xf32>
    %410 = arith.addf %260, %409 : vector<8x128xf32>
    %411 = arith.addf %410, %392 : vector<8x128xf32>
    %412 = arith.select %379, %411, %260 : vector<8x128xi1>, vector<8x128xf32>
    %413 = arith.select %379, %382, %261 : vector<8x128xi1>, vector<8x128xi32>
    %414 = arith.maximumf %281, %293 : vector<8x128xf32>
    %415 = arith.maximumf %414, %305 : vector<8x128xf32>
    %416 = arith.subf %281, %415 : vector<8x128xf32>
    %417 = math.exp %416 : vector<8x128xf32>
    %418 = arith.subf %293, %415 : vector<8x128xf32>
    %419 = math.exp %418 : vector<8x128xf32>
    %420 = arith.subf %305, %415 : vector<8x128xf32>
    %421 = math.exp %420 : vector<8x128xf32>
    %422 = vector.broadcast %15 : f32 to vector<8x128xf32>
    %423 = arith.mulf %417, %422 : vector<8x128xf32>
    %424 = vector.broadcast %18 : f32 to vector<8x128xf32>
    %425 = arith.mulf %419, %424 : vector<8x128xf32>
    %426 = arith.addf %423, %425 : vector<8x128xf32>
    %427 = vector.broadcast %21 : f32 to vector<8x128xf32>
    %428 = arith.mulf %421, %427 : vector<8x128xf32>
    %429 = arith.addf %426, %428 : vector<8x128xf32>
    %430 = math.log %429 : vector<8x128xf32>
    %431 = arith.addf %415, %430 : vector<8x128xf32>
    %432 = arith.addf %431, %371 : vector<8x128xf32>
    %433 = arith.select %379, %432, %281 : vector<8x128xi1>, vector<8x128xf32>
    %434 = vector.broadcast %16 : f32 to vector<8x128xf32>
    %435 = arith.mulf %417, %434 : vector<8x128xf32>
    %436 = vector.broadcast %19 : f32 to vector<8x128xf32>
    %437 = arith.mulf %419, %436 : vector<8x128xf32>
    %438 = arith.addf %435, %437 : vector<8x128xf32>
    %439 = vector.broadcast %22 : f32 to vector<8x128xf32>
    %440 = arith.mulf %421, %439 : vector<8x128xf32>
    %441 = arith.addf %438, %440 : vector<8x128xf32>
    %442 = math.log %441 : vector<8x128xf32>
    %443 = arith.addf %415, %442 : vector<8x128xf32>
    %444 = arith.addf %443, %374 : vector<8x128xf32>
    %445 = arith.select %379, %444, %293 : vector<8x128xi1>, vector<8x128xf32>
    %446 = vector.broadcast %17 : f32 to vector<8x128xf32>
    %447 = arith.mulf %417, %446 : vector<8x128xf32>
    %448 = vector.broadcast %20 : f32 to vector<8x128xf32>
    %449 = arith.mulf %419, %448 : vector<8x128xf32>
    %450 = arith.addf %447, %449 : vector<8x128xf32>
    %451 = vector.broadcast %23 : f32 to vector<8x128xf32>
    %452 = arith.mulf %421, %451 : vector<8x128xf32>
    %453 = arith.addf %450, %452 : vector<8x128xf32>
    %454 = math.log %453 : vector<8x128xf32>
    %455 = arith.addf %415, %454 : vector<8x128xf32>
    %456 = arith.addf %455, %377 : vector<8x128xf32>
    %457 = arith.select %379, %456, %305 : vector<8x128xi1>, vector<8x128xf32>
    %458 = vector.broadcast %6 : f32 to vector<8x128xf32>
    %459 = arith.addf %323, %458 : vector<8x128xf32>
    %460 = vector.broadcast %9 : f32 to vector<8x128xf32>
    %461 = arith.addf %344, %460 : vector<8x128xf32>
    %462 = vector.broadcast %12 : f32 to vector<8x128xf32>
    %463 = arith.addf %365, %462 : vector<8x128xf32>
    %464 = arith.cmpf ogt, %461, %459 : vector<8x128xf32>
    %c1_i32_131 = arith.constant 1 : i32
    %465 = vector.broadcast %c1_i32_131 : i32 to vector<8x128xi32>
    %466 = arith.select %464, %465, %28 : vector<8x128xi1>, vector<8x128xi32>
    %467 = arith.maximumf %459, %461 : vector<8x128xf32>
    %468 = arith.cmpf ogt, %463, %467 : vector<8x128xf32>
    %c2_i32_132 = arith.constant 2 : i32
    %469 = vector.broadcast %c2_i32_132 : i32 to vector<8x128xi32>
    %470 = arith.select %468, %469, %466 : vector<8x128xi1>, vector<8x128xi32>
    %471 = arith.maximumf %467, %463 : vector<8x128xf32>
    %c0_i32_133 = arith.constant 0 : i32
    %472 = vector.broadcast %c0_i32_133 : i32 to vector<8x128xi32>
    %473 = arith.select %379, %470, %472 : vector<8x128xi1>, vector<8x128xi32>
    %474 = arith.addf %471, %371 : vector<8x128xf32>
    %475 = arith.select %379, %474, %323 : vector<8x128xi1>, vector<8x128xf32>
    %476 = vector.broadcast %7 : f32 to vector<8x128xf32>
    %477 = arith.addf %323, %476 : vector<8x128xf32>
    %478 = vector.broadcast %10 : f32 to vector<8x128xf32>
    %479 = arith.addf %344, %478 : vector<8x128xf32>
    %480 = vector.broadcast %13 : f32 to vector<8x128xf32>
    %481 = arith.addf %365, %480 : vector<8x128xf32>
    %482 = arith.cmpf ogt, %479, %477 : vector<8x128xf32>
    %c1_i32_134 = arith.constant 1 : i32
    %483 = vector.broadcast %c1_i32_134 : i32 to vector<8x128xi32>
    %484 = arith.select %482, %483, %28 : vector<8x128xi1>, vector<8x128xi32>
    %485 = arith.maximumf %477, %479 : vector<8x128xf32>
    %486 = arith.cmpf ogt, %481, %485 : vector<8x128xf32>
    %c2_i32_135 = arith.constant 2 : i32
    %487 = vector.broadcast %c2_i32_135 : i32 to vector<8x128xi32>
    %488 = arith.select %486, %487, %484 : vector<8x128xi1>, vector<8x128xi32>
    %489 = arith.maximumf %485, %481 : vector<8x128xf32>
    %c1_i32_136 = arith.constant 1 : i32
    %490 = vector.broadcast %c1_i32_136 : i32 to vector<8x128xi32>
    %491 = arith.select %379, %488, %490 : vector<8x128xi1>, vector<8x128xi32>
    %c2_i32_137 = arith.constant 2 : i32
    %492 = vector.broadcast %c2_i32_137 : i32 to vector<8x128xi32>
    %493 = arith.shli %491, %492 : vector<8x128xi32>
    %494 = arith.ori %473, %493 : vector<8x128xi32>
    %495 = arith.addf %489, %374 : vector<8x128xf32>
    %496 = arith.select %379, %495, %344 : vector<8x128xi1>, vector<8x128xf32>
    %497 = vector.broadcast %8 : f32 to vector<8x128xf32>
    %498 = arith.addf %323, %497 : vector<8x128xf32>
    %499 = vector.broadcast %11 : f32 to vector<8x128xf32>
    %500 = arith.addf %344, %499 : vector<8x128xf32>
    %501 = vector.broadcast %14 : f32 to vector<8x128xf32>
    %502 = arith.addf %365, %501 : vector<8x128xf32>
    %503 = arith.cmpf ogt, %500, %498 : vector<8x128xf32>
    %c1_i32_138 = arith.constant 1 : i32
    %504 = vector.broadcast %c1_i32_138 : i32 to vector<8x128xi32>
    %505 = arith.select %503, %504, %28 : vector<8x128xi1>, vector<8x128xi32>
    %506 = arith.maximumf %498, %500 : vector<8x128xf32>
    %507 = arith.cmpf ogt, %502, %506 : vector<8x128xf32>
    %c2_i32_139 = arith.constant 2 : i32
    %508 = vector.broadcast %c2_i32_139 : i32 to vector<8x128xi32>
    %509 = arith.select %507, %508, %505 : vector<8x128xi1>, vector<8x128xi32>
    %510 = arith.maximumf %506, %502 : vector<8x128xf32>
    %c2_i32_140 = arith.constant 2 : i32
    %511 = vector.broadcast %c2_i32_140 : i32 to vector<8x128xi32>
    %512 = arith.select %379, %509, %511 : vector<8x128xi1>, vector<8x128xi32>
    %c4_i32_141 = arith.constant 4 : i32
    %513 = vector.broadcast %c4_i32_141 : i32 to vector<8x128xi32>
    %514 = arith.shli %512, %513 : vector<8x128xi32>
    %515 = arith.ori %494, %514 : vector<8x128xi32>
    %516 = arith.addf %510, %377 : vector<8x128xf32>
    %517 = arith.select %379, %516, %365 : vector<8x128xi1>, vector<8x128xf32>
    %c3_142 = arith.constant 3 : index
    %c0_143 = arith.constant 0 : index
    %c0_144 = arith.constant 0 : index
    %518 = vector.load %arg10[%c3_142, %c0_143, %c0_144] : memref<8x8x128xi32, #tpu.memory_space<vmem>>, vector<1x8x128xi32>
    %519 = vector.shape_cast %518 : vector<1x8x128xi32> to vector<8x128xi32>
    %520 = vector.shape_cast %515 : vector<8x128xi32> to vector<1x8x128xi32>
    tpu.vector_store %arg10[%c3_142, %c0_143, %c0_144], %520 {strides = array<i32>} : memref<8x8x128xi32, #tpu.memory_space<vmem>>, vector<1x8x128xi32>,
    %c4 = arith.constant 4 : index
    %c0_145 = arith.constant 0 : index
    %521 = arith.index_cast %25 : i32 to index
    %c0_146 = arith.constant 0 : index
    %522 = vector.load %arg1[%c4, %c0_145, %521, %c0_146] : memref<8x3x8x128xf32, #tpu.memory_space<vmem>>, vector<1x1x8x128xf32>
    %523 = vector.shape_cast %522 : vector<1x1x8x128xf32> to vector<8x128xf32>
    %c4_147 = arith.constant 4 : index
    %c1_148 = arith.constant 1 : index
    %524 = arith.index_cast %25 : i32 to index
    %c0_149 = arith.constant 0 : index
    %525 = vector.load %arg1[%c4_147, %c1_148, %524, %c0_149] : memref<8x3x8x128xf32, #tpu.memory_space<vmem>>, vector<1x1x8x128xf32>
    %526 = vector.shape_cast %525 : vector<1x1x8x128xf32> to vector<8x128xf32>
    %c4_150 = arith.constant 4 : index
    %c2_151 = arith.constant 2 : index
    %527 = arith.index_cast %25 : i32 to index
    %c0_152 = arith.constant 0 : index
    %528 = vector.load %arg1[%c4_150, %c2_151, %527, %c0_152] : memref<8x3x8x128xf32, #tpu.memory_space<vmem>>, vector<1x1x8x128xf32>
    %529 = vector.shape_cast %528 : vector<1x1x8x128xf32> to vector<8x128xf32>
    %c4_i32_153 = arith.constant 4 : i32
    %530 = vector.broadcast %c4_i32_153 : i32 to vector<8x128xi32>
    %531 = arith.cmpi sgt, %27, %530 : vector<8x128xi32>
    %c4_154 = arith.constant 4 : index
    %532 = arith.index_cast %25 : i32 to index
    %c0_155 = arith.constant 0 : index
    %533 = vector.load %arg2[%c4_154, %532, %c0_155] : memref<8x8x128xi32, #tpu.memory_space<vmem>>, vector<1x8x128xi32>
    %534 = vector.shape_cast %533 : vector<1x8x128xi32> to vector<8x128xi32>
    %c0_i32_156 = arith.constant 0 : i32
    %535 = vector.broadcast %c0_i32_156 : i32 to vector<8x128xi32>
    %536 = arith.cmpi eq, %534, %535 : vector<8x128xi32>
    %c1_i32_157 = arith.constant 1 : i32
    %537 = vector.broadcast %c1_i32_157 : i32 to vector<8x128xi32>
    %538 = arith.cmpi eq, %534, %537 : vector<8x128xi32>
    %c0_i32_158 = arith.constant 0 : i32
    %539 = vector.broadcast %c0_i32_158 : i32 to vector<8x128xi32>
    %540 = arith.cmpi eq, %413, %539 : vector<8x128xi32>
    %c1_i32_159 = arith.constant 1 : i32
    %541 = vector.broadcast %c1_i32_159 : i32 to vector<8x128xi32>
    %542 = arith.cmpi eq, %413, %541 : vector<8x128xi32>
    %543 = arith.select %538, %526, %529 : vector<8x128xi1>, vector<8x128xf32>
    %544 = arith.select %536, %523, %543 : vector<8x128xi1>, vector<8x128xf32>
    %545 = vector.broadcast %7 : f32 to vector<8x128xf32>
    %546 = vector.broadcast %8 : f32 to vector<8x128xf32>
    %547 = arith.select %538, %545, %546 : vector<8x128xi1>, vector<8x128xf32>
    %548 = vector.broadcast %6 : f32 to vector<8x128xf32>
    %549 = arith.select %536, %548, %547 : vector<8x128xi1>, vector<8x128xf32>
    %550 = vector.broadcast %10 : f32 to vector<8x128xf32>
    %551 = vector.broadcast %11 : f32 to vector<8x128xf32>
    %552 = arith.select %538, %550, %551 : vector<8x128xi1>, vector<8x128xf32>
    %553 = vector.broadcast %9 : f32 to vector<8x128xf32>
    %554 = arith.select %536, %553, %552 : vector<8x128xi1>, vector<8x128xf32>
    %555 = vector.broadcast %13 : f32 to vector<8x128xf32>
    %556 = vector.broadcast %14 : f32 to vector<8x128xf32>
    %557 = arith.select %538, %555, %556 : vector<8x128xi1>, vector<8x128xf32>
    %558 = vector.broadcast %12 : f32 to vector<8x128xf32>
    %559 = arith.select %536, %558, %557 : vector<8x128xi1>, vector<8x128xf32>
    %560 = arith.select %542, %554, %559 : vector<8x128xi1>, vector<8x128xf32>
    %561 = arith.select %540, %549, %560 : vector<8x128xi1>, vector<8x128xf32>
    %562 = arith.addf %412, %561 : vector<8x128xf32>
    %563 = arith.addf %562, %544 : vector<8x128xf32>
    %564 = arith.select %531, %563, %412 : vector<8x128xi1>, vector<8x128xf32>
    %565 = arith.select %531, %534, %413 : vector<8x128xi1>, vector<8x128xi32>
    %566 = arith.maximumf %433, %445 : vector<8x128xf32>
    %567 = arith.maximumf %566, %457 : vector<8x128xf32>
    %568 = arith.subf %433, %567 : vector<8x128xf32>
    %569 = math.exp %568 : vector<8x128xf32>
    %570 = arith.subf %445, %567 : vector<8x128xf32>
    %571 = math.exp %570 : vector<8x128xf32>
    %572 = arith.subf %457, %567 : vector<8x128xf32>
    %573 = math.exp %572 : vector<8x128xf32>
    %574 = vector.broadcast %15 : f32 to vector<8x128xf32>
    %575 = arith.mulf %569, %574 : vector<8x128xf32>
    %576 = vector.broadcast %18 : f32 to vector<8x128xf32>
    %577 = arith.mulf %571, %576 : vector<8x128xf32>
    %578 = arith.addf %575, %577 : vector<8x128xf32>
    %579 = vector.broadcast %21 : f32 to vector<8x128xf32>
    %580 = arith.mulf %573, %579 : vector<8x128xf32>
    %581 = arith.addf %578, %580 : vector<8x128xf32>
    %582 = math.log %581 : vector<8x128xf32>
    %583 = arith.addf %567, %582 : vector<8x128xf32>
    %584 = arith.addf %583, %523 : vector<8x128xf32>
    %585 = arith.select %531, %584, %433 : vector<8x128xi1>, vector<8x128xf32>
    %586 = vector.broadcast %16 : f32 to vector<8x128xf32>
    %587 = arith.mulf %569, %586 : vector<8x128xf32>
    %588 = vector.broadcast %19 : f32 to vector<8x128xf32>
    %589 = arith.mulf %571, %588 : vector<8x128xf32>
    %590 = arith.addf %587, %589 : vector<8x128xf32>
    %591 = vector.broadcast %22 : f32 to vector<8x128xf32>
    %592 = arith.mulf %573, %591 : vector<8x128xf32>
    %593 = arith.addf %590, %592 : vector<8x128xf32>
    %594 = math.log %593 : vector<8x128xf32>
    %595 = arith.addf %567, %594 : vector<8x128xf32>
    %596 = arith.addf %595, %526 : vector<8x128xf32>
    %597 = arith.select %531, %596, %445 : vector<8x128xi1>, vector<8x128xf32>
    %598 = vector.broadcast %17 : f32 to vector<8x128xf32>
    %599 = arith.mulf %569, %598 : vector<8x128xf32>
    %600 = vector.broadcast %20 : f32 to vector<8x128xf32>
    %601 = arith.mulf %571, %600 : vector<8x128xf32>
    %602 = arith.addf %599, %601 : vector<8x128xf32>
    %603 = vector.broadcast %23 : f32 to vector<8x128xf32>
    %604 = arith.mulf %573, %603 : vector<8x128xf32>
    %605 = arith.addf %602, %604 : vector<8x128xf32>
    %606 = math.log %605 : vector<8x128xf32>
    %607 = arith.addf %567, %606 : vector<8x128xf32>
    %608 = arith.addf %607, %529 : vector<8x128xf32>
    %609 = arith.select %531, %608, %457 : vector<8x128xi1>, vector<8x128xf32>
    %610 = vector.broadcast %6 : f32 to vector<8x128xf32>
    %611 = arith.addf %475, %610 : vector<8x128xf32>
    %612 = vector.broadcast %9 : f32 to vector<8x128xf32>
    %613 = arith.addf %496, %612 : vector<8x128xf32>
    %614 = vector.broadcast %12 : f32 to vector<8x128xf32>
    %615 = arith.addf %517, %614 : vector<8x128xf32>
    %616 = arith.cmpf ogt, %613, %611 : vector<8x128xf32>
    %c1_i32_160 = arith.constant 1 : i32
    %617 = vector.broadcast %c1_i32_160 : i32 to vector<8x128xi32>
    %618 = arith.select %616, %617, %28 : vector<8x128xi1>, vector<8x128xi32>
    %619 = arith.maximumf %611, %613 : vector<8x128xf32>
    %620 = arith.cmpf ogt, %615, %619 : vector<8x128xf32>
    %c2_i32_161 = arith.constant 2 : i32
    %621 = vector.broadcast %c2_i32_161 : i32 to vector<8x128xi32>
    %622 = arith.select %620, %621, %618 : vector<8x128xi1>, vector<8x128xi32>
    %623 = arith.maximumf %619, %615 : vector<8x128xf32>
    %c0_i32_162 = arith.constant 0 : i32
    %624 = vector.broadcast %c0_i32_162 : i32 to vector<8x128xi32>
    %625 = arith.select %531, %622, %624 : vector<8x128xi1>, vector<8x128xi32>
    %626 = arith.addf %623, %523 : vector<8x128xf32>
    %627 = arith.select %531, %626, %475 : vector<8x128xi1>, vector<8x128xf32>
    %628 = vector.broadcast %7 : f32 to vector<8x128xf32>
    %629 = arith.addf %475, %628 : vector<8x128xf32>
    %630 = vector.broadcast %10 : f32 to vector<8x128xf32>
    %631 = arith.addf %496, %630 : vector<8x128xf32>
    %632 = vector.broadcast %13 : f32 to vector<8x128xf32>
    %633 = arith.addf %517, %632 : vector<8x128xf32>
    %634 = arith.cmpf ogt, %631, %629 : vector<8x128xf32>
    %c1_i32_163 = arith.constant 1 : i32
    %635 = vector.broadcast %c1_i32_163 : i32 to vector<8x128xi32>
    %636 = arith.select %634, %635, %28 : vector<8x128xi1>, vector<8x128xi32>
    %637 = arith.maximumf %629, %631 : vector<8x128xf32>
    %638 = arith.cmpf ogt, %633, %637 : vector<8x128xf32>
    %c2_i32_164 = arith.constant 2 : i32
    %639 = vector.broadcast %c2_i32_164 : i32 to vector<8x128xi32>
    %640 = arith.select %638, %639, %636 : vector<8x128xi1>, vector<8x128xi32>
    %641 = arith.maximumf %637, %633 : vector<8x128xf32>
    %c1_i32_165 = arith.constant 1 : i32
    %642 = vector.broadcast %c1_i32_165 : i32 to vector<8x128xi32>
    %643 = arith.select %531, %640, %642 : vector<8x128xi1>, vector<8x128xi32>
    %c2_i32_166 = arith.constant 2 : i32
    %644 = vector.broadcast %c2_i32_166 : i32 to vector<8x128xi32>
    %645 = arith.shli %643, %644 : vector<8x128xi32>
    %646 = arith.ori %625, %645 : vector<8x128xi32>
    %647 = arith.addf %641, %526 : vector<8x128xf32>
    %648 = arith.select %531, %647, %496 : vector<8x128xi1>, vector<8x128xf32>
    %649 = vector.broadcast %8 : f32 to vector<8x128xf32>
    %650 = arith.addf %475, %649 : vector<8x128xf32>
    %651 = vector.broadcast %11 : f32 to vector<8x128xf32>
    %652 = arith.addf %496, %651 : vector<8x128xf32>
    %653 = vector.broadcast %14 : f32 to vector<8x128xf32>
    %654 = arith.addf %517, %653 : vector<8x128xf32>
    %655 = arith.cmpf ogt, %652, %650 : vector<8x128xf32>
    %c1_i32_167 = arith.constant 1 : i32
    %656 = vector.broadcast %c1_i32_167 : i32 to vector<8x128xi32>
    %657 = arith.select %655, %656, %28 : vector<8x128xi1>, vector<8x128xi32>
    %658 = arith.maximumf %650, %652 : vector<8x128xf32>
    %659 = arith.cmpf ogt, %654, %658 : vector<8x128xf32>
    %c2_i32_168 = arith.constant 2 : i32
    %660 = vector.broadcast %c2_i32_168 : i32 to vector<8x128xi32>
    %661 = arith.select %659, %660, %657 : vector<8x128xi1>, vector<8x128xi32>
    %662 = arith.maximumf %658, %654 : vector<8x128xf32>
    %c2_i32_169 = arith.constant 2 : i32
    %663 = vector.broadcast %c2_i32_169 : i32 to vector<8x128xi32>
    %664 = arith.select %531, %661, %663 : vector<8x128xi1>, vector<8x128xi32>
    %c4_i32_170 = arith.constant 4 : i32
    %665 = vector.broadcast %c4_i32_170 : i32 to vector<8x128xi32>
    %666 = arith.shli %664, %665 : vector<8x128xi32>
    %667 = arith.ori %646, %666 : vector<8x128xi32>
    %668 = arith.addf %662, %529 : vector<8x128xf32>
    %669 = arith.select %531, %668, %517 : vector<8x128xi1>, vector<8x128xf32>
    %c4_171 = arith.constant 4 : index
    %c0_172 = arith.constant 0 : index
    %c0_173 = arith.constant 0 : index
    %670 = vector.load %arg10[%c4_171, %c0_172, %c0_173] : memref<8x8x128xi32, #tpu.memory_space<vmem>>, vector<1x8x128xi32>
    %671 = vector.shape_cast %670 : vector<1x8x128xi32> to vector<8x128xi32>
    %672 = vector.shape_cast %667 : vector<8x128xi32> to vector<1x8x128xi32>
    tpu.vector_store %arg10[%c4_171, %c0_172, %c0_173], %672 {strides = array<i32>} : memref<8x8x128xi32, #tpu.memory_space<vmem>>, vector<1x8x128xi32>,
    %c5 = arith.constant 5 : index
    %c0_174 = arith.constant 0 : index
    %673 = arith.index_cast %25 : i32 to index
    %c0_175 = arith.constant 0 : index
    %674 = vector.load %arg1[%c5, %c0_174, %673, %c0_175] : memref<8x3x8x128xf32, #tpu.memory_space<vmem>>, vector<1x1x8x128xf32>
    %675 = vector.shape_cast %674 : vector<1x1x8x128xf32> to vector<8x128xf32>
    %c5_176 = arith.constant 5 : index
    %c1_177 = arith.constant 1 : index
    %676 = arith.index_cast %25 : i32 to index
    %c0_178 = arith.constant 0 : index
    %677 = vector.load %arg1[%c5_176, %c1_177, %676, %c0_178] : memref<8x3x8x128xf32, #tpu.memory_space<vmem>>, vector<1x1x8x128xf32>
    %678 = vector.shape_cast %677 : vector<1x1x8x128xf32> to vector<8x128xf32>
    %c5_179 = arith.constant 5 : index
    %c2_180 = arith.constant 2 : index
    %679 = arith.index_cast %25 : i32 to index
    %c0_181 = arith.constant 0 : index
    %680 = vector.load %arg1[%c5_179, %c2_180, %679, %c0_181] : memref<8x3x8x128xf32, #tpu.memory_space<vmem>>, vector<1x1x8x128xf32>
    %681 = vector.shape_cast %680 : vector<1x1x8x128xf32> to vector<8x128xf32>
    %c5_i32 = arith.constant 5 : i32
    %682 = vector.broadcast %c5_i32 : i32 to vector<8x128xi32>
    %683 = arith.cmpi sgt, %27, %682 : vector<8x128xi32>
    %c5_182 = arith.constant 5 : index
    %684 = arith.index_cast %25 : i32 to index
    %c0_183 = arith.constant 0 : index
    %685 = vector.load %arg2[%c5_182, %684, %c0_183] : memref<8x8x128xi32, #tpu.memory_space<vmem>>, vector<1x8x128xi32>
    %686 = vector.shape_cast %685 : vector<1x8x128xi32> to vector<8x128xi32>
    %c0_i32_184 = arith.constant 0 : i32
    %687 = vector.broadcast %c0_i32_184 : i32 to vector<8x128xi32>
    %688 = arith.cmpi eq, %686, %687 : vector<8x128xi32>
    %c1_i32_185 = arith.constant 1 : i32
    %689 = vector.broadcast %c1_i32_185 : i32 to vector<8x128xi32>
    %690 = arith.cmpi eq, %686, %689 : vector<8x128xi32>
    %c0_i32_186 = arith.constant 0 : i32
    %691 = vector.broadcast %c0_i32_186 : i32 to vector<8x128xi32>
    %692 = arith.cmpi eq, %565, %691 : vector<8x128xi32>
    %c1_i32_187 = arith.constant 1 : i32
    %693 = vector.broadcast %c1_i32_187 : i32 to vector<8x128xi32>
    %694 = arith.cmpi eq, %565, %693 : vector<8x128xi32>
    %695 = arith.select %690, %678, %681 : vector<8x128xi1>, vector<8x128xf32>
    %696 = arith.select %688, %675, %695 : vector<8x128xi1>, vector<8x128xf32>
    %697 = vector.broadcast %7 : f32 to vector<8x128xf32>
    %698 = vector.broadcast %8 : f32 to vector<8x128xf32>
    %699 = arith.select %690, %697, %698 : vector<8x128xi1>, vector<8x128xf32>
    %700 = vector.broadcast %6 : f32 to vector<8x128xf32>
    %701 = arith.select %688, %700, %699 : vector<8x128xi1>, vector<8x128xf32>
    %702 = vector.broadcast %10 : f32 to vector<8x128xf32>
    %703 = vector.broadcast %11 : f32 to vector<8x128xf32>
    %704 = arith.select %690, %702, %703 : vector<8x128xi1>, vector<8x128xf32>
    %705 = vector.broadcast %9 : f32 to vector<8x128xf32>
    %706 = arith.select %688, %705, %704 : vector<8x128xi1>, vector<8x128xf32>
    %707 = vector.broadcast %13 : f32 to vector<8x128xf32>
    %708 = vector.broadcast %14 : f32 to vector<8x128xf32>
    %709 = arith.select %690, %707, %708 : vector<8x128xi1>, vector<8x128xf32>
    %710 = vector.broadcast %12 : f32 to vector<8x128xf32>
    %711 = arith.select %688, %710, %709 : vector<8x128xi1>, vector<8x128xf32>
    %712 = arith.select %694, %706, %711 : vector<8x128xi1>, vector<8x128xf32>
    %713 = arith.select %692, %701, %712 : vector<8x128xi1>, vector<8x128xf32>
    %714 = arith.addf %564, %713 : vector<8x128xf32>
    %715 = arith.addf %714, %696 : vector<8x128xf32>
    %716 = arith.select %683, %715, %564 : vector<8x128xi1>, vector<8x128xf32>
    %717 = arith.select %683, %686, %565 : vector<8x128xi1>, vector<8x128xi32>
    %718 = arith.maximumf %585, %597 : vector<8x128xf32>
    %719 = arith.maximumf %718, %609 : vector<8x128xf32>
    %720 = arith.subf %585, %719 : vector<8x128xf32>
    %721 = math.exp %720 : vector<8x128xf32>
    %722 = arith.subf %597, %719 : vector<8x128xf32>
    %723 = math.exp %722 : vector<8x128xf32>
    %724 = arith.subf %609, %719 : vector<8x128xf32>
    %725 = math.exp %724 : vector<8x128xf32>
    %726 = vector.broadcast %15 : f32 to vector<8x128xf32>
    %727 = arith.mulf %721, %726 : vector<8x128xf32>
    %728 = vector.broadcast %18 : f32 to vector<8x128xf32>
    %729 = arith.mulf %723, %728 : vector<8x128xf32>
    %730 = arith.addf %727, %729 : vector<8x128xf32>
    %731 = vector.broadcast %21 : f32 to vector<8x128xf32>
    %732 = arith.mulf %725, %731 : vector<8x128xf32>
    %733 = arith.addf %730, %732 : vector<8x128xf32>
    %734 = math.log %733 : vector<8x128xf32>
    %735 = arith.addf %719, %734 : vector<8x128xf32>
    %736 = arith.addf %735, %675 : vector<8x128xf32>
    %737 = arith.select %683, %736, %585 : vector<8x128xi1>, vector<8x128xf32>
    %738 = vector.broadcast %16 : f32 to vector<8x128xf32>
    %739 = arith.mulf %721, %738 : vector<8x128xf32>
    %740 = vector.broadcast %19 : f32 to vector<8x128xf32>
    %741 = arith.mulf %723, %740 : vector<8x128xf32>
    %742 = arith.addf %739, %741 : vector<8x128xf32>
    %743 = vector.broadcast %22 : f32 to vector<8x128xf32>
    %744 = arith.mulf %725, %743 : vector<8x128xf32>
    %745 = arith.addf %742, %744 : vector<8x128xf32>
    %746 = math.log %745 : vector<8x128xf32>
    %747 = arith.addf %719, %746 : vector<8x128xf32>
    %748 = arith.addf %747, %678 : vector<8x128xf32>
    %749 = arith.select %683, %748, %597 : vector<8x128xi1>, vector<8x128xf32>
    %750 = vector.broadcast %17 : f32 to vector<8x128xf32>
    %751 = arith.mulf %721, %750 : vector<8x128xf32>
    %752 = vector.broadcast %20 : f32 to vector<8x128xf32>
    %753 = arith.mulf %723, %752 : vector<8x128xf32>
    %754 = arith.addf %751, %753 : vector<8x128xf32>
    %755 = vector.broadcast %23 : f32 to vector<8x128xf32>
    %756 = arith.mulf %725, %755 : vector<8x128xf32>
    %757 = arith.addf %754, %756 : vector<8x128xf32>
    %758 = math.log %757 : vector<8x128xf32>
    %759 = arith.addf %719, %758 : vector<8x128xf32>
    %760 = arith.addf %759, %681 : vector<8x128xf32>
    %761 = arith.select %683, %760, %609 : vector<8x128xi1>, vector<8x128xf32>
    %762 = vector.broadcast %6 : f32 to vector<8x128xf32>
    %763 = arith.addf %627, %762 : vector<8x128xf32>
    %764 = vector.broadcast %9 : f32 to vector<8x128xf32>
    %765 = arith.addf %648, %764 : vector<8x128xf32>
    %766 = vector.broadcast %12 : f32 to vector<8x128xf32>
    %767 = arith.addf %669, %766 : vector<8x128xf32>
    %768 = arith.cmpf ogt, %765, %763 : vector<8x128xf32>
    %c1_i32_188 = arith.constant 1 : i32
    %769 = vector.broadcast %c1_i32_188 : i32 to vector<8x128xi32>
    %770 = arith.select %768, %769, %28 : vector<8x128xi1>, vector<8x128xi32>
    %771 = arith.maximumf %763, %765 : vector<8x128xf32>
    %772 = arith.cmpf ogt, %767, %771 : vector<8x128xf32>
    %c2_i32_189 = arith.constant 2 : i32
    %773 = vector.broadcast %c2_i32_189 : i32 to vector<8x128xi32>
    %774 = arith.select %772, %773, %770 : vector<8x128xi1>, vector<8x128xi32>
    %775 = arith.maximumf %771, %767 : vector<8x128xf32>
    %c0_i32_190 = arith.constant 0 : i32
    %776 = vector.broadcast %c0_i32_190 : i32 to vector<8x128xi32>
    %777 = arith.select %683, %774, %776 : vector<8x128xi1>, vector<8x128xi32>
    %778 = arith.addf %775, %675 : vector<8x128xf32>
    %779 = arith.select %683, %778, %627 : vector<8x128xi1>, vector<8x128xf32>
    %780 = vector.broadcast %7 : f32 to vector<8x128xf32>
    %781 = arith.addf %627, %780 : vector<8x128xf32>
    %782 = vector.broadcast %10 : f32 to vector<8x128xf32>
    %783 = arith.addf %648, %782 : vector<8x128xf32>
    %784 = vector.broadcast %13 : f32 to vector<8x128xf32>
    %785 = arith.addf %669, %784 : vector<8x128xf32>
    %786 = arith.cmpf ogt, %783, %781 : vector<8x128xf32>
    %c1_i32_191 = arith.constant 1 : i32
    %787 = vector.broadcast %c1_i32_191 : i32 to vector<8x128xi32>
    %788 = arith.select %786, %787, %28 : vector<8x128xi1>, vector<8x128xi32>
    %789 = arith.maximumf %781, %783 : vector<8x128xf32>
    %790 = arith.cmpf ogt, %785, %789 : vector<8x128xf32>
    %c2_i32_192 = arith.constant 2 : i32
    %791 = vector.broadcast %c2_i32_192 : i32 to vector<8x128xi32>
    %792 = arith.select %790, %791, %788 : vector<8x128xi1>, vector<8x128xi32>
    %793 = arith.maximumf %789, %785 : vector<8x128xf32>
    %c1_i32_193 = arith.constant 1 : i32
    %794 = vector.broadcast %c1_i32_193 : i32 to vector<8x128xi32>
    %795 = arith.select %683, %792, %794 : vector<8x128xi1>, vector<8x128xi32>
    %c2_i32_194 = arith.constant 2 : i32
    %796 = vector.broadcast %c2_i32_194 : i32 to vector<8x128xi32>
    %797 = arith.shli %795, %796 : vector<8x128xi32>
    %798 = arith.ori %777, %797 : vector<8x128xi32>
    %799 = arith.addf %793, %678 : vector<8x128xf32>
    %800 = arith.select %683, %799, %648 : vector<8x128xi1>, vector<8x128xf32>
    %801 = vector.broadcast %8 : f32 to vector<8x128xf32>
    %802 = arith.addf %627, %801 : vector<8x128xf32>
    %803 = vector.broadcast %11 : f32 to vector<8x128xf32>
    %804 = arith.addf %648, %803 : vector<8x128xf32>
    %805 = vector.broadcast %14 : f32 to vector<8x128xf32>
    %806 = arith.addf %669, %805 : vector<8x128xf32>
    %807 = arith.cmpf ogt, %804, %802 : vector<8x128xf32>
    %c1_i32_195 = arith.constant 1 : i32
    %808 = vector.broadcast %c1_i32_195 : i32 to vector<8x128xi32>
    %809 = arith.select %807, %808, %28 : vector<8x128xi1>, vector<8x128xi32>
    %810 = arith.maximumf %802, %804 : vector<8x128xf32>
    %811 = arith.cmpf ogt, %806, %810 : vector<8x128xf32>
    %c2_i32_196 = arith.constant 2 : i32
    %812 = vector.broadcast %c2_i32_196 : i32 to vector<8x128xi32>
    %813 = arith.select %811, %812, %809 : vector<8x128xi1>, vector<8x128xi32>
    %814 = arith.maximumf %810, %806 : vector<8x128xf32>
    %c2_i32_197 = arith.constant 2 : i32
    %815 = vector.broadcast %c2_i32_197 : i32 to vector<8x128xi32>
    %816 = arith.select %683, %813, %815 : vector<8x128xi1>, vector<8x128xi32>
    %c4_i32_198 = arith.constant 4 : i32
    %817 = vector.broadcast %c4_i32_198 : i32 to vector<8x128xi32>
    %818 = arith.shli %816, %817 : vector<8x128xi32>
    %819 = arith.ori %798, %818 : vector<8x128xi32>
    %820 = arith.addf %814, %681 : vector<8x128xf32>
    %821 = arith.select %683, %820, %669 : vector<8x128xi1>, vector<8x128xf32>
    %c5_199 = arith.constant 5 : index
    %c0_200 = arith.constant 0 : index
    %c0_201 = arith.constant 0 : index
    %822 = vector.load %arg10[%c5_199, %c0_200, %c0_201] : memref<8x8x128xi32, #tpu.memory_space<vmem>>, vector<1x8x128xi32>
    %823 = vector.shape_cast %822 : vector<1x8x128xi32> to vector<8x128xi32>
    %824 = vector.shape_cast %819 : vector<8x128xi32> to vector<1x8x128xi32>
    tpu.vector_store %arg10[%c5_199, %c0_200, %c0_201], %824 {strides = array<i32>} : memref<8x8x128xi32, #tpu.memory_space<vmem>>, vector<1x8x128xi32>,
    %c6 = arith.constant 6 : index
    %c0_202 = arith.constant 0 : index
    %825 = arith.index_cast %25 : i32 to index
    %c0_203 = arith.constant 0 : index
    %826 = vector.load %arg1[%c6, %c0_202, %825, %c0_203] : memref<8x3x8x128xf32, #tpu.memory_space<vmem>>, vector<1x1x8x128xf32>
    %827 = vector.shape_cast %826 : vector<1x1x8x128xf32> to vector<8x128xf32>
    %c6_204 = arith.constant 6 : index
    %c1_205 = arith.constant 1 : index
    %828 = arith.index_cast %25 : i32 to index
    %c0_206 = arith.constant 0 : index
    %829 = vector.load %arg1[%c6_204, %c1_205, %828, %c0_206] : memref<8x3x8x128xf32, #tpu.memory_space<vmem>>, vector<1x1x8x128xf32>
    %830 = vector.shape_cast %829 : vector<1x1x8x128xf32> to vector<8x128xf32>
    %c6_207 = arith.constant 6 : index
    %c2_208 = arith.constant 2 : index
    %831 = arith.index_cast %25 : i32 to index
    %c0_209 = arith.constant 0 : index
    %832 = vector.load %arg1[%c6_207, %c2_208, %831, %c0_209] : memref<8x3x8x128xf32, #tpu.memory_space<vmem>>, vector<1x1x8x128xf32>
    %833 = vector.shape_cast %832 : vector<1x1x8x128xf32> to vector<8x128xf32>
    %c6_i32 = arith.constant 6 : i32
    %834 = vector.broadcast %c6_i32 : i32 to vector<8x128xi32>
    %835 = arith.cmpi sgt, %27, %834 : vector<8x128xi32>
    %c6_210 = arith.constant 6 : index
    %836 = arith.index_cast %25 : i32 to index
    %c0_211 = arith.constant 0 : index
    %837 = vector.load %arg2[%c6_210, %836, %c0_211] : memref<8x8x128xi32, #tpu.memory_space<vmem>>, vector<1x8x128xi32>
    %838 = vector.shape_cast %837 : vector<1x8x128xi32> to vector<8x128xi32>
    %c0_i32_212 = arith.constant 0 : i32
    %839 = vector.broadcast %c0_i32_212 : i32 to vector<8x128xi32>
    %840 = arith.cmpi eq, %838, %839 : vector<8x128xi32>
    %c1_i32_213 = arith.constant 1 : i32
    %841 = vector.broadcast %c1_i32_213 : i32 to vector<8x128xi32>
    %842 = arith.cmpi eq, %838, %841 : vector<8x128xi32>
    %c0_i32_214 = arith.constant 0 : i32
    %843 = vector.broadcast %c0_i32_214 : i32 to vector<8x128xi32>
    %844 = arith.cmpi eq, %717, %843 : vector<8x128xi32>
    %c1_i32_215 = arith.constant 1 : i32
    %845 = vector.broadcast %c1_i32_215 : i32 to vector<8x128xi32>
    %846 = arith.cmpi eq, %717, %845 : vector<8x128xi32>
    %847 = arith.select %842, %830, %833 : vector<8x128xi1>, vector<8x128xf32>
    %848 = arith.select %840, %827, %847 : vector<8x128xi1>, vector<8x128xf32>
    %849 = vector.broadcast %7 : f32 to vector<8x128xf32>
    %850 = vector.broadcast %8 : f32 to vector<8x128xf32>
    %851 = arith.select %842, %849, %850 : vector<8x128xi1>, vector<8x128xf32>
    %852 = vector.broadcast %6 : f32 to vector<8x128xf32>
    %853 = arith.select %840, %852, %851 : vector<8x128xi1>, vector<8x128xf32>
    %854 = vector.broadcast %10 : f32 to vector<8x128xf32>
    %855 = vector.broadcast %11 : f32 to vector<8x128xf32>
    %856 = arith.select %842, %854, %855 : vector<8x128xi1>, vector<8x128xf32>
    %857 = vector.broadcast %9 : f32 to vector<8x128xf32>
    %858 = arith.select %840, %857, %856 : vector<8x128xi1>, vector<8x128xf32>
    %859 = vector.broadcast %13 : f32 to vector<8x128xf32>
    %860 = vector.broadcast %14 : f32 to vector<8x128xf32>
    %861 = arith.select %842, %859, %860 : vector<8x128xi1>, vector<8x128xf32>
    %862 = vector.broadcast %12 : f32 to vector<8x128xf32>
    %863 = arith.select %840, %862, %861 : vector<8x128xi1>, vector<8x128xf32>
    %864 = arith.select %846, %858, %863 : vector<8x128xi1>, vector<8x128xf32>
    %865 = arith.select %844, %853, %864 : vector<8x128xi1>, vector<8x128xf32>
    %866 = arith.addf %716, %865 : vector<8x128xf32>
    %867 = arith.addf %866, %848 : vector<8x128xf32>
    %868 = arith.select %835, %867, %716 : vector<8x128xi1>, vector<8x128xf32>
    %869 = arith.select %835, %838, %717 : vector<8x128xi1>, vector<8x128xi32>
    %870 = arith.maximumf %737, %749 : vector<8x128xf32>
    %871 = arith.maximumf %870, %761 : vector<8x128xf32>
    %872 = arith.subf %737, %871 : vector<8x128xf32>
    %873 = math.exp %872 : vector<8x128xf32>
    %874 = arith.subf %749, %871 : vector<8x128xf32>
    %875 = math.exp %874 : vector<8x128xf32>
    %876 = arith.subf %761, %871 : vector<8x128xf32>
    %877 = math.exp %876 : vector<8x128xf32>
    %878 = vector.broadcast %15 : f32 to vector<8x128xf32>
    %879 = arith.mulf %873, %878 : vector<8x128xf32>
    %880 = vector.broadcast %18 : f32 to vector<8x128xf32>
    %881 = arith.mulf %875, %880 : vector<8x128xf32>
    %882 = arith.addf %879, %881 : vector<8x128xf32>
    %883 = vector.broadcast %21 : f32 to vector<8x128xf32>
    %884 = arith.mulf %877, %883 : vector<8x128xf32>
    %885 = arith.addf %882, %884 : vector<8x128xf32>
    %886 = math.log %885 : vector<8x128xf32>
    %887 = arith.addf %871, %886 : vector<8x128xf32>
    %888 = arith.addf %887, %827 : vector<8x128xf32>
    %889 = arith.select %835, %888, %737 : vector<8x128xi1>, vector<8x128xf32>
    %890 = vector.broadcast %16 : f32 to vector<8x128xf32>
    %891 = arith.mulf %873, %890 : vector<8x128xf32>
    %892 = vector.broadcast %19 : f32 to vector<8x128xf32>
    %893 = arith.mulf %875, %892 : vector<8x128xf32>
    %894 = arith.addf %891, %893 : vector<8x128xf32>
    %895 = vector.broadcast %22 : f32 to vector<8x128xf32>
    %896 = arith.mulf %877, %895 : vector<8x128xf32>
    %897 = arith.addf %894, %896 : vector<8x128xf32>
    %898 = math.log %897 : vector<8x128xf32>
    %899 = arith.addf %871, %898 : vector<8x128xf32>
    %900 = arith.addf %899, %830 : vector<8x128xf32>
    %901 = arith.select %835, %900, %749 : vector<8x128xi1>, vector<8x128xf32>
    %902 = vector.broadcast %17 : f32 to vector<8x128xf32>
    %903 = arith.mulf %873, %902 : vector<8x128xf32>
    %904 = vector.broadcast %20 : f32 to vector<8x128xf32>
    %905 = arith.mulf %875, %904 : vector<8x128xf32>
    %906 = arith.addf %903, %905 : vector<8x128xf32>
    %907 = vector.broadcast %23 : f32 to vector<8x128xf32>
    %908 = arith.mulf %877, %907 : vector<8x128xf32>
    %909 = arith.addf %906, %908 : vector<8x128xf32>
    %910 = math.log %909 : vector<8x128xf32>
    %911 = arith.addf %871, %910 : vector<8x128xf32>
    %912 = arith.addf %911, %833 : vector<8x128xf32>
    %913 = arith.select %835, %912, %761 : vector<8x128xi1>, vector<8x128xf32>
    %914 = vector.broadcast %6 : f32 to vector<8x128xf32>
    %915 = arith.addf %779, %914 : vector<8x128xf32>
    %916 = vector.broadcast %9 : f32 to vector<8x128xf32>
    %917 = arith.addf %800, %916 : vector<8x128xf32>
    %918 = vector.broadcast %12 : f32 to vector<8x128xf32>
    %919 = arith.addf %821, %918 : vector<8x128xf32>
    %920 = arith.cmpf ogt, %917, %915 : vector<8x128xf32>
    %c1_i32_216 = arith.constant 1 : i32
    %921 = vector.broadcast %c1_i32_216 : i32 to vector<8x128xi32>
    %922 = arith.select %920, %921, %28 : vector<8x128xi1>, vector<8x128xi32>
    %923 = arith.maximumf %915, %917 : vector<8x128xf32>
    %924 = arith.cmpf ogt, %919, %923 : vector<8x128xf32>
    %c2_i32_217 = arith.constant 2 : i32
    %925 = vector.broadcast %c2_i32_217 : i32 to vector<8x128xi32>
    %926 = arith.select %924, %925, %922 : vector<8x128xi1>, vector<8x128xi32>
    %927 = arith.maximumf %923, %919 : vector<8x128xf32>
    %c0_i32_218 = arith.constant 0 : i32
    %928 = vector.broadcast %c0_i32_218 : i32 to vector<8x128xi32>
    %929 = arith.select %835, %926, %928 : vector<8x128xi1>, vector<8x128xi32>
    %930 = arith.addf %927, %827 : vector<8x128xf32>
    %931 = arith.select %835, %930, %779 : vector<8x128xi1>, vector<8x128xf32>
    %932 = vector.broadcast %7 : f32 to vector<8x128xf32>
    %933 = arith.addf %779, %932 : vector<8x128xf32>
    %934 = vector.broadcast %10 : f32 to vector<8x128xf32>
    %935 = arith.addf %800, %934 : vector<8x128xf32>
    %936 = vector.broadcast %13 : f32 to vector<8x128xf32>
    %937 = arith.addf %821, %936 : vector<8x128xf32>
    %938 = arith.cmpf ogt, %935, %933 : vector<8x128xf32>
    %c1_i32_219 = arith.constant 1 : i32
    %939 = vector.broadcast %c1_i32_219 : i32 to vector<8x128xi32>
    %940 = arith.select %938, %939, %28 : vector<8x128xi1>, vector<8x128xi32>
    %941 = arith.maximumf %933, %935 : vector<8x128xf32>
    %942 = arith.cmpf ogt, %937, %941 : vector<8x128xf32>
    %c2_i32_220 = arith.constant 2 : i32
    %943 = vector.broadcast %c2_i32_220 : i32 to vector<8x128xi32>
    %944 = arith.select %942, %943, %940 : vector<8x128xi1>, vector<8x128xi32>
    %945 = arith.maximumf %941, %937 : vector<8x128xf32>
    %c1_i32_221 = arith.constant 1 : i32
    %946 = vector.broadcast %c1_i32_221 : i32 to vector<8x128xi32>
    %947 = arith.select %835, %944, %946 : vector<8x128xi1>, vector<8x128xi32>
    %c2_i32_222 = arith.constant 2 : i32
    %948 = vector.broadcast %c2_i32_222 : i32 to vector<8x128xi32>
    %949 = arith.shli %947, %948 : vector<8x128xi32>
    %950 = arith.ori %929, %949 : vector<8x128xi32>
    %951 = arith.addf %945, %830 : vector<8x128xf32>
    %952 = arith.select %835, %951, %800 : vector<8x128xi1>, vector<8x128xf32>
    %953 = vector.broadcast %8 : f32 to vector<8x128xf32>
    %954 = arith.addf %779, %953 : vector<8x128xf32>
    %955 = vector.broadcast %11 : f32 to vector<8x128xf32>
    %956 = arith.addf %800, %955 : vector<8x128xf32>
    %957 = vector.broadcast %14 : f32 to vector<8x128xf32>
    %958 = arith.addf %821, %957 : vector<8x128xf32>
    %959 = arith.cmpf ogt, %956, %954 : vector<8x128xf32>
    %c1_i32_223 = arith.constant 1 : i32
    %960 = vector.broadcast %c1_i32_223 : i32 to vector<8x128xi32>
    %961 = arith.select %959, %960, %28 : vector<8x128xi1>, vector<8x128xi32>
    %962 = arith.maximumf %954, %956 : vector<8x128xf32>
    %963 = arith.cmpf ogt, %958, %962 : vector<8x128xf32>
    %c2_i32_224 = arith.constant 2 : i32
    %964 = vector.broadcast %c2_i32_224 : i32 to vector<8x128xi32>
    %965 = arith.select %963, %964, %961 : vector<8x128xi1>, vector<8x128xi32>
    %966 = arith.maximumf %962, %958 : vector<8x128xf32>
    %c2_i32_225 = arith.constant 2 : i32
    %967 = vector.broadcast %c2_i32_225 : i32 to vector<8x128xi32>
    %968 = arith.select %835, %965, %967 : vector<8x128xi1>, vector<8x128xi32>
    %c4_i32_226 = arith.constant 4 : i32
    %969 = vector.broadcast %c4_i32_226 : i32 to vector<8x128xi32>
    %970 = arith.shli %968, %969 : vector<8x128xi32>
    %971 = arith.ori %950, %970 : vector<8x128xi32>
    %972 = arith.addf %966, %833 : vector<8x128xf32>
    %973 = arith.select %835, %972, %821 : vector<8x128xi1>, vector<8x128xf32>
    %c6_227 = arith.constant 6 : index
    %c0_228 = arith.constant 0 : index
    %c0_229 = arith.constant 0 : index
    %974 = vector.load %arg10[%c6_227, %c0_228, %c0_229] : memref<8x8x128xi32, #tpu.memory_space<vmem>>, vector<1x8x128xi32>
    %975 = vector.shape_cast %974 : vector<1x8x128xi32> to vector<8x128xi32>
    %976 = vector.shape_cast %971 : vector<8x128xi32> to vector<1x8x128xi32>
    tpu.vector_store %arg10[%c6_227, %c0_228, %c0_229], %976 {strides = array<i32>} : memref<8x8x128xi32, #tpu.memory_space<vmem>>, vector<1x8x128xi32>,
    %c7 = arith.constant 7 : index
    %c0_230 = arith.constant 0 : index
    %977 = arith.index_cast %25 : i32 to index
    %c0_231 = arith.constant 0 : index
    %978 = vector.load %arg1[%c7, %c0_230, %977, %c0_231] : memref<8x3x8x128xf32, #tpu.memory_space<vmem>>, vector<1x1x8x128xf32>
    %979 = vector.shape_cast %978 : vector<1x1x8x128xf32> to vector<8x128xf32>
    %c7_232 = arith.constant 7 : index
    %c1_233 = arith.constant 1 : index
    %980 = arith.index_cast %25 : i32 to index
    %c0_234 = arith.constant 0 : index
    %981 = vector.load %arg1[%c7_232, %c1_233, %980, %c0_234] : memref<8x3x8x128xf32, #tpu.memory_space<vmem>>, vector<1x1x8x128xf32>
    %982 = vector.shape_cast %981 : vector<1x1x8x128xf32> to vector<8x128xf32>
    %c7_235 = arith.constant 7 : index
    %c2_236 = arith.constant 2 : index
    %983 = arith.index_cast %25 : i32 to index
    %c0_237 = arith.constant 0 : index
    %984 = vector.load %arg1[%c7_235, %c2_236, %983, %c0_237] : memref<8x3x8x128xf32, #tpu.memory_space<vmem>>, vector<1x1x8x128xf32>
    %985 = vector.shape_cast %984 : vector<1x1x8x128xf32> to vector<8x128xf32>
    %c7_i32 = arith.constant 7 : i32
    %986 = vector.broadcast %c7_i32 : i32 to vector<8x128xi32>
    %987 = arith.cmpi sgt, %27, %986 : vector<8x128xi32>
    %c7_238 = arith.constant 7 : index
    %988 = arith.index_cast %25 : i32 to index
    %c0_239 = arith.constant 0 : index
    %989 = vector.load %arg2[%c7_238, %988, %c0_239] : memref<8x8x128xi32, #tpu.memory_space<vmem>>, vector<1x8x128xi32>
    %990 = vector.shape_cast %989 : vector<1x8x128xi32> to vector<8x128xi32>
    %c0_i32_240 = arith.constant 0 : i32
    %991 = vector.broadcast %c0_i32_240 : i32 to vector<8x128xi32>
    %992 = arith.cmpi eq, %990, %991 : vector<8x128xi32>
    %c1_i32_241 = arith.constant 1 : i32
    %993 = vector.broadcast %c1_i32_241 : i32 to vector<8x128xi32>
    %994 = arith.cmpi eq, %990, %993 : vector<8x128xi32>
    %c0_i32_242 = arith.constant 0 : i32
    %995 = vector.broadcast %c0_i32_242 : i32 to vector<8x128xi32>
    %996 = arith.cmpi eq, %869, %995 : vector<8x128xi32>
    %c1_i32_243 = arith.constant 1 : i32
    %997 = vector.broadcast %c1_i32_243 : i32 to vector<8x128xi32>
    %998 = arith.cmpi eq, %869, %997 : vector<8x128xi32>
    %999 = arith.select %994, %982, %985 : vector<8x128xi1>, vector<8x128xf32>
    %1000 = arith.select %992, %979, %999 : vector<8x128xi1>, vector<8x128xf32>
    %1001 = vector.broadcast %7 : f32 to vector<8x128xf32>
    %1002 = vector.broadcast %8 : f32 to vector<8x128xf32>
    %1003 = arith.select %994, %1001, %1002 : vector<8x128xi1>, vector<8x128xf32>
    %1004 = vector.broadcast %6 : f32 to vector<8x128xf32>
    %1005 = arith.select %992, %1004, %1003 : vector<8x128xi1>, vector<8x128xf32>
    %1006 = vector.broadcast %10 : f32 to vector<8x128xf32>
    %1007 = vector.broadcast %11 : f32 to vector<8x128xf32>
    %1008 = arith.select %994, %1006, %1007 : vector<8x128xi1>, vector<8x128xf32>
    %1009 = vector.broadcast %9 : f32 to vector<8x128xf32>
    %1010 = arith.select %992, %1009, %1008 : vector<8x128xi1>, vector<8x128xf32>
    %1011 = vector.broadcast %13 : f32 to vector<8x128xf32>
    %1012 = vector.broadcast %14 : f32 to vector<8x128xf32>
    %1013 = arith.select %994, %1011, %1012 : vector<8x128xi1>, vector<8x128xf32>
    %1014 = vector.broadcast %12 : f32 to vector<8x128xf32>
    %1015 = arith.select %992, %1014, %1013 : vector<8x128xi1>, vector<8x128xf32>
    %1016 = arith.select %998, %1010, %1015 : vector<8x128xi1>, vector<8x128xf32>
    %1017 = arith.select %996, %1005, %1016 : vector<8x128xi1>, vector<8x128xf32>
    %1018 = arith.addf %868, %1017 : vector<8x128xf32>
    %1019 = arith.addf %1018, %1000 : vector<8x128xf32>
    %1020 = arith.select %987, %1019, %868 : vector<8x128xi1>, vector<8x128xf32>
    %1021 = arith.select %987, %990, %869 : vector<8x128xi1>, vector<8x128xi32>
    %1022 = arith.maximumf %889, %901 : vector<8x128xf32>
    %1023 = arith.maximumf %1022, %913 : vector<8x128xf32>
    %1024 = arith.subf %889, %1023 : vector<8x128xf32>
    %1025 = math.exp %1024 : vector<8x128xf32>
    %1026 = arith.subf %901, %1023 : vector<8x128xf32>
    %1027 = math.exp %1026 : vector<8x128xf32>
    %1028 = arith.subf %913, %1023 : vector<8x128xf32>
    %1029 = math.exp %1028 : vector<8x128xf32>
    %1030 = vector.broadcast %15 : f32 to vector<8x128xf32>
    %1031 = arith.mulf %1025, %1030 : vector<8x128xf32>
    %1032 = vector.broadcast %18 : f32 to vector<8x128xf32>
    %1033 = arith.mulf %1027, %1032 : vector<8x128xf32>
    %1034 = arith.addf %1031, %1033 : vector<8x128xf32>
    %1035 = vector.broadcast %21 : f32 to vector<8x128xf32>
    %1036 = arith.mulf %1029, %1035 : vector<8x128xf32>
    %1037 = arith.addf %1034, %1036 : vector<8x128xf32>
    %1038 = math.log %1037 : vector<8x128xf32>
    %1039 = arith.addf %1023, %1038 : vector<8x128xf32>
    %1040 = arith.addf %1039, %979 : vector<8x128xf32>
    %1041 = arith.select %987, %1040, %889 : vector<8x128xi1>, vector<8x128xf32>
    %1042 = vector.broadcast %16 : f32 to vector<8x128xf32>
    %1043 = arith.mulf %1025, %1042 : vector<8x128xf32>
    %1044 = vector.broadcast %19 : f32 to vector<8x128xf32>
    %1045 = arith.mulf %1027, %1044 : vector<8x128xf32>
    %1046 = arith.addf %1043, %1045 : vector<8x128xf32>
    %1047 = vector.broadcast %22 : f32 to vector<8x128xf32>
    %1048 = arith.mulf %1029, %1047 : vector<8x128xf32>
    %1049 = arith.addf %1046, %1048 : vector<8x128xf32>
    %1050 = math.log %1049 : vector<8x128xf32>
    %1051 = arith.addf %1023, %1050 : vector<8x128xf32>
    %1052 = arith.addf %1051, %982 : vector<8x128xf32>
    %1053 = arith.select %987, %1052, %901 : vector<8x128xi1>, vector<8x128xf32>
    %1054 = vector.broadcast %17 : f32 to vector<8x128xf32>
    %1055 = arith.mulf %1025, %1054 : vector<8x128xf32>
    %1056 = vector.broadcast %20 : f32 to vector<8x128xf32>
    %1057 = arith.mulf %1027, %1056 : vector<8x128xf32>
    %1058 = arith.addf %1055, %1057 : vector<8x128xf32>
    %1059 = vector.broadcast %23 : f32 to vector<8x128xf32>
    %1060 = arith.mulf %1029, %1059 : vector<8x128xf32>
    %1061 = arith.addf %1058, %1060 : vector<8x128xf32>
    %1062 = math.log %1061 : vector<8x128xf32>
    %1063 = arith.addf %1023, %1062 : vector<8x128xf32>
    %1064 = arith.addf %1063, %985 : vector<8x128xf32>
    %1065 = arith.select %987, %1064, %913 : vector<8x128xi1>, vector<8x128xf32>
    %1066 = vector.broadcast %6 : f32 to vector<8x128xf32>
    %1067 = arith.addf %931, %1066 : vector<8x128xf32>
    %1068 = vector.broadcast %9 : f32 to vector<8x128xf32>
    %1069 = arith.addf %952, %1068 : vector<8x128xf32>
    %1070 = vector.broadcast %12 : f32 to vector<8x128xf32>
    %1071 = arith.addf %973, %1070 : vector<8x128xf32>
    %1072 = arith.cmpf ogt, %1069, %1067 : vector<8x128xf32>
    %c1_i32_244 = arith.constant 1 : i32
    %1073 = vector.broadcast %c1_i32_244 : i32 to vector<8x128xi32>
    %1074 = arith.select %1072, %1073, %28 : vector<8x128xi1>, vector<8x128xi32>
    %1075 = arith.maximumf %1067, %1069 : vector<8x128xf32>
    %1076 = arith.cmpf ogt, %1071, %1075 : vector<8x128xf32>
    %c2_i32_245 = arith.constant 2 : i32
    %1077 = vector.broadcast %c2_i32_245 : i32 to vector<8x128xi32>
    %1078 = arith.select %1076, %1077, %1074 : vector<8x128xi1>, vector<8x128xi32>
    %1079 = arith.maximumf %1075, %1071 : vector<8x128xf32>
    %c0_i32_246 = arith.constant 0 : i32
    %1080 = vector.broadcast %c0_i32_246 : i32 to vector<8x128xi32>
    %1081 = arith.select %987, %1078, %1080 : vector<8x128xi1>, vector<8x128xi32>
    %1082 = arith.addf %1079, %979 : vector<8x128xf32>
    %1083 = arith.select %987, %1082, %931 : vector<8x128xi1>, vector<8x128xf32>
    %1084 = vector.broadcast %7 : f32 to vector<8x128xf32>
    %1085 = arith.addf %931, %1084 : vector<8x128xf32>
    %1086 = vector.broadcast %10 : f32 to vector<8x128xf32>
    %1087 = arith.addf %952, %1086 : vector<8x128xf32>
    %1088 = vector.broadcast %13 : f32 to vector<8x128xf32>
    %1089 = arith.addf %973, %1088 : vector<8x128xf32>
    %1090 = arith.cmpf ogt, %1087, %1085 : vector<8x128xf32>
    %c1_i32_247 = arith.constant 1 : i32
    %1091 = vector.broadcast %c1_i32_247 : i32 to vector<8x128xi32>
    %1092 = arith.select %1090, %1091, %28 : vector<8x128xi1>, vector<8x128xi32>
    %1093 = arith.maximumf %1085, %1087 : vector<8x128xf32>
    %1094 = arith.cmpf ogt, %1089, %1093 : vector<8x128xf32>
    %c2_i32_248 = arith.constant 2 : i32
    %1095 = vector.broadcast %c2_i32_248 : i32 to vector<8x128xi32>
    %1096 = arith.select %1094, %1095, %1092 : vector<8x128xi1>, vector<8x128xi32>
    %1097 = arith.maximumf %1093, %1089 : vector<8x128xf32>
    %c1_i32_249 = arith.constant 1 : i32
    %1098 = vector.broadcast %c1_i32_249 : i32 to vector<8x128xi32>
    %1099 = arith.select %987, %1096, %1098 : vector<8x128xi1>, vector<8x128xi32>
    %c2_i32_250 = arith.constant 2 : i32
    %1100 = vector.broadcast %c2_i32_250 : i32 to vector<8x128xi32>
    %1101 = arith.shli %1099, %1100 : vector<8x128xi32>
    %1102 = arith.ori %1081, %1101 : vector<8x128xi32>
    %1103 = arith.addf %1097, %982 : vector<8x128xf32>
    %1104 = arith.select %987, %1103, %952 : vector<8x128xi1>, vector<8x128xf32>
    %1105 = vector.broadcast %8 : f32 to vector<8x128xf32>
    %1106 = arith.addf %931, %1105 : vector<8x128xf32>
    %1107 = vector.broadcast %11 : f32 to vector<8x128xf32>
    %1108 = arith.addf %952, %1107 : vector<8x128xf32>
    %1109 = vector.broadcast %14 : f32 to vector<8x128xf32>
    %1110 = arith.addf %973, %1109 : vector<8x128xf32>
    %1111 = arith.cmpf ogt, %1108, %1106 : vector<8x128xf32>
    %c1_i32_251 = arith.constant 1 : i32
    %1112 = vector.broadcast %c1_i32_251 : i32 to vector<8x128xi32>
    %1113 = arith.select %1111, %1112, %28 : vector<8x128xi1>, vector<8x128xi32>
    %1114 = arith.maximumf %1106, %1108 : vector<8x128xf32>
    %1115 = arith.cmpf ogt, %1110, %1114 : vector<8x128xf32>
    %c2_i32_252 = arith.constant 2 : i32
    %1116 = vector.broadcast %c2_i32_252 : i32 to vector<8x128xi32>
    %1117 = arith.select %1115, %1116, %1113 : vector<8x128xi1>, vector<8x128xi32>
    %1118 = arith.maximumf %1114, %1110 : vector<8x128xf32>
    %c2_i32_253 = arith.constant 2 : i32
    %1119 = vector.broadcast %c2_i32_253 : i32 to vector<8x128xi32>
    %1120 = arith.select %987, %1117, %1119 : vector<8x128xi1>, vector<8x128xi32>
    %c4_i32_254 = arith.constant 4 : i32
    %1121 = vector.broadcast %c4_i32_254 : i32 to vector<8x128xi32>
    %1122 = arith.shli %1120, %1121 : vector<8x128xi32>
    %1123 = arith.ori %1102, %1122 : vector<8x128xi32>
    %1124 = arith.addf %1118, %985 : vector<8x128xf32>
    %1125 = arith.select %987, %1124, %973 : vector<8x128xi1>, vector<8x128xf32>
    %c7_255 = arith.constant 7 : index
    %c0_256 = arith.constant 0 : index
    %c0_257 = arith.constant 0 : index
    %1126 = vector.load %arg10[%c7_255, %c0_256, %c0_257] : memref<8x8x128xi32, #tpu.memory_space<vmem>>, vector<1x8x128xi32>
    %1127 = vector.shape_cast %1126 : vector<1x8x128xi32> to vector<8x128xi32>
    %1128 = vector.shape_cast %1123 : vector<8x128xi32> to vector<1x8x128xi32>
    tpu.vector_store %arg10[%c7_255, %c0_256, %c0_257], %1128 {strides = array<i32>} : memref<8x8x128xi32, #tpu.memory_space<vmem>>, vector<1x8x128xi32>,
    %c0_i32_258 = arith.constant 0 : i32
    %1129 = vector.broadcast %c0_i32_258 : i32 to vector<8x128xi32>
    %1130 = arith.cmpi eq, %1021, %1129 : vector<8x128xi32>
    %c1_i32_259 = arith.constant 1 : i32
    %1131 = vector.broadcast %c1_i32_259 : i32 to vector<8x128xi32>
    %1132 = arith.cmpi eq, %1021, %1131 : vector<8x128xi32>
    %1133 = vector.broadcast %4 : f32 to vector<8x128xf32>
    %1134 = vector.broadcast %5 : f32 to vector<8x128xf32>
    %1135 = arith.select %1132, %1133, %1134 : vector<8x128xi1>, vector<8x128xf32>
    %1136 = vector.broadcast %3 : f32 to vector<8x128xf32>
    %1137 = arith.select %1130, %1136, %1135 : vector<8x128xi1>, vector<8x128xf32>
    %1138 = arith.addf %1020, %1137 : vector<8x128xf32>
    %1139 = vector.broadcast %3 : f32 to vector<8x128xf32>
    %1140 = arith.addf %1041, %1139 : vector<8x128xf32>
    %1141 = vector.broadcast %4 : f32 to vector<8x128xf32>
    %1142 = arith.addf %1053, %1141 : vector<8x128xf32>
    %1143 = vector.broadcast %5 : f32 to vector<8x128xf32>
    %1144 = arith.addf %1065, %1143 : vector<8x128xf32>
    %1145 = arith.maximumf %1140, %1142 : vector<8x128xf32>
    %1146 = arith.maximumf %1145, %1144 : vector<8x128xf32>
    %1147 = arith.subf %1140, %1146 : vector<8x128xf32>
    %1148 = math.exp %1147 : vector<8x128xf32>
    %1149 = arith.subf %1142, %1146 : vector<8x128xf32>
    %1150 = math.exp %1149 : vector<8x128xf32>
    %1151 = arith.addf %1148, %1150 : vector<8x128xf32>
    %1152 = arith.subf %1144, %1146 : vector<8x128xf32>
    %1153 = math.exp %1152 : vector<8x128xf32>
    %1154 = arith.addf %1151, %1153 : vector<8x128xf32>
    %1155 = math.log %1154 : vector<8x128xf32>
    %1156 = arith.addf %1146, %1155 : vector<8x128xf32>
    %1157 = arith.subf %1138, %1156 : vector<8x128xf32>
    %1158 = arith.index_cast %25 : i32 to index
    %c0_260 = arith.constant 0 : index
    %1159 = vector.load %arg8[%1158, %c0_260] : memref<8x128xf32, #tpu.memory_space<vmem>>, vector<8x128xf32>
    tpu.vector_store %arg8[%1158, %c0_260], %1157 {strides = array<i32>} : memref<8x128xf32, #tpu.memory_space<vmem>>, vector<8x128xf32>,
    %1160 = vector.broadcast %3 : f32 to vector<8x128xf32>
    %1161 = arith.addf %1083, %1160 : vector<8x128xf32>
    %1162 = vector.broadcast %4 : f32 to vector<8x128xf32>
    %1163 = arith.addf %1104, %1162 : vector<8x128xf32>
    %1164 = vector.broadcast %5 : f32 to vector<8x128xf32>
    %1165 = arith.addf %1125, %1164 : vector<8x128xf32>
    %1166 = arith.cmpf ogt, %1163, %1161 : vector<8x128xf32>
    %c1_i32_261 = arith.constant 1 : i32
    %1167 = vector.broadcast %c1_i32_261 : i32 to vector<8x128xi32>
    %1168 = arith.select %1166, %1167, %28 : vector<8x128xi1>, vector<8x128xi32>
    %1169 = arith.maximumf %1161, %1163 : vector<8x128xf32>
    %1170 = arith.cmpf ogt, %1165, %1169 : vector<8x128xf32>
    %c2_i32_262 = arith.constant 2 : i32
    %1171 = vector.broadcast %c2_i32_262 : i32 to vector<8x128xi32>
    %1172 = arith.select %1170, %1171, %1168 : vector<8x128xi1>, vector<8x128xi32>
    %c7_263 = arith.constant 7 : index
    %1173 = arith.index_cast %25 : i32 to index
    %c0_264 = arith.constant 0 : index
    %1174 = vector.load %arg9[%c7_263, %1173, %c0_264] : memref<8x8x128xi32, #tpu.memory_space<vmem>>, vector<1x8x128xi32>
    %1175 = vector.shape_cast %1174 : vector<1x8x128xi32> to vector<8x128xi32>
    %1176 = vector.shape_cast %1172 : vector<8x128xi32> to vector<1x8x128xi32>
    tpu.vector_store %arg9[%c7_263, %1173, %c0_264], %1176 {strides = array<i32>} : memref<8x8x128xi32, #tpu.memory_space<vmem>>, vector<1x8x128xi32>,
    %c7_265 = arith.constant 7 : index
    %c0_266 = arith.constant 0 : index
    %c0_267 = arith.constant 0 : index
    %1177 = vector.load %arg10[%c7_265, %c0_266, %c0_267] : memref<8x8x128xi32, #tpu.memory_space<vmem>>, vector<1x8x128xi32>
    %1178 = vector.shape_cast %1177 : vector<1x8x128xi32> to vector<8x128xi32>
    %c0_i32_268 = arith.constant 0 : i32
    %1179 = vector.broadcast %c0_i32_268 : i32 to vector<8x128xi32>
    %1180 = arith.cmpi eq, %1172, %1179 : vector<8x128xi32>
    %c1_i32_269 = arith.constant 1 : i32
    %1181 = vector.broadcast %c1_i32_269 : i32 to vector<8x128xi32>
    %1182 = arith.cmpi eq, %1172, %1181 : vector<8x128xi32>
    %c3_i32_270 = arith.constant 3 : i32
    %1183 = vector.broadcast %c3_i32_270 : i32 to vector<8x128xi32>
    %1184 = arith.andi %1178, %1183 : vector<8x128xi32>
    %c2_i32_271 = arith.constant 2 : i32
    %1185 = vector.broadcast %c2_i32_271 : i32 to vector<8x128xi32>
    %1186 = arith.shrsi %1178, %1185 : vector<8x128xi32>
    %c3_i32_272 = arith.constant 3 : i32
    %1187 = vector.broadcast %c3_i32_272 : i32 to vector<8x128xi32>
    %1188 = arith.andi %1186, %1187 : vector<8x128xi32>
    %c4_i32_273 = arith.constant 4 : i32
    %1189 = vector.broadcast %c4_i32_273 : i32 to vector<8x128xi32>
    %1190 = arith.shrsi %1178, %1189 : vector<8x128xi32>
    %c3_i32_274 = arith.constant 3 : i32
    %1191 = vector.broadcast %c3_i32_274 : i32 to vector<8x128xi32>
    %1192 = arith.andi %1190, %1191 : vector<8x128xi32>
    %1193 = arith.select %1182, %1188, %1192 : vector<8x128xi1>, vector<8x128xi32>
    %1194 = arith.select %1180, %1184, %1193 : vector<8x128xi1>, vector<8x128xi32>
    %c6_275 = arith.constant 6 : index
    %1195 = arith.index_cast %25 : i32 to index
    %c0_276 = arith.constant 0 : index
    %1196 = vector.load %arg9[%c6_275, %1195, %c0_276] : memref<8x8x128xi32, #tpu.memory_space<vmem>>, vector<1x8x128xi32>
    %1197 = vector.shape_cast %1196 : vector<1x8x128xi32> to vector<8x128xi32>
    %1198 = vector.shape_cast %1194 : vector<8x128xi32> to vector<1x8x128xi32>
    tpu.vector_store %arg9[%c6_275, %1195, %c0_276], %1198 {strides = array<i32>} : memref<8x8x128xi32, #tpu.memory_space<vmem>>, vector<1x8x128xi32>,
    %c6_277 = arith.constant 6 : index
    %c0_278 = arith.constant 0 : index
    %c0_279 = arith.constant 0 : index
    %1199 = vector.load %arg10[%c6_277, %c0_278, %c0_279] : memref<8x8x128xi32, #tpu.memory_space<vmem>>, vector<1x8x128xi32>
    %1200 = vector.shape_cast %1199 : vector<1x8x128xi32> to vector<8x128xi32>
    %c0_i32_280 = arith.constant 0 : i32
    %1201 = vector.broadcast %c0_i32_280 : i32 to vector<8x128xi32>
    %1202 = arith.cmpi eq, %1194, %1201 : vector<8x128xi32>
    %c1_i32_281 = arith.constant 1 : i32
    %1203 = vector.broadcast %c1_i32_281 : i32 to vector<8x128xi32>
    %1204 = arith.cmpi eq, %1194, %1203 : vector<8x128xi32>
    %c3_i32_282 = arith.constant 3 : i32
    %1205 = vector.broadcast %c3_i32_282 : i32 to vector<8x128xi32>
    %1206 = arith.andi %1200, %1205 : vector<8x128xi32>
    %c2_i32_283 = arith.constant 2 : i32
    %1207 = vector.broadcast %c2_i32_283 : i32 to vector<8x128xi32>
    %1208 = arith.shrsi %1200, %1207 : vector<8x128xi32>
    %c3_i32_284 = arith.constant 3 : i32
    %1209 = vector.broadcast %c3_i32_284 : i32 to vector<8x128xi32>
    %1210 = arith.andi %1208, %1209 : vector<8x128xi32>
    %c4_i32_285 = arith.constant 4 : i32
    %1211 = vector.broadcast %c4_i32_285 : i32 to vector<8x128xi32>
    %1212 = arith.shrsi %1200, %1211 : vector<8x128xi32>
    %c3_i32_286 = arith.constant 3 : i32
    %1213 = vector.broadcast %c3_i32_286 : i32 to vector<8x128xi32>
    %1214 = arith.andi %1212, %1213 : vector<8x128xi32>
    %1215 = arith.select %1204, %1210, %1214 : vector<8x128xi1>, vector<8x128xi32>
    %1216 = arith.select %1202, %1206, %1215 : vector<8x128xi1>, vector<8x128xi32>
    %c5_287 = arith.constant 5 : index
    %1217 = arith.index_cast %25 : i32 to index
    %c0_288 = arith.constant 0 : index
    %1218 = vector.load %arg9[%c5_287, %1217, %c0_288] : memref<8x8x128xi32, #tpu.memory_space<vmem>>, vector<1x8x128xi32>
    %1219 = vector.shape_cast %1218 : vector<1x8x128xi32> to vector<8x128xi32>
    %1220 = vector.shape_cast %1216 : vector<8x128xi32> to vector<1x8x128xi32>
    tpu.vector_store %arg9[%c5_287, %1217, %c0_288], %1220 {strides = array<i32>} : memref<8x8x128xi32, #tpu.memory_space<vmem>>, vector<1x8x128xi32>,
    %c5_289 = arith.constant 5 : index
    %c0_290 = arith.constant 0 : index
    %c0_291 = arith.constant 0 : index
    %1221 = vector.load %arg10[%c5_289, %c0_290, %c0_291] : memref<8x8x128xi32, #tpu.memory_space<vmem>>, vector<1x8x128xi32>
    %1222 = vector.shape_cast %1221 : vector<1x8x128xi32> to vector<8x128xi32>
    %c0_i32_292 = arith.constant 0 : i32
    %1223 = vector.broadcast %c0_i32_292 : i32 to vector<8x128xi32>
    %1224 = arith.cmpi eq, %1216, %1223 : vector<8x128xi32>
    %c1_i32_293 = arith.constant 1 : i32
    %1225 = vector.broadcast %c1_i32_293 : i32 to vector<8x128xi32>
    %1226 = arith.cmpi eq, %1216, %1225 : vector<8x128xi32>
    %c3_i32_294 = arith.constant 3 : i32
    %1227 = vector.broadcast %c3_i32_294 : i32 to vector<8x128xi32>
    %1228 = arith.andi %1222, %1227 : vector<8x128xi32>
    %c2_i32_295 = arith.constant 2 : i32
    %1229 = vector.broadcast %c2_i32_295 : i32 to vector<8x128xi32>
    %1230 = arith.shrsi %1222, %1229 : vector<8x128xi32>
    %c3_i32_296 = arith.constant 3 : i32
    %1231 = vector.broadcast %c3_i32_296 : i32 to vector<8x128xi32>
    %1232 = arith.andi %1230, %1231 : vector<8x128xi32>
    %c4_i32_297 = arith.constant 4 : i32
    %1233 = vector.broadcast %c4_i32_297 : i32 to vector<8x128xi32>
    %1234 = arith.shrsi %1222, %1233 : vector<8x128xi32>
    %c3_i32_298 = arith.constant 3 : i32
    %1235 = vector.broadcast %c3_i32_298 : i32 to vector<8x128xi32>
    %1236 = arith.andi %1234, %1235 : vector<8x128xi32>
    %1237 = arith.select %1226, %1232, %1236 : vector<8x128xi1>, vector<8x128xi32>
    %1238 = arith.select %1224, %1228, %1237 : vector<8x128xi1>, vector<8x128xi32>
    %c4_299 = arith.constant 4 : index
    %1239 = arith.index_cast %25 : i32 to index
    %c0_300 = arith.constant 0 : index
    %1240 = vector.load %arg9[%c4_299, %1239, %c0_300] : memref<8x8x128xi32, #tpu.memory_space<vmem>>, vector<1x8x128xi32>
    %1241 = vector.shape_cast %1240 : vector<1x8x128xi32> to vector<8x128xi32>
    %1242 = vector.shape_cast %1238 : vector<8x128xi32> to vector<1x8x128xi32>
    tpu.vector_store %arg9[%c4_299, %1239, %c0_300], %1242 {strides = array<i32>} : memref<8x8x128xi32, #tpu.memory_space<vmem>>, vector<1x8x128xi32>,
    %c4_301 = arith.constant 4 : index
    %c0_302 = arith.constant 0 : index
    %c0_303 = arith.constant 0 : index
    %1243 = vector.load %arg10[%c4_301, %c0_302, %c0_303] : memref<8x8x128xi32, #tpu.memory_space<vmem>>, vector<1x8x128xi32>
    %1244 = vector.shape_cast %1243 : vector<1x8x128xi32> to vector<8x128xi32>
    %c0_i32_304 = arith.constant 0 : i32
    %1245 = vector.broadcast %c0_i32_304 : i32 to vector<8x128xi32>
    %1246 = arith.cmpi eq, %1238, %1245 : vector<8x128xi32>
    %c1_i32_305 = arith.constant 1 : i32
    %1247 = vector.broadcast %c1_i32_305 : i32 to vector<8x128xi32>
    %1248 = arith.cmpi eq, %1238, %1247 : vector<8x128xi32>
    %c3_i32_306 = arith.constant 3 : i32
    %1249 = vector.broadcast %c3_i32_306 : i32 to vector<8x128xi32>
    %1250 = arith.andi %1244, %1249 : vector<8x128xi32>
    %c2_i32_307 = arith.constant 2 : i32
    %1251 = vector.broadcast %c2_i32_307 : i32 to vector<8x128xi32>
    %1252 = arith.shrsi %1244, %1251 : vector<8x128xi32>
    %c3_i32_308 = arith.constant 3 : i32
    %1253 = vector.broadcast %c3_i32_308 : i32 to vector<8x128xi32>
    %1254 = arith.andi %1252, %1253 : vector<8x128xi32>
    %c4_i32_309 = arith.constant 4 : i32
    %1255 = vector.broadcast %c4_i32_309 : i32 to vector<8x128xi32>
    %1256 = arith.shrsi %1244, %1255 : vector<8x128xi32>
    %c3_i32_310 = arith.constant 3 : i32
    %1257 = vector.broadcast %c3_i32_310 : i32 to vector<8x128xi32>
    %1258 = arith.andi %1256, %1257 : vector<8x128xi32>
    %1259 = arith.select %1248, %1254, %1258 : vector<8x128xi1>, vector<8x128xi32>
    %1260 = arith.select %1246, %1250, %1259 : vector<8x128xi1>, vector<8x128xi32>
    %c3_311 = arith.constant 3 : index
    %1261 = arith.index_cast %25 : i32 to index
    %c0_312 = arith.constant 0 : index
    %1262 = vector.load %arg9[%c3_311, %1261, %c0_312] : memref<8x8x128xi32, #tpu.memory_space<vmem>>, vector<1x8x128xi32>
    %1263 = vector.shape_cast %1262 : vector<1x8x128xi32> to vector<8x128xi32>
    %1264 = vector.shape_cast %1260 : vector<8x128xi32> to vector<1x8x128xi32>
    tpu.vector_store %arg9[%c3_311, %1261, %c0_312], %1264 {strides = array<i32>} : memref<8x8x128xi32, #tpu.memory_space<vmem>>, vector<1x8x128xi32>,
    %c3_313 = arith.constant 3 : index
    %c0_314 = arith.constant 0 : index
    %c0_315 = arith.constant 0 : index
    %1265 = vector.load %arg10[%c3_313, %c0_314, %c0_315] : memref<8x8x128xi32, #tpu.memory_space<vmem>>, vector<1x8x128xi32>
    %1266 = vector.shape_cast %1265 : vector<1x8x128xi32> to vector<8x128xi32>
    %c0_i32_316 = arith.constant 0 : i32
    %1267 = vector.broadcast %c0_i32_316 : i32 to vector<8x128xi32>
    %1268 = arith.cmpi eq, %1260, %1267 : vector<8x128xi32>
    %c1_i32_317 = arith.constant 1 : i32
    %1269 = vector.broadcast %c1_i32_317 : i32 to vector<8x128xi32>
    %1270 = arith.cmpi eq, %1260, %1269 : vector<8x128xi32>
    %c3_i32_318 = arith.constant 3 : i32
    %1271 = vector.broadcast %c3_i32_318 : i32 to vector<8x128xi32>
    %1272 = arith.andi %1266, %1271 : vector<8x128xi32>
    %c2_i32_319 = arith.constant 2 : i32
    %1273 = vector.broadcast %c2_i32_319 : i32 to vector<8x128xi32>
    %1274 = arith.shrsi %1266, %1273 : vector<8x128xi32>
    %c3_i32_320 = arith.constant 3 : i32
    %1275 = vector.broadcast %c3_i32_320 : i32 to vector<8x128xi32>
    %1276 = arith.andi %1274, %1275 : vector<8x128xi32>
    %c4_i32_321 = arith.constant 4 : i32
    %1277 = vector.broadcast %c4_i32_321 : i32 to vector<8x128xi32>
    %1278 = arith.shrsi %1266, %1277 : vector<8x128xi32>
    %c3_i32_322 = arith.constant 3 : i32
    %1279 = vector.broadcast %c3_i32_322 : i32 to vector<8x128xi32>
    %1280 = arith.andi %1278, %1279 : vector<8x128xi32>
    %1281 = arith.select %1270, %1276, %1280 : vector<8x128xi1>, vector<8x128xi32>
    %1282 = arith.select %1268, %1272, %1281 : vector<8x128xi1>, vector<8x128xi32>
    %c2_323 = arith.constant 2 : index
    %1283 = arith.index_cast %25 : i32 to index
    %c0_324 = arith.constant 0 : index
    %1284 = vector.load %arg9[%c2_323, %1283, %c0_324] : memref<8x8x128xi32, #tpu.memory_space<vmem>>, vector<1x8x128xi32>
    %1285 = vector.shape_cast %1284 : vector<1x8x128xi32> to vector<8x128xi32>
    %1286 = vector.shape_cast %1282 : vector<8x128xi32> to vector<1x8x128xi32>
    tpu.vector_store %arg9[%c2_323, %1283, %c0_324], %1286 {strides = array<i32>} : memref<8x8x128xi32, #tpu.memory_space<vmem>>, vector<1x8x128xi32>,
    %c2_325 = arith.constant 2 : index
    %c0_326 = arith.constant 0 : index
    %c0_327 = arith.constant 0 : index
    %1287 = vector.load %arg10[%c2_325, %c0_326, %c0_327] : memref<8x8x128xi32, #tpu.memory_space<vmem>>, vector<1x8x128xi32>
    %1288 = vector.shape_cast %1287 : vector<1x8x128xi32> to vector<8x128xi32>
    %c0_i32_328 = arith.constant 0 : i32
    %1289 = vector.broadcast %c0_i32_328 : i32 to vector<8x128xi32>
    %1290 = arith.cmpi eq, %1282, %1289 : vector<8x128xi32>
    %c1_i32_329 = arith.constant 1 : i32
    %1291 = vector.broadcast %c1_i32_329 : i32 to vector<8x128xi32>
    %1292 = arith.cmpi eq, %1282, %1291 : vector<8x128xi32>
    %c3_i32_330 = arith.constant 3 : i32
    %1293 = vector.broadcast %c3_i32_330 : i32 to vector<8x128xi32>
    %1294 = arith.andi %1288, %1293 : vector<8x128xi32>
    %c2_i32_331 = arith.constant 2 : i32
    %1295 = vector.broadcast %c2_i32_331 : i32 to vector<8x128xi32>
    %1296 = arith.shrsi %1288, %1295 : vector<8x128xi32>
    %c3_i32_332 = arith.constant 3 : i32
    %1297 = vector.broadcast %c3_i32_332 : i32 to vector<8x128xi32>
    %1298 = arith.andi %1296, %1297 : vector<8x128xi32>
    %c4_i32_333 = arith.constant 4 : i32
    %1299 = vector.broadcast %c4_i32_333 : i32 to vector<8x128xi32>
    %1300 = arith.shrsi %1288, %1299 : vector<8x128xi32>
    %c3_i32_334 = arith.constant 3 : i32
    %1301 = vector.broadcast %c3_i32_334 : i32 to vector<8x128xi32>
    %1302 = arith.andi %1300, %1301 : vector<8x128xi32>
    %1303 = arith.select %1292, %1298, %1302 : vector<8x128xi1>, vector<8x128xi32>
    %1304 = arith.select %1290, %1294, %1303 : vector<8x128xi1>, vector<8x128xi32>
    %c1_335 = arith.constant 1 : index
    %1305 = arith.index_cast %25 : i32 to index
    %c0_336 = arith.constant 0 : index
    %1306 = vector.load %arg9[%c1_335, %1305, %c0_336] : memref<8x8x128xi32, #tpu.memory_space<vmem>>, vector<1x8x128xi32>
    %1307 = vector.shape_cast %1306 : vector<1x8x128xi32> to vector<8x128xi32>
    %1308 = vector.shape_cast %1304 : vector<8x128xi32> to vector<1x8x128xi32>
    tpu.vector_store %arg9[%c1_335, %1305, %c0_336], %1308 {strides = array<i32>} : memref<8x8x128xi32, #tpu.memory_space<vmem>>, vector<1x8x128xi32>,
    %c1_337 = arith.constant 1 : index
    %c0_338 = arith.constant 0 : index
    %c0_339 = arith.constant 0 : index
    %1309 = vector.load %arg10[%c1_337, %c0_338, %c0_339] : memref<8x8x128xi32, #tpu.memory_space<vmem>>, vector<1x8x128xi32>
    %1310 = vector.shape_cast %1309 : vector<1x8x128xi32> to vector<8x128xi32>
    %c0_i32_340 = arith.constant 0 : i32
    %1311 = vector.broadcast %c0_i32_340 : i32 to vector<8x128xi32>
    %1312 = arith.cmpi eq, %1304, %1311 : vector<8x128xi32>
    %c1_i32_341 = arith.constant 1 : i32
    %1313 = vector.broadcast %c1_i32_341 : i32 to vector<8x128xi32>
    %1314 = arith.cmpi eq, %1304, %1313 : vector<8x128xi32>
    %c3_i32_342 = arith.constant 3 : i32
    %1315 = vector.broadcast %c3_i32_342 : i32 to vector<8x128xi32>
    %1316 = arith.andi %1310, %1315 : vector<8x128xi32>
    %c2_i32_343 = arith.constant 2 : i32
    %1317 = vector.broadcast %c2_i32_343 : i32 to vector<8x128xi32>
    %1318 = arith.shrsi %1310, %1317 : vector<8x128xi32>
    %c3_i32_344 = arith.constant 3 : i32
    %1319 = vector.broadcast %c3_i32_344 : i32 to vector<8x128xi32>
    %1320 = arith.andi %1318, %1319 : vector<8x128xi32>
    %c4_i32_345 = arith.constant 4 : i32
    %1321 = vector.broadcast %c4_i32_345 : i32 to vector<8x128xi32>
    %1322 = arith.shrsi %1310, %1321 : vector<8x128xi32>
    %c3_i32_346 = arith.constant 3 : i32
    %1323 = vector.broadcast %c3_i32_346 : i32 to vector<8x128xi32>
    %1324 = arith.andi %1322, %1323 : vector<8x128xi32>
    %1325 = arith.select %1314, %1320, %1324 : vector<8x128xi1>, vector<8x128xi32>
    %1326 = arith.select %1312, %1316, %1325 : vector<8x128xi1>, vector<8x128xi32>
    %c0_347 = arith.constant 0 : index
    %1327 = arith.index_cast %25 : i32 to index
    %c0_348 = arith.constant 0 : index
    %1328 = vector.load %arg9[%c0_347, %1327, %c0_348] : memref<8x8x128xi32, #tpu.memory_space<vmem>>, vector<1x8x128xi32>
    %1329 = vector.shape_cast %1328 : vector<1x8x128xi32> to vector<8x128xi32>
    %1330 = vector.shape_cast %1326 : vector<8x128xi32> to vector<1x8x128xi32>
    tpu.vector_store %arg9[%c0_347, %1327, %c0_348], %1330 {strides = array<i32>} : memref<8x8x128xi32, #tpu.memory_space<vmem>>, vector<1x8x128xi32>,
    %c1_i32_349 = arith.constant 1 : i32
    return
  }
  func.func @transform_0(%arg0: i32) -> (i32, i32, i32, i32) {
    %c0_i32 = arith.constant 0 : i32
    %c0_i32_0 = arith.constant 0 : i32
    %c0_i32_1 = arith.constant 0 : i32
    %c0_i32_2 = arith.constant 0 : i32
    return %c0_i32, %c0_i32_0, %arg0, %c0_i32_1 : i32, i32, i32, i32
  }
  func.func @transform_1(%arg0: i32) -> (i32, i32, i32) {
    %c0_i32 = arith.constant 0 : i32
    %c0_i32_0 = arith.constant 0 : i32
    %c0_i32_1 = arith.constant 0 : i32
    return %c0_i32, %arg0, %c0_i32_0 : i32, i32, i32
  }
  func.func @transform_2(%arg0: i32) -> (i32, i32) {
    %c0_i32 = arith.constant 0 : i32
    %c0_i32_0 = arith.constant 0 : i32
    return %arg0, %c0_i32 : i32, i32
  }
  func.func @transform_3(%arg0: i32) -> (i32, i32) {
    %c0_i32 = arith.constant 0 : i32
    %c0_i32_0 = arith.constant 0 : i32
    %c0_i32_1 = arith.constant 0 : i32
    return %c0_i32, %c0_i32_0 : i32, i32
  }
  func.func @transform_4(%arg0: i32) -> (i32, i32) {
    %c0_i32 = arith.constant 0 : i32
    %c0_i32_0 = arith.constant 0 : i32
    %c0_i32_1 = arith.constant 0 : i32
    return %c0_i32, %c0_i32_0 : i32, i32
  }
  func.func @transform_5(%arg0: i32) -> (i32, i32) {
    %c0_i32 = arith.constant 0 : i32
    %c0_i32_0 = arith.constant 0 : i32
    %c0_i32_1 = arith.constant 0 : i32
    return %c0_i32, %c0_i32_0 : i32, i32
  }
  func.func @transform_6(%arg0: i32) -> (i32, i32) {
    %c0_i32 = arith.constant 0 : i32
    %c0_i32_0 = arith.constant 0 : i32
    %c0_i32_1 = arith.constant 0 : i32
    return %c0_i32, %c0_i32_0 : i32, i32
  }
  func.func @transform_7(%arg0: i32) -> (i32, i32) {
    %c0_i32 = arith.constant 0 : i32
    %c0_i32_0 = arith.constant 0 : i32
    return %arg0, %c0_i32 : i32, i32
  }
  func.func @transform_8(%arg0: i32) -> (i32, i32, i32) {
    %c0_i32 = arith.constant 0 : i32
    %c0_i32_0 = arith.constant 0 : i32
    %c0_i32_1 = arith.constant 0 : i32
    return %c0_i32, %arg0, %c0_i32_0 : i32, i32, i32
  }
}

</mosaic_0001>

<bundles_post_ra>
// kernel: crf_pallas.1
= control target key start
LH: loop header
LB: loop body
LE: loop exit
PB: predicated region body
PF: predicated region fallthrough
CT: control target
= control target key end

     0   :  { %14 = vsyncpa [#allocation4], 0  ;;  %s2622_s0 = inlined_call_operand.vmem [shape: f32[8,3,8,128], index: 0, kind: input, shape index: {}]   ;;  %s2623_s1 = inlined_call_operand.vmem [shape: s32[8,8,128], index: 1, kind: input, shape index: {}]   ;;  %s2624_s2 = inlined_call_operand.vmem [shape: s32[8,128], index: 2, kind: input, shape index: {}]   ;;  %s2625_s3 = inlined_call_operand.vmem [shape: f32[1,3], index: 3, kind: input, shape index: {}]   ;;  %s2626_s4 = inlined_call_operand.vmem [shape: f32[3,3], index: 4, kind: input, shape index: {}]   ;;  %s2627_s5 = inlined_call_operand.vmem [shape: f32[3,3], index: 5, kind: input, shape index: {}]   ;;  %s2628_s6 = inlined_call_operand.vmem [shape: f32[1,3], index: 6, kind: input, shape index: {}]   ;;  %s2629_s7 = inlined_call_operand.vmem [shape: f32[8,128], index: 7, kind: output, shape index: {0}]   ;;  %s2630_s8 = inlined_call_operand.vmem [shape: s32[8,8,128], index: 8, kind: output, shape index: {1}]  }
   0x1   :  { %15 = vsyncpa [#allocation6], 0  ;;  %s39_s29 = sshll.u32 %s2626_s4, 4  ;;  %s40_s29 = int_to_ptr.vmem [resolvable:$true] %s39_s29 }
   0x2   :  { %16 = vsyncpa [#allocation9], 0  ;;  %s29_s10 = sshll.u32 %s2625_s3, 4  ;;  %s1257_s11 = scalar_lea.vmem %s40_s29, 64  ;;  %s30_s10 = int_to_ptr.vmem [resolvable:$true] %s29_s10 }
   0x3   :  { %p1258_p0 = scmp.ne.s32.totalorder %s40_s29, %s1257_s11  ;;  %p1262_p1 = scmp.lt.s32.totalorder %s40_s29, %s40_s29 }
   0x4   :  { %p1263_p2 = scmp.lt.s32.totalorder %s1257_s11, %s1257_s11 }
   0x6   :  { %p1264_p3 = por %p1263_p2, %p1262_p1 }
   0x8   :  { %p1265_p4 = pnand %p1264_p3, %p1258_p0 }
   0xa   :  { %1268 = shalt.err (!%p1265_p4)
}
   0xb   :  { %s1311_s12 = smov [#allocation5]   ;;  %s1269_s13 = scalar_lea.vmem %s30_s10, 16 }
   0xc   :  { %42 = dma.vmem_to_smem %s40_s29, 64, %s1311_s12, [#allocation6]  }
   0xd   :  { %p1270_p5 = scmp.ne.s32.totalorder %s30_s10, %s1269_s13  ;;  %p1274_p6 = scmp.lt.s32.totalorder %s30_s10, %s30_s10 }
   0xe   :  { %p1275_p7 = scmp.lt.s32.totalorder %s1269_s13, %s1269_s13 }
  0x10   :  { %p1276_p8 = por %p1275_p7, %p1274_p6 }
  0x12   :  { %p1277_p9 = pnand %p1276_p8, %p1270_p5 }
  0x14   :  { %1280 = shalt.err (!%p1277_p9)
}
  0x15   :  { %s1312_s4 = smov [#allocation3]   ;;  %s49_s15 = sshll.u32 %s2627_s5, 4  ;;  %s50_s15 = int_to_ptr.vmem [resolvable:$true] %s49_s15 }
  0x16   :  { %32 = dma.vmem_to_smem %s30_s10, 16, %s1312_s4, [#allocation4]  }
  0x17   :  { %s59_s18 = sshll.u32 %s2628_s6, 4  ;;  %s1281_s19 = scalar_lea.vmem %s50_s15, 64  ;;  %s60_s18 = int_to_ptr.vmem [resolvable:$true] %s59_s18 }
  0x18   :  { %p1282_p10 = scmp.ne.s32.totalorder %s50_s15, %s1281_s19  ;;  %p1286_p11 = scmp.lt.s32.totalorder %s50_s15, %s50_s15 }
  0x19   :  { %p1287_p12 = scmp.lt.s32.totalorder %s1281_s19, %s1281_s19 }
  0x1b   :  { %p1288_p13 = por %p1287_p12, %p1286_p11 }
  0x1d   :  { %p1289_p0 = pnand %p1288_p13, %p1282_p10 }
  0x1f   :  { %1292 = shalt.err (!%p1289_p0)
}
  0x20   :  { %s1313_s20 = smov [#allocation7]   ;;  %s1293_s21 = scalar_lea.vmem %s60_s18, 16 }
  0x21   :  { %52 = dma.vmem_to_smem %s50_s15, 64, %s1313_s20, [#allocation6]  }
  0x22   :  { %p1294_p1 = scmp.ne.s32.totalorder %s60_s18, %s1293_s21  ;;  %p1298_p2 = scmp.lt.s32.totalorder %s60_s18, %s60_s18 }
  0x23   :  { %p1299_p3 = scmp.lt.s32.totalorder %s1293_s21, %s1293_s21 }
  0x25   :  { %p1300_p4 = por %p1299_p3, %p1298_p2 }
  0x27   :  { %p1301_p5 = pnand %p1300_p4, %p1294_p1 }
  0x29   :  { %1304 = shalt.err (!%p1301_p5)
}
  0x2a   :  { %s1314_s5 = smov [#allocation8]  }
  0x2b   :  { %62 = dma.vmem_to_smem %s60_s18, 16, %s1314_s5, [#allocation9]  }
  0x2c   :  { %1305 = dma.done.wait [#allocation4], 16  }
  0x2d   :  { %1306 = vsyncadd [#allocation4], 4294967280 }
  0x2e   :  { %1307 = dma.done.wait [#allocation6], 128  }
  0x2f   :  { %1308 = vsyncadd [#allocation6], 4294967168 }
  0x30   :  { %1309 = dma.done.wait [#allocation9], 16  }
  0x31   :  { %1310 = vsyncadd [#allocation9], 4294967280 }
  0x32   :  { %75 = sfence }
  0x33   :  { %s1373_s6 = sld [smem:[#allocation3]]  ;;  %v1380_v0 = vld [vmem:[%s2623_s1] sm:$0xff]  ;;  %v1122_v1 = vld [vmem:[%s2622_s0 + $0x8] sm:$0xff]  ;;  %v1123_v2 = vld [vmem:[%s2622_s0 + $0x10] sm:$0xff] }
  0x34   :  { %s1375_s22 = sld [smem:[#allocation3 + $0x1]]  ;;  %vm115_vm0 = vcmp.eq.s32.totalorder %v1380_v0, 0  ;;  %vm116_vm1 = vcmp.eq.s32.totalorder %v1380_v0, 1  ;;  %v101_v3 = vld [vmem:[%s2622_s0] sm:$0xff]  ;;  %v1400_v5 = vld [vmem:[%s2623_s1 + $0x8] sm:$0xff]  ;;  %v1418_v9 = vld [vmem:[%s2622_s0 + $0x18] sm:$0xff] }
  0x35   :  { %s1382_s25 = sld [smem:[#allocation3 + $0x2]]  ;;  %v119_v4 = vsel %vm116_vm1, %v1122_v1, %v1123_v2  ;;  %v1407_v7 = vld [vmem:[%s2622_s0 + $0x20] sm:$0xff]  ;;  %v1412_v8 = vld [vmem:[%s2622_s0 + $0x28] sm:$0xff]  ;;  %vm135_vm2 = vcmp.eq.s32.totalorder %v1400_v5, 1  ;;  %vm134_vm3 = vcmp.eq.s32.totalorder %v1400_v5, 0  ;;  %v1428_v11 = vld [vmem:[%s2623_s1 + $0x10] sm:$0xff] }
  0x36   :  { %v120_v6 = vsel %vm115_vm0, %v101_v3, %v119_v4  ;;  %v136_v10 = vsel %vm135_vm2, %v1407_v7, %v1412_v8  ;;  %s1430_s18 = sld [smem:[#allocation5]]  ;;  %v1441_v14 = vld [vmem:[%s2623_s1 + $0x18] sm:$0xff]  ;;  %v1448_v15 = vld [vmem:[%s2624_s2] sm:$0xff]  ;;  %vm264_vm4 = vcmp.eq.s32.totalorder %v1428_v11, 1  ;;  %v1482_v25 = vld [vmem:[%s2622_s0 + $0x50] sm:$0xff]  ;;  %vm263_vm8 = vcmp.eq.s32.totalorder %v1428_v11, 0 }
  0x37   :  { %v1436_v13 = vsel %vm134_vm3, %v1418_v9, %v136_v10  ;;  %s1443_s21 = sld [smem:[#allocation5 + $0x1]]  ;;  %v1461_v20 = vld [vmem:[%s2622_s0 + $0x38] sm:$0xff]  ;;  %v1466_v21 = vld [vmem:[%s2622_s0 + $0x40] sm:$0xff]  ;;  %vm377_vm5 = vcmp.eq.s32.totalorder %v1441_v14, 1  ;;  %vm131_vm6 = vcmp.gt.s32.totalorder %v1448_v15, 1  ;;  %v1514_v32 = vld [vmem:[%s2622_s0 + $0x30] sm:$0xff] }
  0x38   :  { %s1469_s29 = sld [smem:[#allocation5 + $0x80]]  ;;  %v267_v24 = vsel %vm264_vm4, %v1461_v20, %v1466_v21  ;;  %v1487_v26 = vld [vmem:[%s2622_s0 + $0x58] sm:$0xff]  ;;  %v1509_v31 = vsel %vm131_vm6, %v1400_v5, %v1380_v0  ;;  %vm260_vm7 = vcmp.gt.s32.totalorder %v1448_v15, 2  ;;  %v1534_v36 = vld [vmem:[%s2622_s0 + $0x48] sm:$0xff]  ;;  %vm376_vm9 = vcmp.eq.s32.totalorder %v1441_v14, 0 }
  0x39   :  { %v108_v12 = vstv %s1373_s6  ;;  %s1453_s6 = sld [smem:[#allocation5 + $0x2]]  ;;  %v380_v29 = vsel %vm377_vm5, %v1482_v25, %v1487_v26  ;;  %v1529_v35 = vsel %vm263_vm8, %v1514_v32, %v267_v24  ;;  %v1548_v39 = vsel %vm260_vm7, %v1428_v11, %v1509_v31 }
  0x3a   :  { %v1450_v16 = vadd.f32 %v108_v12, %v101_v3  ;;  %v110_v17 = vstv %s1375_s22  ;;  %s1490_s10 = sld [smem:[#allocation5 + $0x81]]  ;;  %v1553_v40 = vsel %vm376_vm9, %v1534_v36, %v380_v29  ;;  %v2631_v4 = vmov 0  }
  0x3b   :  { %v1455_v18 = vadd.f32 %v1122_v1, %v110_v17  ;;  %v112_v19 = vstv %s1382_s25  ;;  %s1501_s11 = sld [smem:[#allocation5 + $0x82]]  ;;  %vm266_vm15 = vcmp.eq.s32.totalorder %v1509_v31, 1 }
  0x3c   :  { %v1471_v22 = vadd.f32 %v1123_v2, %v112_v19  ;;  %v117_v23 = vsel %vm116_vm1, %v110_v17, %v112_v19  ;;  %s1518_s4 = sld [smem:[#allocation5 + $0x100]]  ;;  %v1521_v33 = vstv %s1430_s18 }
  0x3d   :  { %v118_v27 = vsel %vm115_vm0, %v108_v12, %v117_v23  ;;  %v159_v28 = vmax.f32 %v1450_v16, %v1455_v18  ;;  %s1537_s15 = sld [smem:[#allocation5 + $0x101]]  ;;  %v1540_v37 = vstv %s1443_s21  ;;  %v209_v38 = vadd.f32 %v1521_v33, %v1450_v16 }
  0x3e   :  { %v1503_v30 = vadd.f32 %v120_v6, %v118_v27  ;;  %s1555_s16 = sld [smem:[#allocation5 + $0x102]]  ;;  %v1573_v46 = vstv %s1469_s29  ;;  %v221_v47 = vadd.f32 %v1540_v37, %v1450_v16 }
  0x3f   :  { %v1524_v34 = vmax.f32 %v159_v28, %v1471_v22  ;;  %v1558_v41 = vstv %s1453_s6  ;;  %s1566_s17 = sld [smem:[#allocation7]]  ;;  %v210_v55 = vadd.f32 %v1573_v46, %v1455_v18 }
  0x40   :  { %v140_v45 = vsel %vm135_vm2, %v1540_v37, %v1558_v41  ;;  %v235_v48 = vadd.f32 %v1558_v41, %v1450_v16  ;;  %s1579_s18 = sld [smem:[#allocation7 + $0x1]]  ;;  %v1585_v50 = vstv %s1490_s10 }
  0x41   :  { %v161_v42 = vsub.f32 %v1450_v16, %v1524_v34  ;;  %v164_v43 = vsub.f32 %v1455_v18, %v1524_v34  ;;  %v167_v44 = vsub.f32 %v1471_v22, %v1524_v34  ;;  %v142_v49 = vsel %vm134_vm3, %v1521_v33, %v140_v45  ;;  %s1587_s19 = sld [smem:[#allocation7 + $0x2]] }
  0x42   :  { %v1590_v53 = vstv %s1501_s11  ;;  %v222_v56 = vadd.f32 %v1585_v50, %v1455_v18  ;;  %s1596_s20 = sld [smem:[#allocation7 + $0x80]]  ;;  %v1603_v58 = vstv %s1518_s4  ;;  %vm212_vm10 = vcmp.gt.f32.partialorder %v210_v55, %v209_v38 }
  0x43   :  { %v162_v51 = vmul.f32 1.442695, %v161_v42  ;;  %v165_v52 = vmul.f32 1.442695, %v164_v43  ;;  %v168_v54 = vmul.f32 1.442695, %v167_v44  ;;  %v145_v57 = vsel %vm135_vm2, %v1585_v50, %v1590_v53 }
  0x44   :  { %v236_v59 = vadd.f32 %v1590_v53, %v1455_v18  ;;  %s1607_s21 = sld [smem:[#allocation7 + $0x81]]  ;;  %v147_v60 = vsel %vm134_vm3, %v1573_v46, %v145_v57  ;;  %v1613_v61 = vstv %s1537_s15  ;;  %v211_v62 = vadd.f32 %v1603_v58, %v1471_v22 }
  0x45   :  { %1164 = vpow2.f32 %v162_v51  ;;  %s1118_s5 = sld [smem:[#allocation7 + $0x82]]  ;;  %v1618_v63 = vstv %s1555_s16  ;;  %v214_v1 = vmax.f32 %v209_v38, %v210_v55  ;;  %v1625_v3 = vstv %s1566_s17 }
  0x46   :  { %1166 = vpow2.f32 %v165_v52  ;;  %s1119_s23 = sld [smem:[#allocation7 + $0x100]]  ;;  %v150_v2 = vsel %vm135_vm2, %v1613_v61, %v1618_v63  ;;  %v213_v6 = vsel %vm212_vm10, 1, %v2631_v4  ;;  %v223_v10 = vadd.f32 %v1613_v61, %v1471_v22 }
  0x47   :  { %1168 = vpow2.f32 %v168_v54  ;;  %s1120_s6 = sld [smem:[#allocation7 + $0x101]]  ;;  %v152_v12 = vsel %vm134_vm3, %v1603_v58, %v150_v2  ;;  %v1634_v17 = vstv %s1579_s18  ;;  %vm215_vm11 = vcmp.gt.f32.partialorder %v211_v62, %v214_v1 }
  0x48   :  { %v217_v19 = vmax.f32 %v214_v1, %v211_v62  ;;  %s1121_s24 = sld [smem:[#allocation7 + $0x102]]  ;;  %v153_v23 = vsel %vm116_vm1, %v147_v60, %v152_v12  ;;  %v1639_v24 = vstv %s1587_s19  ;;  %v216_v27 = vsel %vm215_vm11, 2, %v213_v6 }
  0x49   :  { %vm224_vm12 = vcmp.gt.f32.partialorder %v222_v56, %v221_v47  ;;  %v154_v28 = vsel %vm115_vm0, %v142_v49, %v153_v23  ;;  %v1644_v29 = vstv %s1596_s20  ;;  %v218_v5 = vsel %vm131_vm6, %v216_v27, 0  ;;  %s2450_s30 = sld [smem:[#allocation8 + $0x2]] }
  0x4a   :  { %v219_v38 = vadd.f32 %v1418_v9, %v217_v19  ;;  %v155_v42 = vadd.f32 %v154_v28, %v1503_v30  ;;  %v1651_v43 = vstv %s1607_s21  ;;  %v225_v44 = vsel %vm224_vm12, 1, %v2631_v4  ;;  %s2454_s9 = sld [smem:[#allocation8]] }
  0x4b   :  { %v226_v45 = vmax.f32 %v221_v47, %v222_v56  ;;  %v1654_v51 = vstv %s1118_s5  ;;  %v237_v49 = vadd.f32 %v1618_v63, %v1471_v22  ;;  %vm238_vm13 = vcmp.gt.f32.partialorder %v236_v59, %v235_v48 }
  0x4c   :  { %v1659_v0 = vsel %vm131_vm6, %v219_v38, %v1450_v16  ;;  %v156_v52 = vadd.f32 %v155_v42, %v1436_v13  ;;  %v1664_v54 = vstv %s1119_s23  ;;  %v239_v56 = vsel %vm238_vm13, 1, %v2631_v4 }
  0x4d   :  { %vm227_vm14 = vcmp.gt.f32.partialorder %v223_v10, %v226_v45  ;;  %v229_v55 = vmax.f32 %v226_v45, %v223_v10  ;;  %v1666_v57 = vstv %s1120_s6  ;;  %v240_v60 = vmax.f32 %v235_v48, %v236_v59 }
  0x4e   :  { %v228_v47 = vsel %vm227_vm14, 2, %v225_v44  ;;  %v1673_v62 = vsel %vm131_vm6, %v156_v52, %v1503_v30  ;;  %v1675_v1 = vstv %s1121_s24  ;;  %vm265_vm0 = vcmp.eq.s32.totalorder %v1509_v31, 0 }
  0x4f   :  { %v230_v13 = vsel %vm131_vm6, %v228_v47, 1  ;;  %v233_v2 = vadd.f32 %v1407_v7, %v229_v55  ;;  %vm241_vm1 = vcmp.gt.f32.partialorder %v237_v49, %v240_v60  ;;  %v243_v10 = vmax.f32 %v240_v60, %v237_v49 }
  0x50   :  { %v231_v6 = vshll.u32 %v230_v13, 2  ;;  %v269_v48 = vsel %vm264_vm4, %v1540_v37, %v1558_v41  ;;  %v242_v12 = vsel %vm241_vm1, 2, %v239_v56  ;;  %v271_v23 = vsel %vm264_vm4, %v1585_v50, %v1590_v53 }
  0x51   :  { %v1688_v30 = vsel %vm131_vm6, %v233_v2, %v1455_v18  ;;  %v270_v19 = vsel %vm263_vm8, %v1521_v33, %v269_v48  ;;  %v244_v47 = vsel %vm131_vm6, %v242_v12, 2  ;;  %v273_v12 = vsel %vm264_vm4, %v1613_v61, %v1618_v63 }
  0x52   :  { %v1165_v59 = vpop.eup %1164  ;;  %v232_v44 = vor.u32 %v231_v6, %v218_v5  ;;  %v245_v2 = vshll.u32 %v244_v47, 4  ;;  %v247_v6 = vadd.f32 %v1412_v8, %v243_v10  ;;  %vm379_vm2 = vcmp.eq.s32.totalorder %v1548_v39, 1 }
  0x53   :  { %v1167_v27 = vpop.eup %1166  ;;  %v171_v28 = vmul.f32 %v1165_v59, %v1625_v3  ;;  %v184_v38 = vmul.f32 %v1165_v59, %v1634_v17  ;;  %v197_v42 = vmul.f32 %v1165_v59, %v1639_v24  ;;  %vm378_vm4 = vcmp.eq.s32.totalorder %v1548_v39, 0 }
  0x54   :  { %v1169_v45 = vpop.eup %1168  ;;  %v173_v49 = vmul.f32 %v1167_v27, %v1644_v29  ;;  %v186_v52 = vmul.f32 %v1167_v27, %v1651_v43  ;;  %v199_v55 = vmul.f32 %v1167_v27, %v1654_v51  ;;  %v1709_v4 = vor.u32 %v245_v2, %v232_v44 }
  0x55   :  { %v176_v56 = vmul.f32 %v1169_v45, %v1664_v54  ;;  %v189_v60 = vmul.f32 %v1169_v45, %v1666_v57  ;;  %v202_v13 = vmul.f32 %v1169_v45, %v1675_v1  ;;  %v272_v27 = vsel %vm263_vm8, %v1573_v46, %v271_v23 }
  0x56   :  { %v174_v48 = vadd.f32 %v173_v49, %v171_v28  ;;  %v187_v59 = vadd.f32 %v186_v52, %v184_v38  ;;  %v200_v5 = vadd.f32 %v199_v55, %v197_v42  ;;  %v322_v45 = vadd.f32 %v1659_v0, %v1521_v33 }
  0x57   :  { %v1723_v10 = vsel %vm131_vm6, %v247_v6, %v1471_v22  ;;  %v274_v23 = vsel %vm263_vm8, %v1603_v58, %v273_v12  ;;  %v323_v42 = vadd.f32 %v1688_v30, %v1573_v46  ;;  %v334_v49 = vadd.f32 %v1659_v0, %v1540_v37 }
  0x58   :  { %v177_v47 = vadd.f32 %v176_v56, %v174_v48  ;;  %v190_v28 = vadd.f32 %v189_v60, %v187_v59  ;;  %v203_v38 = vadd.f32 %v202_v13, %v200_v5  ;;  %v324_v44 = vadd.f32 %v1723_v10, %v1603_v58 }
  0x59   :  { %v275_v52 = vsel %vm266_vm15, %v272_v27, %v274_v23  ;;  %v335_v55 = vadd.f32 %v1688_v30, %v1585_v50  ;;  %v336_v11 = vadd.f32 %v1723_v10, %v1613_v61  ;;  %vm325_vm3 = vcmp.gt.f32.partialorder %v323_v42, %v322_v45 }
  0x5a   :  { %1170 = vlog2.f32 %v177_v47  ;;  %v276_v56 = vsel %vm265_vm0, %v270_v19, %v275_v52  ;;  %v327_v60 = vmax.f32 %v322_v45, %v323_v42  ;;  %v2633_v2 = vmov 0  }
  0x5b   :  { %1172 = vlog2.f32 %v190_v28  ;;  %v277_v13 = vadd.f32 %v276_v56, %v1673_v62  ;;  %v326_v48 = vsel %vm325_vm3, 1, %v2633_v2  ;;  %vm337_vm8 = vcmp.gt.f32.partialorder %v335_v55, %v334_v49 }
  0x5c   :  { %1174 = vlog2.f32 %v203_v38  ;;  %vm328_vm10 = vcmp.gt.f32.partialorder %v324_v44, %v327_v60  ;;  %v330_v59 = vmax.f32 %v327_v60, %v324_v44  ;;  %v338_v5 = vsel %vm337_vm8, 1, %v2633_v2 }
  0x5d   :  { %v339_v6 = vmax.f32 %v334_v49, %v335_v55  ;;  %v278_v27 = vadd.f32 %v277_v13, %v1529_v35  ;;  %v329_v12 = vsel %vm328_vm10, 2, %v326_v48  ;;  %v348_v31 = vadd.f32 %v1659_v0, %v1558_v41 }
  0x5e   :  { %v349_v19 = vadd.f32 %v1688_v30, %v1590_v53  ;;  %v331_v45 = vsel %vm260_vm7, %v329_v12, 0  ;;  %v332_v47 = vadd.f32 %v1514_v32, %v330_v59  ;;  %v350_v35 = vadd.f32 %v1723_v10, %v1618_v63 }
  0x5f   :  { %vm340_vm11 = vcmp.gt.f32.partialorder %v336_v11, %v339_v6  ;;  %v342_v28 = vmax.f32 %v339_v6, %v336_v11  ;;  %v279_v38 = vsel %vm260_vm7, %v278_v27, %v1673_v62  ;;  %vm373_vm13 = vcmp.gt.s32.totalorder %v1448_v15, 3 }
  0x60   :  { %v341_v23 = vsel %vm340_vm11, 2, %v338_v5  ;;  %vm351_vm12 = vcmp.gt.f32.partialorder %v349_v19, %v348_v31  ;;  %v333_v42 = vsel %vm260_vm7, %v332_v47, %v1659_v0  ;;  %v353_v11 = vmax.f32 %v348_v31, %v349_v19 }
  0x61   :  { %v343_v44 = vsel %vm260_vm7, %v341_v23, 1  ;;  %v346_v49 = vadd.f32 %v1461_v20, %v342_v28  ;;  %v352_v52 = vsel %vm351_vm12, 1, %v2633_v2  ;;  %v382_v62 = vsel %vm377_vm5, %v1540_v37, %v1558_v41 }
  0x62   :  { %v344_v55 = vshll.u32 %v343_v44, 2  ;;  %v384_v0 = vsel %vm377_vm5, %v1585_v50, %v1590_v53  ;;  %v383_v60 = vsel %vm376_vm9, %v1521_v33, %v382_v62  ;;  %v386_v48 = vsel %vm377_vm5, %v1613_v61, %v1618_v63 }
  0x63   :  { %v1779_v56 = vsel %vm260_vm7, %v346_v49, %v1688_v30  ;;  %v385_v13 = vsel %vm376_vm9, %v1573_v46, %v384_v0  ;;  %vm354_vm14 = vcmp.gt.f32.partialorder %v350_v35, %v353_v11  ;;  %v356_v5 = vmax.f32 %v353_v11, %v350_v35 }
  0x64   :  { %v345_v59 = vor.u32 %v344_v55, %v331_v45  ;;  %v387_v30 = vsel %vm376_vm9, %v1603_v58, %v386_v48  ;;  %v355_v6 = vsel %vm354_vm14, 2, %v352_v52  ;;  %v435_v12 = vadd.f32 %v333_v42, %v1521_v33 }
  0x65   :  { %v388_v27 = vsel %vm379_vm2, %v385_v13, %v387_v30  ;;  %v436_v31 = vadd.f32 %v1779_v56, %v1573_v46  ;;  %v357_v19 = vsel %vm260_vm7, %v355_v6, 2  ;;  %v360_v45 = vadd.f32 %v1466_v21, %v356_v5 }
  0x66   :  { %v389_v47 = vsel %vm378_vm4, %v383_v60, %v388_v27  ;;  %v447_v28 = vadd.f32 %v333_v42, %v1540_v37  ;;  %v358_v35 = vshll.u32 %v357_v19, 4  ;;  %v448_v0 = vadd.f32 %v1779_v56, %v1585_v50 }
  0x67   :  { %v1171_v23 = vpop.eup %1170  ;;  %v390_v44 = vadd.f32 %v389_v47, %v279_v38  ;;  %vm438_vm5 = vcmp.gt.f32.partialorder %v436_v31, %v435_v12  ;;  %v440_v49 = vmax.f32 %v435_v12, %v436_v31  ;;  %v1808_v11 = vsel %vm260_vm7, %v360_v45, %v1723_v10 }
  0x68   :  { %v1173_v52 = vpop.eup %1172  ;;  %v179_v55 = vmul.f32 0.6931472, %v1171_v23  ;;  %v439_v62 = vsel %vm438_vm5, 1, %v2633_v2  ;;  %v1813_v48 = vor.u32 %v358_v35, %v345_v59  ;;  %v437_v30 = vadd.f32 %v1808_v11, %v1603_v58 }
  0x69   :  { %v1175_v60 = vpop.eup %1174  ;;  %v192_v13 = vmul.f32 0.6931472, %v1173_v52  ;;  %v391_v5 = vadd.f32 %v390_v44, %v1553_v40  ;;  %v449_v10 = vadd.f32 %v1808_v11, %v1613_v61  ;;  %vm450_vm9 = vcmp.gt.f32.partialorder %v448_v0, %v447_v28 }
  0x6a   :  { %v180_v6 = vadd.f32 %v179_v55, %v1524_v34  ;;  %v205_v27 = vmul.f32 0.6931472, %v1175_v60  ;;  %vm441_vm15 = vcmp.gt.f32.partialorder %v437_v30, %v440_v49  ;;  %v443_v59 = vmax.f32 %v440_v49, %v437_v30 }
  0x6b   :  { %v193_v12 = vadd.f32 %v192_v13, %v1524_v34  ;;  %v1824_v31 = vsel %vm373_vm13, %v391_v5, %v279_v38  ;;  %v442_v45 = vsel %vm441_vm15, 2, %v439_v62  ;;  %v451_v47 = vsel %vm450_vm9, 1, %v2633_v2 }
  0x6c   :  { %v181_v40 = vadd.f32 %v1418_v9, %v180_v6  ;;  %v206_v19 = vadd.f32 %v205_v27, %v1524_v34  ;;  %v444_v35 = vsel %vm373_vm13, %v442_v45, 0  ;;  %v445_v44 = vadd.f32 %v1534_v36, %v443_v59  ;;  %v1899_v45 = vld [vmem:[%s2622_s0 + $0x70] sm:$0xff] }
  0x6d   :  { %v194_v23 = vadd.f32 %v1407_v7, %v193_v12  ;;  %v452_v52 = vmax.f32 %v447_v28, %v448_v0  ;;  %v461_v34 = vadd.f32 %v333_v42, %v1558_v41  ;;  %v462_v49 = vadd.f32 %v1779_v56, %v1590_v53 }
  0x6e   :  { %v1836_v38 = vsel %vm131_vm6, %v181_v40, %v1450_v16  ;;  %v207_v9 = vadd.f32 %v1412_v8, %v206_v19  ;;  %v1849_v28 = vsel %vm373_vm13, %v445_v44, %v333_v42  ;;  %v463_v0 = vadd.f32 %v1808_v11, %v1618_v63 }
  0x6f   :  { %v1845_v7 = vsel %vm131_vm6, %v194_v23, %v1455_v18  ;;  %vm453_vm0 = vcmp.gt.f32.partialorder %v449_v10, %v452_v52  ;;  %v455_v55 = vmax.f32 %v452_v52, %v449_v10  ;;  %v1863_v18 = vld [vmem:[%s2623_s1 + $0x20] sm:$0xff]  ;;  %vm464_vm1 = vcmp.gt.f32.partialorder %v462_v49, %v461_v34 }
  0x70   :  { %v1854_v8 = vsel %vm131_vm6, %v207_v9, %v1471_v22  ;;  %v281_v16 = vmax.f32 %v1836_v38, %v1845_v7  ;;  %v454_v62 = vsel %vm453_vm0, 2, %v451_v47  ;;  %v466_v22 = vmax.f32 %v461_v34, %v462_v49 }
  0x71   :  { %v456_v42 = vsel %vm373_vm13, %v454_v62, 1  ;;  %v459_v60 = vadd.f32 %v1482_v25, %v455_v55  ;;  %v1875_v5 = vsel %vm373_vm13, %v1441_v14, %v1548_v39  ;;  %v465_v6 = vsel %vm464_vm1, 1, %v2633_v2 }
  0x72   :  { %v1869_v13 = vmax.f32 %v281_v16, %v1854_v8  ;;  %v457_v30 = vshll.u32 %v456_v42, 2  ;;  %vm467_vm6 = vcmp.gt.f32.partialorder %v463_v0, %v466_v22  ;;  %v469_v10 = vmax.f32 %v466_v22, %v463_v0 }
  0x73   :  { %v1881_v27 = vsel %vm373_vm13, %v459_v60, %v1779_v56  ;;  %vm490_vm2 = vcmp.eq.s32.totalorder %v1863_v18, 0  ;;  %v468_v40 = vsel %vm467_vm6, 2, %v465_v6  ;;  %v1894_v56 = vld [vmem:[%s2622_s0 + $0x68] sm:$0xff]  ;;  %vm491_vm3 = vcmp.eq.s32.totalorder %v1863_v18, 1  ;;  %v1941_v60 = vld [vmem:[%s2622_s0 + $0x60] sm:$0xff] }
  0x74   :  { %v283_v12 = vsub.f32 %v1836_v38, %v1869_v13  ;;  %v286_v59 = vsub.f32 %v1845_v7, %v1869_v13  ;;  %v289_v14 = vsub.f32 %v1854_v8, %v1869_v13  ;;  %v458_v39 = vor.u32 %v457_v30, %v444_v35 }
  0x75   :  { %v473_v19 = vadd.f32 %v1487_v26, %v469_v10  ;;  %vm492_vm4 = vcmp.eq.s32.totalorder %v1875_v5, 0  ;;  %v470_v44 = vsel %vm373_vm13, %v468_v40, 2  ;;  %vm493_vm8 = vcmp.eq.s32.totalorder %v1875_v5, 1 }
  0x76   :  { %v284_v47 = vmul.f32 1.442695, %v283_v12  ;;  %v287_v23 = vmul.f32 1.442695, %v286_v59  ;;  %v290_v35 = vmul.f32 1.442695, %v289_v14  ;;  %v494_v9 = vsel %vm491_vm3, %v1894_v56, %v1899_v45 }
  0x77   :  { %v1908_v52 = vsel %vm373_vm13, %v473_v19, %v1808_v11  ;;  %v471_v34 = vshll.u32 %v470_v44, 4  ;;  %v496_v49 = vsel %vm491_vm3, %v1540_v37, %v1558_v41  ;;  %v498_v11 = vsel %vm491_vm3, %v1585_v50, %v1590_v53 }
  0x78   :  { %1176 = vpow2.f32 %v284_v47  ;;  %v497_v55 = vsel %vm490_vm2, %v1521_v33, %v496_v49  ;;  %v499_v16 = vsel %vm490_vm2, %v1573_v46, %v498_v11  ;;  %v500_v62 = vsel %vm491_vm3, %v1613_v61, %v1618_v63 }
  0x79   :  { %1178 = vpow2.f32 %v287_v23  ;;  %v1933_v0 = vor.u32 %v471_v34, %v458_v39  ;;  %v501_v42 = vsel %vm490_vm2, %v1603_v58, %v500_v62  ;;  %v495_v30 = vsel %vm490_vm2, %v1941_v60, %v494_v9 }
  0x7a   :  { %1180 = vpow2.f32 %v290_v35  ;;  %v502_v22 = vsel %vm493_vm8, %v499_v16, %v501_v42  ;;  %vm486_vm10 = vcmp.gt.s32.totalorder %v1448_v15, 4  ;;  %v549_v62 = vadd.f32 %v1849_v28, %v1521_v33 }
  0x7b   :  { %v503_v6 = vsel %vm492_vm4, %v497_v55, %v502_v22  ;;  %v550_v42 = vadd.f32 %v1881_v27, %v1573_v46  ;;  %v551_v22 = vadd.f32 %v1908_v52, %v1603_v58  ;;  %vm600_vm3 = vcmp.gt.s32.totalorder %v1448_v15, 5 }
  0x7c   :  { %v504_v10 = vadd.f32 %v503_v6, %v1824_v31  ;;  %v562_v6 = vadd.f32 %v1881_v27, %v1585_v50 }
  0x7d   :  { %vm552_vm11 = vcmp.gt.f32.partialorder %v550_v42, %v549_v62 }
  0x7e   :  { %v505_v12 = vadd.f32 %v504_v10, %v495_v30  ;;  %v561_v30 = vadd.f32 %v1849_v28, %v1540_v37 }
  0x80   :  { %v1953_v59 = vsel %vm486_vm10, %v505_v12, %v1824_v31  ;;  %vm564_vm12 = vcmp.gt.f32.partialorder %v562_v6, %v561_v30 }
  0x85   :  { %v1177_v14 = vpop.eup %1176 }
  0x86   :  { %v1179_v39 = vpop.eup %1178  ;;  %v292_v40 = vmul.f32 %v1177_v14, %v1625_v3  ;;  %v302_v19 = vmul.f32 %v1177_v14, %v1634_v17  ;;  %v312_v47 = vmul.f32 %v1177_v14, %v1639_v24 }
  0x87   :  { %v1181_v23 = vpop.eup %1180  ;;  %v293_v35 = vmul.f32 %v1179_v39, %v1644_v29  ;;  %v303_v44 = vmul.f32 %v1179_v39, %v1651_v43  ;;  %v313_v9 = vmul.f32 %v1179_v39, %v1654_v51  ;;  %v563_v39 = vadd.f32 %v1908_v52, %v1613_v61 }
  0x88   :  { %v295_v34 = vmul.f32 %v1181_v23, %v1664_v54  ;;  %v305_v31 = vmul.f32 %v1181_v23, %v1666_v57  ;;  %v315_v49 = vmul.f32 %v1181_v23, %v1675_v1  ;;  %v565_v23 = vsel %vm564_vm12, 1, %v2633_v2 }
  0x89   :  { %v294_v11 = vadd.f32 %v293_v35, %v292_v40  ;;  %v304_v55 = vadd.f32 %v303_v44, %v302_v19  ;;  %v314_v16 = vadd.f32 %v313_v9, %v312_v47  ;;  %v554_v40 = vmax.f32 %v549_v62, %v550_v42  ;;  %v1990_v62 = vld [vmem:[%s2623_s1 + $0x28] sm:$0xff] }
  0x8a   :  { %v566_v19 = vmax.f32 %v561_v30, %v562_v6  ;;  %v553_v47 = vsel %vm552_vm11, 1, %v2633_v2  ;;  %v575_v35 = vadd.f32 %v1849_v28, %v1558_v41  ;;  %v577_v30 = vadd.f32 %v1908_v52, %v1618_v63 }
  0x8b   :  { %v296_v10 = vadd.f32 %v295_v34, %v294_v11  ;;  %v306_v12 = vadd.f32 %v305_v31, %v304_v55  ;;  %v316_v14 = vadd.f32 %v315_v49, %v314_v16  ;;  %vm555_vm14 = vcmp.gt.f32.partialorder %v551_v22, %v554_v40 }
  0x8c   :  { %v557_v44 = vmax.f32 %v554_v40, %v551_v22  ;;  %vm567_vm5 = vcmp.gt.f32.partialorder %v563_v39, %v566_v19  ;;  %v556_v9 = vsel %vm555_vm14, 2, %v553_v47  ;;  %v569_v31 = vmax.f32 %v566_v19, %v563_v39  ;;  %v2022_v19 = vld [vmem:[%s2622_s0 + $0x88] sm:$0xff] }
  0x8d   :  { %1182 = vlog2.f32 %v296_v10  ;;  %v568_v34 = vsel %vm567_vm5, 2, %v565_v23  ;;  %v558_v49 = vsel %vm486_vm10, %v556_v9, 0  ;;  %v576_v16 = vadd.f32 %v1881_v27, %v1590_v53 }
  0x8e   :  { %1184 = vlog2.f32 %v306_v12  ;;  %v559_v11 = vadd.f32 %v1941_v60, %v557_v44  ;;  %v570_v55 = vsel %vm486_vm10, %v568_v34, 1  ;;  %v573_v22 = vadd.f32 %v1894_v56, %v569_v31 }
  0x8f   :  { %1186 = vlog2.f32 %v316_v14  ;;  %v571_v42 = vshll.u32 %v570_v55, 2  ;;  %v1999_v6 = vsel %vm486_vm10, %v1863_v18, %v1875_v5  ;;  %vm578_vm9 = vcmp.gt.f32.partialorder %v576_v16, %v575_v35 }
  0x90   :  { %v2004_v10 = vsel %vm486_vm10, %v559_v11, %v1849_v28  ;;  %v580_v12 = vmax.f32 %v575_v35, %v576_v16  ;;  %v2009_v39 = vsel %vm486_vm10, %v573_v22, %v1881_v27  ;;  %v579_v40 = vsel %vm578_vm9, 1, %v2633_v2  ;;  %v2017_v28 = vld [vmem:[%s2622_s0 + $0x80] sm:$0xff] }
  0x91   :  { %v572_v14 = vor.u32 %v571_v42, %v558_v49  ;;  %vm605_vm15 = vcmp.eq.s32.totalorder %v1990_v62, 1  ;;  %vm604_vm1 = vcmp.eq.s32.totalorder %v1990_v62, 0  ;;  %vm606_vm6 = vcmp.eq.s32.totalorder %v1999_v6, 0  ;;  %v2064_v42 = vld [vmem:[%s2622_s0 + $0x78] sm:$0xff] }
  0x92   :  { %vm581_vm0 = vcmp.gt.f32.partialorder %v577_v30, %v580_v12  ;;  %v583_v18 = vmax.f32 %v580_v12, %v577_v30  ;;  %v610_v27 = vsel %vm605_vm15, %v1540_v37, %v1558_v41  ;;  %v612_v47 = vsel %vm605_vm15, %v1585_v50, %v1590_v53 }
  0x93   :  { %v582_v5 = vsel %vm581_vm0, 2, %v579_v40  ;;  %vm607_vm2 = vcmp.eq.s32.totalorder %v1999_v6, 1  ;;  %v608_v44 = vsel %vm605_vm15, %v2017_v28, %v2022_v19  ;;  %v611_v34 = vsel %vm604_vm1, %v1521_v33, %v610_v27 }
  0x94   :  { %v584_v23 = vsel %vm486_vm10, %v582_v5, 2  ;;  %v587_v35 = vadd.f32 %v1899_v45, %v583_v18  ;;  %v613_v31 = vsel %vm604_vm1, %v1573_v46, %v612_v47  ;;  %v614_v49 = vsel %vm605_vm15, %v1613_v61, %v1618_v63 }
  0x95   :  { %v585_v9 = vshll.u32 %v584_v23, 4  ;;  %v615_v55 = vsel %vm604_vm1, %v1603_v58, %v614_v49  ;;  %v609_v12 = vsel %vm604_vm1, %v2064_v42, %v608_v44  ;;  %vm714_vm1 = vcmp.gt.s32.totalorder %v1448_v15, 6 }
  0x96   :  { %v2054_v11 = vsel %vm486_vm10, %v587_v35, %v1908_v52  ;;  %v616_v22 = vsel %vm607_vm2, %v613_v31, %v615_v55 }
  0x97   :  { %v2059_v16 = vor.u32 %v585_v9, %v572_v14  ;;  %v617_v52 = vsel %vm606_vm6, %v611_v34, %v616_v22 }
  0x98   :  { %v618_v5 = vadd.f32 %v617_v52, %v1953_v59 }
  0x9a   :  { %v1183_v30 = vpop.eup %1182  ;;  %v619_v35 = vadd.f32 %v618_v5, %v609_v12 }
  0x9b   :  { %v1185_v40 = vpop.eup %1184  ;;  %v298_v18 = vmul.f32 0.6931472, %v1183_v30 }
  0x9c   :  { %v1187_v14 = vpop.eup %1186  ;;  %v308_v27 = vmul.f32 0.6931472, %v1185_v40  ;;  %v2080_v34 = vsel %vm600_vm3, %v619_v35, %v1953_v59 }
  0x9d   :  { %v299_v47 = vadd.f32 %v298_v18, %v1869_v13  ;;  %v318_v23 = vmul.f32 0.6931472, %v1187_v14 }
  0x9e   :  { %v309_v9 = vadd.f32 %v308_v27, %v1869_v13 }
  0x9f   :  { %v300_v31 = vadd.f32 %v1514_v32, %v299_v47  ;;  %v319_v44 = vadd.f32 %v318_v23, %v1869_v13 }
  0xa0   :  { %v310_v49 = vadd.f32 %v1461_v20, %v309_v9 }
  0xa1   :  { %v2086_v55 = vsel %vm260_vm7, %v300_v31, %v1836_v38  ;;  %v320_v22 = vadd.f32 %v1466_v21, %v319_v44 }
  0xa2   :  { %v2092_v32 = vsel %vm260_vm7, %v310_v49, %v1845_v7 }
  0xa3   :  { %v2097_v13 = vsel %vm260_vm7, %v320_v22, %v1854_v8  ;;  %v394_v20 = vmax.f32 %v2086_v55, %v2092_v32 }
  0xa5   :  { %v2102_v59 = vmax.f32 %v394_v20, %v2097_v13 }
  0xa7   :  { %v396_v38 = vsub.f32 %v2086_v55, %v2102_v59  ;;  %v399_v21 = vsub.f32 %v2092_v32, %v2102_v59  ;;  %v402_v7 = vsub.f32 %v2097_v13, %v2102_v59 }
  0xa9   :  { %v397_v30 = vmul.f32 1.442695, %v396_v38  ;;  %v400_v12 = vmul.f32 1.442695, %v399_v21  ;;  %v403_v52 = vmul.f32 1.442695, %v402_v7  ;;  %v663_v38 = vadd.f32 %v2004_v10, %v1521_v33 }
  0xaa   :  { %v664_v21 = vadd.f32 %v2009_v39, %v1573_v46  ;;  %v665_v7 = vadd.f32 %v2054_v11, %v1603_v58 }
  0xab   :  { %1188 = vpow2.f32 %v397_v30  ;;  %v675_v30 = vadd.f32 %v2004_v10, %v1540_v37 }
  0xac   :  { %1190 = vpow2.f32 %v400_v12  ;;  %v676_v12 = vadd.f32 %v2009_v39, %v1585_v50  ;;  %vm666_vm7 = vcmp.gt.f32.partialorder %v664_v21, %v663_v38 }
  0xad   :  { %1192 = vpow2.f32 %v403_v52 }
  0xae   :  { %vm678_vm4 = vcmp.gt.f32.partialorder %v676_v12, %v675_v30 }
  0xb8   :  { %v1189_v8 = vpop.eup %1188 }
  0xb9   :  { %v1191_v40 = vpop.eup %1190  ;;  %v405_v18 = vmul.f32 %v1189_v8, %v1625_v3  ;;  %v415_v5 = vmul.f32 %v1189_v8, %v1634_v17  ;;  %v425_v14 = vmul.f32 %v1189_v8, %v1639_v24 }
  0xba   :  { %v1193_v27 = vpop.eup %1192  ;;  %v406_v47 = vmul.f32 %v1191_v40, %v1644_v29  ;;  %v416_v23 = vmul.f32 %v1191_v40, %v1651_v43  ;;  %v426_v35 = vmul.f32 %v1191_v40, %v1654_v51 }
  0xbb   :  { %v408_v9 = vmul.f32 %v1193_v27, %v1664_v54  ;;  %v418_v31 = vmul.f32 %v1193_v27, %v1666_v57  ;;  %v428_v44 = vmul.f32 %v1193_v27, %v1675_v1  ;;  %v667_v27 = vsel %vm666_vm7, 1, %v2633_v2 }
  0xbc   :  { %v407_v49 = vadd.f32 %v406_v47, %v405_v18  ;;  %v417_v22 = vadd.f32 %v416_v23, %v415_v5  ;;  %v427_v20 = vadd.f32 %v426_v35, %v425_v14  ;;  %v677_v18 = vadd.f32 %v2054_v11, %v1613_v61 }
  0xbd   :  { %v668_v5 = vmax.f32 %v663_v38, %v664_v21  ;;  %v680_v14 = vmax.f32 %v675_v30, %v676_v12  ;;  %v679_v47 = vsel %vm678_vm4, 1, %v2633_v2  ;;  %v689_v23 = vadd.f32 %v2004_v10, %v1558_v41  ;;  %v2145_v21 = vld [vmem:[%s2623_s1 + $0x30] sm:$0xff] }
  0xbe   :  { %v409_v52 = vadd.f32 %v408_v9, %v407_v49  ;;  %v419_v8 = vadd.f32 %v418_v31, %v417_v22  ;;  %v429_v40 = vadd.f32 %v428_v44, %v427_v20  ;;  %v690_v38 = vadd.f32 %v2009_v39, %v1590_v53 }
  0xbf   :  { %vm669_vm8 = vcmp.gt.f32.partialorder %v665_v7, %v668_v5  ;;  %v671_v35 = vmax.f32 %v668_v5, %v665_v7  ;;  %vm681_vm11 = vcmp.gt.f32.partialorder %v677_v18, %v680_v14  ;;  %v683_v44 = vmax.f32 %v680_v14, %v677_v18 }
  0xc0   :  { %1194 = vlog2.f32 %v409_v52  ;;  %v670_v9 = vsel %vm669_vm8, 2, %v667_v27  ;;  %v682_v31 = vsel %vm681_vm11, 2, %v679_v47  ;;  %v691_v12 = vadd.f32 %v2054_v11, %v1618_v63  ;;  %v2177_v27 = vld [vmem:[%s2622_s0 + $0xa0] sm:$0xff] }
  0xc1   :  { %1196 = vlog2.f32 %v419_v8  ;;  %v672_v49 = vsel %vm600_vm3, %v670_v9, 0  ;;  %v673_v22 = vadd.f32 %v2064_v42, %v671_v35  ;;  %v684_v20 = vsel %vm600_vm3, %v682_v31, 1 }
  0xc2   :  { %1198 = vlog2.f32 %v429_v40  ;;  %v685_v7 = vshll.u32 %v684_v20, 2  ;;  %v687_v30 = vadd.f32 %v2017_v28, %v683_v44  ;;  %v2154_v52 = vsel %vm600_vm3, %v1990_v62, %v1999_v6 }
  0xc3   :  { %v2159_v8 = vsel %vm600_vm3, %v673_v22, %v2004_v10  ;;  %vm692_vm12 = vcmp.gt.f32.partialorder %v690_v38, %v689_v23  ;;  %v694_v40 = vmax.f32 %v689_v23, %v690_v38  ;;  %vm718_vm14 = vcmp.eq.s32.totalorder %v2145_v21, 1  ;;  %v2172_v10 = vld [vmem:[%s2622_s0 + $0x98] sm:$0xff] }
  0xc4   :  { %v686_v18 = vor.u32 %v685_v7, %v672_v49  ;;  %v2164_v5 = vsel %vm600_vm3, %v687_v30, %v2009_v39  ;;  %v693_v14 = vsel %vm692_vm12, 1, %v2633_v2  ;;  %vm717_vm9 = vcmp.eq.s32.totalorder %v2145_v21, 0  ;;  %v2219_v30 = vld [vmem:[%s2622_s0 + $0x90] sm:$0xff] }
  0xc5   :  { %vm695_vm5 = vcmp.gt.f32.partialorder %v691_v12, %v694_v40  ;;  %v697_v62 = vmax.f32 %v694_v40, %v691_v12  ;;  %vm719_vm15 = vcmp.eq.s32.totalorder %v2154_v52, 0  ;;  %v723_v39 = vsel %vm718_vm14, %v1540_v37, %v1558_v41 }
  0xc6   :  { %v696_v6 = vsel %vm695_vm5, 2, %v693_v14  ;;  %v725_v47 = vsel %vm718_vm14, %v1585_v50, %v1590_v53  ;;  %vm720_vm0 = vcmp.eq.s32.totalorder %v2154_v52, 1  ;;  %v721_v9 = vsel %vm718_vm14, %v2172_v10, %v2177_v27 }
  0xc7   :  { %v698_v23 = vsel %vm600_vm3, %v696_v6, 2  ;;  %v701_v35 = vadd.f32 %v2022_v19, %v697_v62  ;;  %v724_v44 = vsel %vm717_vm9, %v1521_v33, %v723_v39  ;;  %v726_v49 = vsel %vm717_vm9, %v1573_v46, %v725_v47 }
  0xc8   :  { %v699_v31 = vshll.u32 %v698_v23, 4  ;;  %v727_v22 = vsel %vm718_vm14, %v1613_v61, %v1618_v63  ;;  %v722_v14 = vsel %vm717_vm9, %v2219_v30, %v721_v9 }
  0xc9   :  { %v2209_v20 = vsel %vm600_vm3, %v701_v35, %v2054_v11  ;;  %v728_v38 = vsel %vm717_vm9, %v1603_v58, %v727_v22 }
  0xca   :  { %v2214_v7 = vor.u32 %v699_v31, %v686_v18  ;;  %v729_v12 = vsel %vm720_vm0, %v726_v49, %v728_v38 }
  0xcb   :  { %v730_v11 = vsel %vm719_vm15, %v724_v44, %v729_v12 }
  0xcc   :  { %v731_v39 = vadd.f32 %v730_v11, %v2080_v34 }
  0xcd   :  { %v1195_v40 = vpop.eup %1194 }
  0xce   :  { %v1197_v62 = vpop.eup %1196  ;;  %v411_v6 = vmul.f32 0.6931472, %v1195_v40  ;;  %v732_v31 = vadd.f32 %v731_v39, %v722_v14 }
  0xcf   :  { %v1199_v18 = vpop.eup %1198  ;;  %v421_v47 = vmul.f32 0.6931472, %v1197_v62 }
  0xd0   :  { %v412_v23 = vadd.f32 %v411_v6, %v2102_v59  ;;  %v431_v35 = vmul.f32 0.6931472, %v1199_v18  ;;  %v2235_v44 = vsel %vm714_vm1, %v732_v31, %v2080_v34 }
  0xd1   :  { %v422_v49 = vadd.f32 %v421_v47, %v2102_v59 }
  0xd2   :  { %v413_v22 = vadd.f32 %v1534_v36, %v412_v23  ;;  %v432_v9 = vadd.f32 %v431_v35, %v2102_v59 }
  0xd3   :  { %v423_v38 = vadd.f32 %v1482_v25, %v422_v49 }
  0xd4   :  { %v2241_v12 = vsel %vm373_vm13, %v413_v22, %v2086_v55  ;;  %v433_v40 = vadd.f32 %v1487_v26, %v432_v9 }
  0xd5   :  { %v2247_v36 = vsel %vm373_vm13, %v423_v38, %v2092_v32 }
  0xd6   :  { %v2252_v59 = vsel %vm373_vm13, %v433_v40, %v2097_v13  ;;  %v508_v25 = vmax.f32 %v2241_v12, %v2247_v36 }
  0xd8   :  { %v2257_v34 = vmax.f32 %v508_v25, %v2252_v59 }
  0xda   :  { %v510_v55 = vsub.f32 %v2241_v12, %v2257_v34  ;;  %v513_v26 = vsub.f32 %v2247_v36, %v2257_v34  ;;  %v516_v32 = vsub.f32 %v2252_v59, %v2257_v34 }
  0xdc   :  { %v511_v14 = vmul.f32 1.442695, %v510_v55  ;;  %v514_v11 = vmul.f32 1.442695, %v513_v26  ;;  %v517_v62 = vmul.f32 1.442695, %v516_v32  ;;  %v776_v26 = vadd.f32 %v2159_v8, %v1521_v33 }
  0xdd   :  { %v777_v32 = vadd.f32 %v2164_v5, %v1573_v46 }
  0xde   :  { %1200 = vpow2.f32 %v511_v14  ;;  %v778_v14 = vadd.f32 %v2209_v20, %v1603_v58 }
  0xdf   :  { %1202 = vpow2.f32 %v514_v11  ;;  %v788_v11 = vadd.f32 %v2159_v8, %v1540_v37  ;;  %vm779_vm13 = vcmp.gt.f32.partialorder %v777_v32, %v776_v26 }
  0xe0   :  { %1204 = vpow2.f32 %v517_v62  ;;  %v789_v62 = vadd.f32 %v2164_v5, %v1585_v50 }
  0xe2   :  { %vm791_vm6 = vcmp.gt.f32.partialorder %v789_v62, %v788_v11 }
  0xeb   :  { %v1201_v13 = vpop.eup %1200 }
  0xec   :  { %v1203_v6 = vpop.eup %1202  ;;  %v519_v39 = vmul.f32 %v1201_v13, %v1625_v3  ;;  %v529_v18 = vmul.f32 %v1201_v13, %v1634_v17  ;;  %v539_v47 = vmul.f32 %v1201_v13, %v1639_v24 }
  0xed   :  { %v1205_v23 = vpop.eup %1204  ;;  %v520_v35 = vmul.f32 %v1203_v6, %v1644_v29  ;;  %v530_v31 = vmul.f32 %v1203_v6, %v1651_v43  ;;  %v540_v49 = vmul.f32 %v1203_v6, %v1654_v51 }
  0xee   :  { %v522_v22 = vmul.f32 %v1205_v23, %v1664_v54  ;;  %v532_v9 = vmul.f32 %v1205_v23, %v1666_v57  ;;  %v542_v38 = vmul.f32 %v1205_v23, %v1675_v1  ;;  %v793_v23 = vmax.f32 %v788_v11, %v789_v62 }
  0xef   :  { %v521_v40 = vadd.f32 %v520_v35, %v519_v39  ;;  %v531_v25 = vadd.f32 %v530_v31, %v529_v18  ;;  %v541_v55 = vadd.f32 %v540_v49, %v539_v47  ;;  %v790_v18 = vadd.f32 %v2209_v20, %v1613_v61 }
  0xf0   :  { %v781_v47 = vmax.f32 %v776_v26, %v777_v32  ;;  %v780_v35 = vsel %vm779_vm13, 1, %v2633_v2  ;;  %v792_v31 = vsel %vm791_vm6, 1, %v2633_v2  ;;  %v802_v49 = vadd.f32 %v2159_v8, %v1558_v41 }
  0xf1   :  { %v523_v13 = vadd.f32 %v522_v22, %v521_v40  ;;  %v533_v6 = vadd.f32 %v532_v9, %v531_v25  ;;  %v543_v39 = vadd.f32 %v542_v38, %v541_v55  ;;  %vm794_vm7 = vcmp.gt.f32.partialorder %v790_v18, %v793_v23 }
  0xf2   :  { %vm782_vm2 = vcmp.gt.f32.partialorder %v778_v14, %v781_v47  ;;  %v784_v22 = vmax.f32 %v781_v47, %v778_v14  ;;  %v795_v38 = vsel %vm794_vm7, 2, %v792_v31  ;;  %v796_v40 = vmax.f32 %v793_v23, %v790_v18  ;;  %v2300_v14 = vld [vmem:[%s2623_s1 + $0x38] sm:$0xff] }
  0xf3   :  { %1206 = vlog2.f32 %v523_v13  ;;  %v783_v9 = vsel %vm782_vm2, 2, %v780_v35  ;;  %v797_v26 = vsel %vm714_vm1, %v795_v38, 1  ;;  %v803_v32 = vadd.f32 %v2164_v5, %v1590_v53  ;;  %v2332_v31 = vld [vmem:[%s2622_s0 + $0xb8] sm:$0xff] }
  0xf4   :  { %1208 = vlog2.f32 %v533_v6  ;;  %v785_v25 = vsel %vm714_vm1, %v783_v9, 0  ;;  %v786_v55 = vadd.f32 %v2219_v30, %v784_v22  ;;  %v798_v11 = vshll.u32 %v797_v26, 2 }
  0xf5   :  { %1210 = vlog2.f32 %v543_v39  ;;  %v800_v62 = vadd.f32 %v2172_v10, %v796_v40  ;;  %v804_v13 = vadd.f32 %v2209_v20, %v1618_v63  ;;  %v2309_v6 = vsel %vm714_vm1, %v2145_v21, %v2154_v52 }
  0xf6   :  { %v2314_v39 = vsel %vm714_vm1, %v786_v55, %v2159_v8  ;;  %vm805_vm4 = vcmp.gt.f32.partialorder %v803_v32, %v802_v49  ;;  %v807_v18 = vmax.f32 %v802_v49, %v803_v32  ;;  %v799_v47 = vor.u32 %v798_v11, %v785_v25  ;;  %v2327_v8 = vld [vmem:[%s2622_s0 + $0xb0] sm:$0xff] }
  0xf7   :  { %v2319_v23 = vsel %vm714_vm1, %v800_v62, %v2164_v5  ;;  %v806_v35 = vsel %vm805_vm4, 1, %v2633_v2  ;;  %vm832_vm8 = vcmp.eq.s32.totalorder %v2300_v14, 1  ;;  %vm831_vm12 = vcmp.eq.s32.totalorder %v2300_v14, 0 }
  0xf8   :  { %vm808_vm11 = vcmp.gt.f32.partialorder %v804_v13, %v807_v18  ;;  %v810_v21 = vmax.f32 %v807_v18, %v804_v13  ;;  %vm833_vm14 = vcmp.eq.s32.totalorder %v2309_v6, 0  ;;  %v837_v5 = vsel %vm832_vm8, %v1540_v37, %v1558_v41  ;;  %v2374_v13 = vld [vmem:[%s2622_s0 + $0xa8] sm:$0xff] }
  0xf9   :  { %v809_v52 = vsel %vm808_vm11, 2, %v806_v35  ;;  %v839_v49 = vsel %vm832_vm8, %v1585_v50, %v1590_v53  ;;  %vm834_vm5 = vcmp.eq.s32.totalorder %v2309_v6, 1  ;;  %v835_v38 = vsel %vm832_vm8, %v2327_v8, %v2332_v31 }
  0xfa   :  { %v811_v22 = vsel %vm714_vm1, %v809_v52, 2  ;;  %v814_v9 = vadd.f32 %v2177_v27, %v810_v21  ;;  %v838_v25 = vsel %vm831_vm12, %v1521_v33, %v837_v5  ;;  %v840_v55 = vsel %vm831_vm12, %v1573_v46, %v839_v49 }
  0xfb   :  { %v812_v40 = vshll.u32 %v811_v22, 4  ;;  %v841_v26 = vsel %vm832_vm8, %v1613_v61, %v1618_v63  ;;  %v836_v21 = vsel %vm831_vm12, %v2374_v13, %v835_v38 }
  0xfc   :  { %v2364_v32 = vsel %vm714_vm1, %v814_v9, %v2209_v20  ;;  %v842_v11 = vsel %vm831_vm12, %v1603_v58, %v841_v26 }
  0xfd   :  { %v2369_v62 = vor.u32 %v812_v40, %v799_v47  ;;  %v843_v18 = vsel %vm834_vm5, %v840_v55, %v842_v11  ;;  %v2387_v11 = vld [vmem:[%s2624_s2] sm:$0xff]  ;;  %s1104_s2 = sld [smem:[#allocation8 + $0x1]] }
  0xfe   :  { %v844_v20 = vsel %vm833_vm14, %v838_v25, %v843_v18  ;;  %vm827_vm9 = vcmp.gt.s32.totalorder %v2387_v11, 7 }
  0xff   :  { %v845_v49 = vadd.f32 %v844_v20, %v2235_v44 }
 0x100   :  { %v1207_v35 = vpop.eup %1206 }
 0x101   :  { %v1209_v52 = vpop.eup %1208  ;;  %v525_v5 = vmul.f32 0.6931472, %v1207_v35  ;;  %v846_v26 = vadd.f32 %v845_v49, %v836_v21 }
 0x102   :  { %v1211_v47 = vpop.eup %1210  ;;  %v535_v22 = vmul.f32 0.6931472, %v1209_v52 }
 0x103   :  { %v526_v9 = vadd.f32 %v525_v5, %v2257_v34  ;;  %v545_v40 = vmul.f32 0.6931472, %v1211_v47  ;;  %v2395_v18 = vsel %vm827_vm9, %v846_v26, %v2235_v44 }
 0x104   :  { %v536_v55 = vadd.f32 %v535_v22, %v2257_v34 }
 0x105   :  { %v527_v38 = vadd.f32 %v1941_v60, %v526_v9  ;;  %v546_v25 = vadd.f32 %v545_v40, %v2257_v34 }
 0x106   :  { %v537_v35 = vadd.f32 %v1894_v56, %v536_v55 }
 0x107   :  { %v2401_v21 = vsel %vm486_vm10, %v527_v38, %v2241_v12  ;;  %v547_v20 = vadd.f32 %v1899_v45, %v546_v25 }
 0x108   :  { %v2407_v60 = vsel %vm486_vm10, %v537_v35, %v2247_v36  ;;  %v848_v35 = vsel %vm827_vm9, %v2300_v14, %v2309_v6  ;;  %v892_v14 = vadd.f32 %v2364_v32, %v1603_v58  ;;  %v902_v6 = vadd.f32 %v2314_v39, %v1540_v37 }
 0x109   :  { %v2412_v34 = vsel %vm486_vm10, %v547_v20, %v2252_v59  ;;  %v622_v56 = vmax.f32 %v2401_v21, %v2407_v60  ;;  %vm932_vm6 = vcmp.eq.s32.totalorder %v848_v35, 0  ;;  %vm933_vm7 = vcmp.eq.s32.totalorder %v848_v35, 1 }
 0x10b   :  { %v2417_v44 = vmax.f32 %v622_v56, %v2412_v34 }
 0x10d   :  { %v624_v12 = vsub.f32 %v2401_v21, %v2417_v44  ;;  %v627_v45 = vsub.f32 %v2407_v60, %v2417_v44  ;;  %v630_v36 = vsub.f32 %v2412_v34, %v2417_v44 }
 0x10f   :  { %v625_v52 = vmul.f32 1.442695, %v624_v12  ;;  %v628_v5 = vmul.f32 1.442695, %v627_v45  ;;  %v631_v49 = vmul.f32 1.442695, %v630_v36  ;;  %v2438_v45 = vstv %s1104_s2 }
 0x111   :  { %1212 = vpow2.f32 %v625_v52 }
 0x112   :  { %1214 = vpow2.f32 %v628_v5 }
 0x113   :  { %1216 = vpow2.f32 %v631_v49  ;;  %v890_v49 = vadd.f32 %v2314_v39, %v1521_v33  ;;  %v904_v33 = vadd.f32 %v2364_v32, %v1613_v61 }
 0x11e   :  { %v1213_v59 = vpop.eup %1212 }
 0x11f   :  { %v1215_v47 = vpop.eup %1214  ;;  %v633_v22 = vmul.f32 %v1213_v59, %v1625_v3  ;;  %v643_v9 = vmul.f32 %v1213_v59, %v1634_v17  ;;  %v653_v40 = vmul.f32 %v1213_v59, %v1639_v24  ;;  %v891_v59 = vadd.f32 %v2319_v23, %v1573_v46 }
 0x120   :  { %v1217_v26 = vpop.eup %1216  ;;  %v634_v55 = vmul.f32 %v1215_v47, %v1644_v29  ;;  %v644_v38 = vmul.f32 %v1215_v47, %v1651_v43  ;;  %v654_v25 = vmul.f32 %v1215_v47, %v1654_v51  ;;  %v903_v47 = vadd.f32 %v2319_v23, %v1585_v50 }
 0x121   :  { %v636_v20 = vmul.f32 %v1217_v26, %v1664_v54  ;;  %v646_v56 = vmul.f32 %v1217_v26, %v1666_v57  ;;  %v656_v12 = vmul.f32 %v1217_v26, %v1675_v1  ;;  %vm893_vm10 = vcmp.gt.f32.partialorder %v891_v59, %v890_v49 }
 0x122   :  { %v635_v36 = vadd.f32 %v634_v55, %v633_v22  ;;  %v645_v52 = vadd.f32 %v644_v38, %v643_v9  ;;  %v655_v5 = vadd.f32 %v654_v25, %v653_v40  ;;  %v895_v46 = vmax.f32 %v890_v49, %v891_v59 }
 0x123   :  { %vm905_vm15 = vcmp.gt.f32.partialorder %v903_v47, %v902_v6  ;;  %v907_v58 = vmax.f32 %v902_v6, %v903_v47  ;;  %v894_v37 = vsel %vm893_vm10, 1, %v2633_v2  ;;  %v916_v50 = vadd.f32 %v2314_v39, %v1558_v41 }
 0x124   :  { %v637_v22 = vadd.f32 %v636_v20, %v635_v36  ;;  %v647_v9 = vadd.f32 %v646_v56, %v645_v52  ;;  %v657_v40 = vadd.f32 %v656_v12, %v655_v5  ;;  %v906_v26 = vsel %vm905_vm15, 1, %v2633_v2 }
 0x125   :  { %vm896_vm0 = vcmp.gt.f32.partialorder %v892_v14, %v895_v46  ;;  %v898_v55 = vmax.f32 %v895_v46, %v892_v14  ;;  %vm908_vm13 = vcmp.gt.f32.partialorder %v904_v33, %v907_v58  ;;  %v910_v25 = vmax.f32 %v907_v58, %v904_v33 }
 0x126   :  { %1218 = vlog2.f32 %v637_v22  ;;  %v897_v61 = vsel %vm896_vm0, 2, %v894_v37  ;;  %v909_v38 = vsel %vm908_vm13, 2, %v906_v26  ;;  %v917_v41 = vadd.f32 %v2319_v23, %v1590_v53 }
 0x127   :  { %1220 = vlog2.f32 %v647_v9  ;;  %v899_v20 = vsel %vm827_vm9, %v897_v61, 0  ;;  %v900_v56 = vadd.f32 %v2374_v13, %v898_v55  ;;  %v911_v12 = vsel %vm827_vm9, %v909_v38, 1 }
 0x128   :  { %1222 = vlog2.f32 %v657_v40  ;;  %v912_v36 = vshll.u32 %v911_v12, 2  ;;  %v914_v52 = vadd.f32 %v2327_v8, %v910_v25  ;;  %v918_v5 = vadd.f32 %v2364_v32, %v1618_v63 }
 0x129   :  { %v901_v49 = vsel %vm827_vm9, %v900_v56, %v2314_v39  ;;  %vm919_vm2 = vcmp.gt.f32.partialorder %v917_v41, %v916_v50  ;;  %v921_v59 = vmax.f32 %v916_v50, %v917_v41  ;;  %v2478_v47 = vstv %s2450_s30 }
 0x12a   :  { %v913_v14 = vor.u32 %v912_v36, %v899_v20  ;;  %v915_v53 = vsel %vm827_vm9, %v914_v52, %v2319_v23  ;;  %v920_v6 = vsel %vm919_vm2, 1, %v2633_v2  ;;  %v936_v63 = vsel %vm933_vm7, %v2438_v45, %v2478_v47 }
 0x12b   :  { %vm922_vm4 = vcmp.gt.f32.partialorder %v918_v5, %v921_v59  ;;  %v924_v22 = vmax.f32 %v921_v59, %v918_v5  ;;  %v2483_v9 = vstv %s2454_s9  ;;  %v962_v36 = vadd.f32 %v2438_v45, %v915_v53 }
 0x12c   :  { %v923_v39 = vsel %vm922_vm4, 2, %v920_v6  ;;  %v938_v40 = vsel %vm932_vm6, %v2483_v9, %v936_v63  ;;  %v961_v41 = vadd.f32 %v2483_v9, %v901_v49 }
 0x12d   :  { %v925_v35 = vsel %vm827_vm9, %v923_v39, 2  ;;  %v928_v33 = vadd.f32 %v2332_v31, %v924_v22  ;;  %v2490_v23 = vadd.f32 %v938_v40, %v2395_v18  ;;  %v989_v40 = vshra.s32 %v2369_v62, 4 }
 0x12e   :  { %v926_v46 = vshll.u32 %v925_v35, 4  ;;  %vm964_vm8 = vcmp.gt.f32.partialorder %v962_v36, %v961_v41 }
 0x12f   :  { %v929_v58 = vsel %vm827_vm9, %v928_v33, %v2364_v32 }
 0x130   :  { %v927_v37 = vor.u32 %v926_v46, %v913_v14  ;;  %v963_v59 = vadd.f32 %v2478_v47, %v929_v58  ;;  %v966_v14 = vmax.f32 %v961_v41, %v962_v36  ;;  %v986_v58 = vand.u32 3, %v2369_v62 }
 0x131   :  { %v1013_v36 = vshra.s32 %v2059_v16, 4 }
 0x132   :  { %v977_v49 = vshra.s32 %v927_v37, 4  ;;  %vm967_vm11 = vcmp.gt.f32.partialorder %v963_v59, %v966_v14  ;;  %v974_v63 = vand.u32 3, %v927_v37  ;;  %v1025_v59 = vshra.s32 %v1933_v0, 4 }
 0x133   :  { %v1219_v26 = vpop.eup %1218 }
 0x134   :  { %v1221_v50 = vpop.eup %1220  ;;  %v639_v55 = vmul.f32 0.6931472, %v1219_v26  ;;  %v978_v22 = vand.u32 3, %v977_v49  ;;  %v990_v26 = vand.u32 3, %v989_v40  ;;  %v1014_v49 = vand.u32 3, %v1013_v36 }
 0x135   :  { %v1223_v61 = vpop.eup %1222  ;;  %v649_v38 = vmul.f32 0.6931472, %v1221_v50 }
 0x136   :  { %v640_v25 = vadd.f32 %v639_v55, %v2417_v44  ;;  %v659_v20 = vmul.f32 0.6931472, %v1223_v61 }
 0x137   :  { %v650_v56 = vadd.f32 %v649_v38, %v2417_v44 }
 0x138   :  { %v641_v12 = vadd.f32 %v2064_v42, %v640_v25  ;;  %v660_v18 = vadd.f32 %v659_v20, %v2417_v44  ;;  %v975_v44 = vshra.s32 %v927_v37, 2  ;;  %v999_v25 = vshra.s32 %v2214_v7, 2 }
 0x139   :  { %v651_v32 = vadd.f32 %v2017_v28, %v650_v56  ;;  %v1001_v20 = vshra.s32 %v2214_v7, 4 }
 0x13a   :  { %v2505_v52 = vsel %vm600_vm3, %v641_v12, %v2401_v21  ;;  %v661_v5 = vadd.f32 %v2022_v19, %v660_v18  ;;  %v965_v19 = vsel %vm964_vm8, 1, %v2633_v2  ;;  %v976_v6 = vand.u32 3, %v975_v44 }
 0x13b   :  { %v2512_v42 = vsel %vm600_vm3, %v651_v32, %v2407_v60  ;;  %v968_v53 = vsel %vm967_vm11, 2, %v965_v19  ;;  %v1011_v12 = vshra.s32 %v2059_v16, 2  ;;  %v1000_v18 = vand.u32 3, %v999_v25 }
 0x13c   :  { %v2517_v28 = vsel %vm600_vm3, %v661_v5, %v2412_v34  ;;  %v735_v21 = vmax.f32 %v2505_v52, %v2512_v42  ;;  %1152 = vst [vmem:[%s2630_s8 + $0x38] sm:$0xff] %v968_v53  ;;  %vm973_vm12 = vcmp.eq.s32.totalorder %v968_v53, 1  ;;  %v987_v34 = vshra.s32 %v2369_v62, 2 }
 0x13d   :  { %vm972_vm3 = vcmp.eq.s32.totalorder %v968_v53, 0  ;;  %v979_v39 = vsel %vm973_vm12, %v976_v6, %v978_v22  ;;  %v998_v62 = vand.u32 3, %v2214_v7  ;;  %v1002_v41 = vand.u32 3, %v1001_v20 }
 0x13e   :  { %v2523_v60 = vmax.f32 %v735_v21, %v2517_v28  ;;  %v980_v46 = vsel %vm972_vm3, %v974_v63, %v979_v39  ;;  %v988_v37 = vand.u32 3, %v987_v34  ;;  %v1012_v32 = vand.u32 3, %v1011_v12 }
 0x13f   :  { %1153 = vst [vmem:[%s2630_s8 + $0x30] sm:$0xff] %v980_v46  ;;  %vm985_vm14 = vcmp.eq.s32.totalorder %v980_v46, 1  ;;  %vm984_vm5 = vcmp.eq.s32.totalorder %v980_v46, 0  ;;  %v1023_v5 = vshra.s32 %v1933_v0, 2  ;;  %v1010_v44 = vand.u32 3, %v2059_v16 }
 0x140   :  { %v737_v2 = vsub.f32 %v2505_v52, %v2523_v60  ;;  %v740_v35 = vsub.f32 %v2512_v42, %v2523_v60  ;;  %v743_v33 = vsub.f32 %v2517_v28, %v2523_v60  ;;  %v991_v38 = vsel %vm985_vm14, %v988_v37, %v990_v26 }
 0x141   :  { %v992_v56 = vsel %vm984_vm5, %v986_v58, %v991_v38  ;;  %v1024_v19 = vand.u32 3, %v1023_v5  ;;  %v1026_v7 = vand.u32 3, %v1025_v59  ;;  %v1035_v53 = vshra.s32 %v1813_v48, 2 }
 0x142   :  { %v738_v50 = vmul.f32 1.442695, %v737_v2  ;;  %v741_v55 = vmul.f32 1.442695, %v740_v35  ;;  %v744_v61 = vmul.f32 1.442695, %v743_v33 }
 0x143   :  { %1154 = vst [vmem:[%s2630_s8 + $0x28] sm:$0xff] %v992_v56  ;;  %vm997_vm10 = vcmp.eq.s32.totalorder %v992_v56, 1  ;;  %vm996_vm15 = vcmp.eq.s32.totalorder %v992_v56, 0  ;;  %v1022_v22 = vand.u32 3, %v1933_v0  ;;  %v1037_v63 = vshra.s32 %v1813_v48, 4 }
 0x144   :  { %1224 = vpow2.f32 %v738_v50  ;;  %v1003_v14 = vsel %vm997_vm10, %v1000_v18, %v1002_v41  ;;  %v1036_v16 = vand.u32 3, %v1035_v53  ;;  %v1034_v2 = vand.u32 3, %v1813_v48 }
 0x145   :  { %1226 = vpow2.f32 %v741_v55  ;;  %v1004_v21 = vsel %vm996_vm15, %v998_v62, %v1003_v14  ;;  %v1038_v39 = vand.u32 3, %v1037_v63  ;;  %v1047_v35 = vshra.s32 %v1709_v4, 2 }
 0x146   :  { %1228 = vpow2.f32 %v744_v61  ;;  %1155 = vst [vmem:[%s2630_s8 + $0x20] sm:$0xff] %v1004_v21  ;;  %vm1008_vm0 = vcmp.eq.s32.totalorder %v1004_v21, 0  ;;  %vm1009_vm13 = vcmp.eq.s32.totalorder %v1004_v21, 1  ;;  %v1049_v33 = vshra.s32 %v1709_v4, 4 }
 0x147   :  { %v1015_v6 = vsel %vm1009_vm13, %v1012_v32, %v1014_v49  ;;  %v1046_v37 = vand.u32 3, %v1709_v4  ;;  %v1048_v26 = vand.u32 3, %v1047_v35 }
 0x148   :  { %v1016_v34 = vsel %vm1008_vm0, %v1010_v44, %v1015_v6  ;;  %v1050_v50 = vand.u32 3, %v1049_v33 }
 0x149   :  { %1156 = vst [vmem:[%s2630_s8 + $0x18] sm:$0xff] %v1016_v34  ;;  %vm1020_vm6 = vcmp.eq.s32.totalorder %v1016_v34, 0  ;;  %vm1021_vm2 = vcmp.eq.s32.totalorder %v1016_v34, 1 }
 0x14a   :  { %v1027_v40 = vsel %vm1021_vm2, %v1024_v19, %v1026_v7 }
 0x14b   :  { %v1028_v46 = vsel %vm1020_vm6, %v1022_v22, %v1027_v40 }
 0x14c   :  { %1157 = vst [vmem:[%s2630_s8 + $0x10] sm:$0xff] %v1028_v46  ;;  %vm1032_vm7 = vcmp.eq.s32.totalorder %v1028_v46, 0  ;;  %vm1033_vm4 = vcmp.eq.s32.totalorder %v1028_v46, 1 }
 0x14d   :  { %v1039_v58 = vsel %vm1033_vm4, %v1036_v16, %v1038_v39 }
 0x14e   :  { %v1040_v25 = vsel %vm1032_vm7, %v1034_v2, %v1039_v58 }
 0x14f   :  { %1158 = vst [vmem:[%s2630_s8 + $0x8] sm:$0xff] %v1040_v25  ;;  %vm1044_vm8 = vcmp.eq.s32.totalorder %v1040_v25, 0  ;;  %vm1045_vm11 = vcmp.eq.s32.totalorder %v1040_v25, 1 }
 0x150   :  { %v1051_v59 = vsel %vm1045_vm11, %v1048_v26, %v1050_v50 }
 0x151   :  { %v1225_v0 = vpop.eup %1224  ;;  %v1052_v14 = vsel %vm1044_vm8, %v1046_v37, %v1051_v59 }
 0x152   :  { %v1227_v55 = vpop.eup %1226  ;;  %v746_v48 = vmul.f32 %v1225_v0, %v1625_v3  ;;  %v756_v61 = vmul.f32 %v1225_v0, %v1634_v17  ;;  %v766_v38 = vmul.f32 %v1225_v0, %v1639_v24  ;;  %1053 = vst [vmem:[%s2630_s8] sm:$0xff] %v1052_v14 }
 0x153   :  { %v1229_v20 = vpop.eup %1228  ;;  %v747_v56 = vmul.f32 %v1227_v55, %v1644_v29  ;;  %v757_v12 = vmul.f32 %v1227_v55, %v1651_v43  ;;  %v767_v62 = vmul.f32 %v1227_v55, %v1654_v51 }
 0x154   :  { %v749_v4 = vmul.f32 %v1229_v20, %v1664_v54  ;;  %v759_v18 = vmul.f32 %v1229_v20, %v1666_v57  ;;  %v769_v41 = vmul.f32 %v1229_v20, %v1675_v1 }
 0x155   :  { %v748_v36 = vadd.f32 %v747_v56, %v746_v48  ;;  %v758_v32 = vadd.f32 %v757_v12, %v756_v61  ;;  %v768_v5 = vadd.f32 %v767_v62, %v766_v38 }
 0x157   :  { %v750_v44 = vadd.f32 %v749_v4, %v748_v36  ;;  %v760_v49 = vadd.f32 %v759_v18, %v758_v32  ;;  %v770_v21 = vadd.f32 %v769_v41, %v768_v5 }
 0x159   :  { %1230 = vlog2.f32 %v750_v44 }
 0x15a   :  { %1232 = vlog2.f32 %v760_v49 }
 0x15b   :  { %1234 = vlog2.f32 %v770_v21 }
 0x166   :  { %v1231_v19 = vpop.eup %1230 }
 0x167   :  { %v1233_v7 = vpop.eup %1232  ;;  %v752_v53 = vmul.f32 0.6931472, %v1231_v19 }
 0x168   :  { %v1235_v6 = vpop.eup %1234  ;;  %v762_v22 = vmul.f32 0.6931472, %v1233_v7 }
 0x169   :  { %v753_v63 = vadd.f32 %v752_v53, %v2523_v60  ;;  %v772_v34 = vmul.f32 0.6931472, %v1235_v6 }
 0x16a   :  { %v763_v16 = vadd.f32 %v762_v22, %v2523_v60 }
 0x16b   :  { %v754_v39 = vadd.f32 %v2219_v30, %v753_v63  ;;  %v773_v40 = vadd.f32 %v772_v34, %v2523_v60 }
 0x16c   :  { %v764_v2 = vadd.f32 %v2172_v10, %v763_v16 }
 0x16d   :  { %v755_v35 = vsel %vm714_vm1, %v754_v39, %v2505_v52  ;;  %v774_v33 = vadd.f32 %v2177_v27, %v773_v40 }
 0x16e   :  { %v765_v46 = vsel %vm714_vm1, %v764_v2, %v2512_v42 }
 0x16f   :  { %v775_v0 = vsel %vm714_vm1, %v774_v33, %v2517_v28  ;;  %v849_v58 = vmax.f32 %v755_v35, %v765_v46 }
 0x171   :  { %v850_v30 = vmax.f32 %v849_v58, %v775_v0 }
 0x173   :  { %v851_v37 = vsub.f32 %v755_v35, %v850_v30  ;;  %v854_v60 = vsub.f32 %v765_v46, %v850_v30  ;;  %v857_v26 = vsub.f32 %v775_v0, %v850_v30 }
 0x175   :  { %v852_v10 = vmul.f32 1.442695, %v851_v37  ;;  %v855_v50 = vmul.f32 1.442695, %v854_v60  ;;  %v858_v55 = vmul.f32 1.442695, %v857_v26 }
 0x177   :  { %1236 = vpow2.f32 %v852_v10 }
 0x178   :  { %1238 = vpow2.f32 %v855_v50 }
 0x179   :  { %1240 = vpow2.f32 %v858_v55 }
 0x184   :  { %v1237_v27 = vpop.eup %1236 }
 0x185   :  { %v1239_v52 = vpop.eup %1238  ;;  %v860_v48 = vmul.f32 %v1237_v27, %v1625_v3  ;;  %v870_v42 = vmul.f32 %v1237_v27, %v1634_v17  ;;  %v880_v15 = vmul.f32 %v1237_v27, %v1639_v24 }
 0x186   :  { %v1241_v28 = vpop.eup %1240  ;;  %v861_v61 = vmul.f32 %v1239_v52, %v1644_v29  ;;  %v871_v38 = vmul.f32 %v1239_v52, %v1651_v43  ;;  %v881_v25 = vmul.f32 %v1239_v52, %v1654_v51 }
 0x187   :  { %v863_v20 = vmul.f32 %v1241_v28, %v1664_v54  ;;  %v873_v56 = vmul.f32 %v1241_v28, %v1666_v57  ;;  %v883_v12 = vmul.f32 %v1241_v28, %v1675_v1 }
 0x188   :  { %v862_v62 = vadd.f32 %v861_v61, %v860_v48  ;;  %v872_v4 = vadd.f32 %v871_v38, %v870_v42  ;;  %v882_v3 = vadd.f32 %v881_v25, %v880_v15 }
 0x18a   :  { %v864_v18 = vadd.f32 %v863_v20, %v862_v62  ;;  %v874_v17 = vadd.f32 %v873_v56, %v872_v4  ;;  %v884_v41 = vadd.f32 %v883_v12, %v882_v3 }
 0x18c   :  { %1242 = vlog2.f32 %v864_v18 }
 0x18d   :  { %1244 = vlog2.f32 %v874_v17 }
 0x18e   :  { %1246 = vlog2.f32 %v884_v41 }
 0x199   :  { %v1243_v24 = vpop.eup %1242 }
 0x19a   :  { %v1245_v29 = vpop.eup %1244  ;;  %v866_v43 = vmul.f32 0.6931472, %v1243_v24 }
 0x19b   :  { %v1247_v36 = vpop.eup %1246  ;;  %v876_v51 = vmul.f32 0.6931472, %v1245_v29 }
 0x19c   :  { %v867_v32 = vadd.f32 %v866_v43, %v850_v30  ;;  %v886_v54 = vmul.f32 0.6931472, %v1247_v36 }
 0x19d   :  { %v877_v5 = vadd.f32 %v876_v51, %v850_v30 }
 0x19e   :  { %v868_v57 = vadd.f32 %v2374_v13, %v867_v32  ;;  %v887_v1 = vadd.f32 %v886_v54, %v850_v30 }
 0x19f   :  { %v878_v59 = vadd.f32 %v2327_v8, %v877_v5 }
 0x1a0   :  { %v869_v14 = vsel %vm827_vm9, %v868_v57, %v755_v35  ;;  %v888_v44 = vadd.f32 %v2332_v31, %v887_v1 }
 0x1a1   :  { %v879_v49 = vsel %vm827_vm9, %v878_v59, %v765_v46  ;;  %v940_v21 = vadd.f32 %v2483_v9, %v869_v14 }
 0x1a2   :  { %v889_v19 = vsel %vm827_vm9, %v888_v44, %v775_v0  ;;  %v941_v7 = vadd.f32 %v2438_v45, %v879_v49 }
 0x1a3   :  { %v942_v13 = vadd.f32 %v2478_v47, %v889_v19 }
 0x1a4   :  { %v943_v53 = vmax.f32 %v940_v21, %v941_v7 }
 0x1a6   :  { %v944_v6 = vmax.f32 %v943_v53, %v942_v13 }
 0x1a8   :  { %v945_v8 = vsub.f32 %v940_v21, %v944_v6  ;;  %v948_v22 = vsub.f32 %v941_v7, %v944_v6  ;;  %v952_v63 = vsub.f32 %v942_v13, %v944_v6 }
 0x1aa   :  { %v946_v34 = vmul.f32 1.442695, %v945_v8  ;;  %v949_v16 = vmul.f32 1.442695, %v948_v22  ;;  %v953_v31 = vmul.f32 1.442695, %v952_v63 }
 0x1ac   :  { %1248 = vpow2.f32 %v946_v34 }
 0x1ad   :  { %1250 = vpow2.f32 %v949_v16 }
 0x1ae   :  { %1252 = vpow2.f32 %v953_v31 }
 0x1b9   :  { %v1249_v39 = vpop.eup %1248 }
 0x1ba   :  { %v1251_v9 = vpop.eup %1250 }
 0x1bb   :  { %v1253_v40 = vpop.eup %1252  ;;  %v951_v11 = vadd.f32 %v1251_v9, %v1249_v39 }
 0x1bd   :  { %v955_v2 = vadd.f32 %v1253_v40, %v951_v11 }
 0x1bf   :  { %1254 = vlog2.f32 %v955_v2 }
 0x1cc   :  { %v1255_v45 = vpop.eup %1254 }
 0x1cd   :  { %v957_v35 = vmul.f32 0.6931472, %v1255_v45 }
 0x1cf   :  { %v958_v47 = vadd.f32 %v957_v35, %v944_v6 }
 0x1d1   :  { %v959_v33 = vsub.f32 %v2490_v23, %v958_v47 }
 0x1d3   :  { %960 = vst [vmem:[%s2629_s7] sm:$0xff] %v959_v33 }
 0x1d4   :  { %1062 = vsyncpa [#allocation4], 1 }
 0x1d5   :  { %1063 = vsyncpa [#allocation6], 1 }
 0x1d6   :  { %1064 = vsyncpa [#allocation9], 1 }

</bundles_post_ra>
